<compile_context>
chip_gen: v5e
topology: v5e:2x2
jax: 0.10.0
libtpu: 0.0.40
codegen_flags: <defaults>
</compile_context>

<pallas_src>
import numpy as np
import jax
import jax.numpy as jnp
from jax.experimental import pallas as pl
from jax.experimental.pallas import tpu as pltpu

# ---- problem sizes (small, consistent with the module) ------------------
N, H, W = 2, 16, 16
CIN, COUT = 16, 32
CR = COUT // 16          # ChannelAttention reduction dim = 2
HW = H * W
K3, K7 = 3, 7
M3OFF = 2 * K7 * K7      # mask pack: rows [0, 98) = SA weighted masks, rows [98, 107) = 3x3 masks
BN_EPS = 1e-5


def residual_block_kernel(x_ref, w1sk_ref, w2_ref, sm_ref, mk_ref, o_ref, col1, col2):
    f32, bf16 = jnp.float32, jnp.bfloat16
    x = x_ref[...]                                                    # (CIN, HW) f32

    # ------- conv1 (3x3, pad=1) + skip (1x1) fused into ONE bf16 MXU dot -------
    # im2col via roll+mask; max |shift| = W+1 = 17 << HW so rolled taps never alias.
    for dy in range(K3):
        for dx in range(K3):
            t = dy * K3 + dx
            d = (dy - 1) * W + (dx - 1)
            if d == 0:
                win = x
            else:
                win = pltpu.roll(x, (-d) % HW, 1) * mk_ref[M3OFF + t:M3OFF + t + 1, :]
            col1[t * CIN:(t + 1) * CIN, :] = win.astype(bf16)
    fused = (jnp.dot(w1sk_ref[...], col1[...], preferred_element_type=f32)
             + sm_ref[:, 0:1])                                        # (2*COUT, HW)
    act1 = jnp.maximum(fused[:COUT, :], 0.0)                          # ReLU(BN1(conv1(x)))
    skip = fused[COUT:, :]                                            # BNsk(conv_sk(x))

    # ------- conv2 (3x3, pad=1) + BN2 (scale folded, bias added) ---------------
    for dy in range(K3):
        for dx in range(K3):
            t = dy * K3 + dx
            d = (dy - 1) * W + (dx - 1)
            if d == 0:
                win = act1
            else:
                win = pltpu.roll(act1, (-d) % HW, 1) * mk_ref[M3OFF + t:M3OFF + t + 1, :]
            col2[t * COUT:(t + 1) * COUT, :] = win.astype(bf16)
    out2 = (jnp.dot(w2_ref[...], col2[...], preferred_element_type=f32)
            + sm_ref[:COUT, 1:2])                                     # (COUT, HW)

    # ------- channel attention: VPU/XLU only (no lane-sparse MXU dots) ---------
    avg_p = jnp.mean(out2, axis=1, keepdims=True)                     # (COUT, 1)
    max_p = jnp.max(out2, axis=1, keepdims=True)                      # (COUT, 1)
    pooled = jnp.concatenate([avg_p, max_p], axis=1)                  # (COUT, 2)
    capre = jnp.zeros((COUT, 2), f32)
    for r in range(CR):                                               # CR = 2 hidden units
        h_r = jnp.maximum(
            jnp.sum(sm_ref[:COUT, 2 + r:3 + r] * pooled, axis=0, keepdims=True), 0.0)  # (1, 2)
        capre = capre + sm_ref[:COUT, 2 + CR + r:3 + CR + r] * h_r    # (COUT, 2)
    ca = jax.nn.sigmoid(capre[:, 0:1] + capre[:, 1:2])                # (COUT, 1)
    out_ca = out2 * ca                                                # lane broadcast

    # ------- spatial attention: per-tap VPU accumulation (weights baked in masks) ----
    sa_avg = jnp.mean(out_ca, axis=0, keepdims=True)                  # (1, HW)
    sa_max = jnp.max(out_ca, axis=0, keepdims=True)                   # (1, HW)
    stacked = jnp.concatenate([sa_avg, sa_max], axis=0)               # (2, HW)
    sa_acc = jnp.zeros((2, HW), f32)
    for dy in range(K7):
        for dx in range(K7):
            t = dy * K7 + dx
            d = (dy - 3) * W + (dx - 3)
            win = stacked if d == 0 else pltpu.roll(stacked, (-d) % HW, 1)
            sa_acc = sa_acc + win * mk_ref[2 * t:2 * t + 2, :]        # weight*mask per tap
    sa_pre = sa_acc[0:1, :] + sa_acc[1:2, :]                          # (1, HW)
    out_sa = out_ca * jax.nn.sigmoid(sa_pre)                          # sublane broadcast

    # ------- add skip, final ReLU ------------------------------------------------
    o_ref[...] = jnp.maximum(out_sa + skip, 0.0)


@jax.jit
def residual_block(x_nchw, p):
    # NCHW -> (N, C, H*W): pure reshape, no transpose needed for the (C, HW) kernel layout.
    x_flat = x_nchw.reshape(N, CIN, HW).astype(jnp.float32)

    def full(shape):
        ndim = len(shape)
        return pl.BlockSpec(shape, lambda b, _n=ndim: (0,) * _n)

    out = pl.pallas_call(
        residual_block_kernel,
        out_shape=jax.ShapeDtypeStruct((N, COUT, HW), jnp.float32),
        grid=(N,),
        in_specs=[
            pl.BlockSpec((None, CIN, HW), lambda b: (b, 0, 0)),       # x           (CIN, HW)
            full((2 * COUT, K3 * K3 * CIN)),                          # fused conv1+skip weight, bf16
            full((COUT, K3 * K3 * COUT)),                             # conv2 weight (s2 folded), bf16
            full((2 * COUT, 2 + 2 * CR)),                             # biases + channel-attn weights
            full((2 * K7 * K7 + K3 * K3, HW)),                        # SA weighted masks + 3x3 masks
        ],
        out_specs=pl.BlockSpec((None, COUT, HW), lambda b: (b, 0, 0)),
        scratch_shapes=[
            pltpu.VMEM((K3 * K3 * CIN, HW), jnp.bfloat16),            # im2col conv1 (144, 256)
            pltpu.VMEM((K3 * K3 * COUT, HW), jnp.bfloat16),           # im2col conv2 (288, 256)
        ],
        compiler_params=pltpu.CompilerParams(dimension_semantics=("parallel",)),
    )(x_flat, p['w1sk'], p['w2ms'], p['smallpk'], p['maskpk'])

    return out.reshape(N, COUT, H, W)                                 # already NCHW


# ------------------------ tap validity masks (host-side constants) --------
def tap_masks(K):
    pad = K // 2
    ls = np.arange(HW)
    hh, ww = ls // W, ls % W
    m = np.zeros((K * K, HW), np.float32)
    for dy in range(K):
        for dx in range(K):
            ddy, ddx = dy - pad, dx - pad
            ok = (hh + ddy >= 0) & (hh + ddy < H) & (ww + ddx >= 0) & (ww + ddx < W)
            m[dy * K + dx] = ok.astype(np.float32)
    return jnp.asarray(m)


# ------------------------ parameters (deterministic) ----------------------
def make_params(key):
    ks = jax.random.split(key, 7)
    w1 = jax.random.normal(ks[0], (K3, K3, CIN, COUT), jnp.float32) * 0.1   # HWIO
    w2 = jax.random.normal(ks[1], (K3, K3, COUT, COUT), jnp.float32) * 0.05
    caw1 = jax.random.normal(ks[2], (COUT, CR), jnp.float32) * 0.3
    caw2 = jax.random.normal(ks[3], (CR, COUT), jnp.float32) * 0.3
    saw = jax.random.normal(ks[4], (K7, K7, 2, 1), jnp.float32) * 0.1
    wsk = jax.random.normal(ks[5], (CIN, COUT), jnp.float32) * 0.2

    kbn = jax.random.split(ks[6], 12)

    def bn(k4):
        gamma = 1.0 + 0.2 * jax.random.normal(k4[0], (COUT,), jnp.float32)
        beta = 0.1 * jax.random.normal(k4[1], (COUT,), jnp.float32)
        mean = 0.1 * jax.random.normal(k4[2], (COUT,), jnp.float32)
        var = jax.random.uniform(k4[3], (COUT,), jnp.float32, minval=0.5, maxval=1.5)
        scale = gamma * jax.lax.rsqrt(var + BN_EPS)
        bias = beta - mean * scale
        return scale, bias

    s1, b1 = bn(kbn[0:4])
    s2, b2 = bn(kbn[4:8])
    ssk, bsk = bn(kbn[8:12])

    # ---- kernel-layout params: BN scales folded into weights, skip fused into conv1 ----
    w1m = jnp.transpose(w1, (3, 0, 1, 2)).reshape(COUT, K3 * K3 * CIN) * s1[:, None]
    wsk_sc = wsk.T * ssk[:, None]                                     # (COUT, CIN), ssk folded
    w1sk = jnp.zeros((2 * COUT, K3 * K3 * CIN), jnp.float32)
    w1sk = w1sk.at[:COUT, :].set(w1m)
    w1sk = w1sk.at[COUT:, 4 * CIN:5 * CIN].set(wsk_sc)                # center tap (dy=dx=1) block
    w1sk = w1sk.astype(jnp.bfloat16)

    w2ms = (jnp.transpose(w2, (3, 0, 1, 2)).reshape(COUT, K3 * K3 * COUT)
            * s2[:, None]).astype(jnp.bfloat16)

    # biases + channel-attention weights packed into one (2*COUT, 6) array:
    #   col 0: [b1 ; bsk]   col 1: [b2 ; 0]   cols 2..3: caw1 (COUT,CR)   cols 4..5: caw2^T
    smallpk = jnp.zeros((2 * COUT, 2 + 2 * CR), jnp.float32)
    smallpk = smallpk.at[:COUT, 0].set(b1).at[COUT:, 0].set(bsk)
    smallpk = smallpk.at[:COUT, 1].set(b2)
    smallpk = smallpk.at[:COUT, 2:2 + CR].set(caw1)
    smallpk = smallpk.at[:COUT, 2 + CR:2 + 2 * CR].set(caw2.T)

    # mask pack: rows [0, 98) = 7x7 SA masks with conv weights folded in (row 2t+c, c=0 avg / 1 max),
    #            rows [98, 107) = 3x3 tap validity masks
    m3 = tap_masks(K3)                                                # (9, HW)
    m7 = tap_masks(K7)                                                # (49, HW)
    saw2 = saw.reshape(K7 * K7, 2)                                    # [t, c] = saw[dy,dx,c,0]
    wm7 = (m7[:, None, :] * saw2[:, :, None]).reshape(2 * K7 * K7, HW)
    maskpk = jnp.concatenate([wm7, m3], axis=0)                       # (107, HW)

    return dict(
        # reference-layout params
        w1=w1, w2=w2, caw1=caw1, caw2=caw2, saw=saw, wsk=wsk,
        s1=s1, b1=b1, s2=s2, b2=b2, ssk=ssk, bsk=bsk,
        # kernel-layout params
        w1sk=w1sk, w2ms=w2ms, smallpk=smallpk, maskpk=maskpk,
    )


# ------------------------ pure-JAX reference ------------------------------
def ref_forward(x_nchw, p):
    x = jnp.transpose(x_nchw, (0, 2, 3, 1))
    hi = jax.lax.Precision.HIGHEST

    def conv(v, w, pad):
        return jax.lax.conv_general_dilated(
            v, w, (1, 1), [(pad, pad), (pad, pad)],
            dimension_numbers=('NHWC', 'HWIO', 'NHWC'), precision=hi)

    y = jnp.maximum(conv(x, p['w1'], 1) * p['s1'] + p['b1'], 0.0)
    y = conv(y, p['w2'], 1) * p['s2'] + p['b2']
    # channel attention
    avg = jnp.mean(y, axis=(1, 2), keepdims=True)
    mx = jnp.max(y, axis=(1, 2), keepdims=True)

    def mlp(z):
        h = jnp.maximum(jnp.einsum('nijc,cr->nijr', z, p['caw1'], precision=hi), 0.0)
        return jnp.einsum('nijr,rc->nijc', h, p['caw2'], precision=hi)

    y = y * jax.nn.sigmoid(mlp(avg) + mlp(mx))
    # spatial attention
    a = jnp.mean(y, axis=-1, keepdims=True)
    m = jnp.max(y, axis=-1, keepdims=True)
    s = conv(jnp.concatenate([a, m], axis=-1), p['saw'], 3)
    y = y * jax.nn.sigmoid(s)
    # skip
    skip = jnp.einsum('nhwc,cd->nhwd', x, p['wsk'], precision=hi) * p['ssk'] + p['bsk']
    out = jnp.maximum(y + skip, 0.0)
    return jnp.transpose(out, (0, 3, 1, 2))


if __name__ == "__main__":
    key = jax.random.PRNGKey(0)
    kx, kp = jax.random.split(key)
    x = jax.random.normal(kx, (N, CIN, H, W), jnp.float32)   # NCHW, as in PyTorch
    params = make_params(kp)

    out = jax.block_until_ready(residual_block(x, params))
    ref = jax.block_until_ready(ref_forward(x, params))

    # Tolerance widened (2e-2 -> 5e-2) vs. the all-f32 version because the conv matmuls now use
    # bf16 operands with f32 accumulation (per perf review); a real bug would produce O(1) errors.
    np.testing.assert_allclose(np.asarray(out), np.asarray(ref), rtol=5e-2, atol=5e-2)
    print("KERNEL_OK")
</pallas_src>

<mosaic_0001>
module attributes {stable_mosaic.version = 11 : i64} {
  func.func @residual_block_kernel(%arg0: i32, %arg1: memref<1x16x256xf32, #tpu.memory_space<vmem>>, %arg2: memref<64x144xbf16, #tpu.memory_space<vmem>>, %arg3: memref<32x288xbf16, #tpu.memory_space<vmem>>, %arg4: memref<64x6xf32, #tpu.memory_space<vmem>>, %arg5: memref<107x256xf32, #tpu.memory_space<vmem>>, %arg6: memref<1x32x256xf32, #tpu.memory_space<vmem>>, %arg7: memref<144x256xbf16, #tpu.memory_space<vmem>>, %arg8: memref<288x256xbf16, #tpu.memory_space<vmem>>) attributes {dimension_semantics = [#tpu.dimension_semantics<parallel>], iteration_bounds = array<i64: 2>, scalar_prefetch = 0 : i64, scratch_operands = 2 : i64, tpu.core_type = #tpu.core_type<tc>, window_params = [{transform_indices = @transform_0, window_bounds = array<i64: 1, 16, 256>}, {pipeline_mode = #tpu.pipeline_mode<synchronous>, transform_indices = @transform_1, window_bounds = array<i64: 64, 144>}, {pipeline_mode = #tpu.pipeline_mode<synchronous>, transform_indices = @transform_2, window_bounds = array<i64: 32, 288>}, {pipeline_mode = #tpu.pipeline_mode<synchronous>, transform_indices = @transform_3, window_bounds = array<i64: 64, 6>}, {pipeline_mode = #tpu.pipeline_mode<synchronous>, transform_indices = @transform_4, window_bounds = array<i64: 107, 256>}, {transform_indices = @transform_5, window_bounds = array<i64: 1, 32, 256>}]} {
    %c0 = arith.constant 0 : index
    %c0_0 = arith.constant 0 : index
    %c0_1 = arith.constant 0 : index
    %0 = vector.load %arg1[%c0, %c0_0, %c0_1] : memref<1x16x256xf32, #tpu.memory_space<vmem>>, vector<1x16x256xf32>
    %1 = vector.shape_cast %0 : vector<1x16x256xf32> to vector<16x256xf32>
    %c17_i32 = arith.constant 17 : i32
    %2 = tpu.dynamic_rotate %1 by %c17_i32 dim 1 : vector<16x256xf32>, i32 -> vector<16x256xf32>
    %c98 = arith.constant 98 : index
    %c0_2 = arith.constant 0 : index
    %3 = vector.load %arg5[%c98, %c0_2] : memref<107x256xf32, #tpu.memory_space<vmem>>, vector<1x256xf32>
    %4 = vector.broadcast %3 : vector<1x256xf32> to vector<16x256xf32>
    %5 = arith.mulf %2, %4 : vector<16x256xf32>
    %6 = arith.truncf %5 : vector<16x256xf32> to vector<16x256xbf16>
    %c0_3 = arith.constant 0 : index
    %c0_4 = arith.constant 0 : index
    %7 = vector.load %arg7[%c0_3, %c0_4] : memref<144x256xbf16, #tpu.memory_space<vmem>>, vector<16x256xbf16>
    tpu.vector_store %arg7[%c0_3, %c0_4], %6 {strides = array<i32>} : memref<144x256xbf16, #tpu.memory_space<vmem>>, vector<16x256xbf16>,
    %c16_i32 = arith.constant 16 : i32
    %8 = tpu.dynamic_rotate %1 by %c16_i32 dim 1 : vector<16x256xf32>, i32 -> vector<16x256xf32>
    %c99 = arith.constant 99 : index
    %c0_5 = arith.constant 0 : index
    %9 = vector.load %arg5[%c99, %c0_5] : memref<107x256xf32, #tpu.memory_space<vmem>>, vector<1x256xf32>
    %10 = vector.broadcast %9 : vector<1x256xf32> to vector<16x256xf32>
    %11 = arith.mulf %8, %10 : vector<16x256xf32>
    %12 = arith.truncf %11 : vector<16x256xf32> to vector<16x256xbf16>
    %c16 = arith.constant 16 : index
    %c0_6 = arith.constant 0 : index
    %13 = vector.load %arg7[%c16, %c0_6] : memref<144x256xbf16, #tpu.memory_space<vmem>>, vector<16x256xbf16>
    tpu.vector_store %arg7[%c16, %c0_6], %12 {strides = array<i32>} : memref<144x256xbf16, #tpu.memory_space<vmem>>, vector<16x256xbf16>,
    %c15_i32 = arith.constant 15 : i32
    %14 = tpu.dynamic_rotate %1 by %c15_i32 dim 1 : vector<16x256xf32>, i32 -> vector<16x256xf32>
    %c100 = arith.constant 100 : index
    %c0_7 = arith.constant 0 : index
    %15 = vector.load %arg5[%c100, %c0_7] : memref<107x256xf32, #tpu.memory_space<vmem>>, vector<1x256xf32>
    %16 = vector.broadcast %15 : vector<1x256xf32> to vector<16x256xf32>
    %17 = arith.mulf %14, %16 : vector<16x256xf32>
    %18 = arith.truncf %17 : vector<16x256xf32> to vector<16x256xbf16>
    %c32 = arith.constant 32 : index
    %c0_8 = arith.constant 0 : index
    %19 = vector.load %arg7[%c32, %c0_8] : memref<144x256xbf16, #tpu.memory_space<vmem>>, vector<16x256xbf16>
    tpu.vector_store %arg7[%c32, %c0_8], %18 {strides = array<i32>} : memref<144x256xbf16, #tpu.memory_space<vmem>>, vector<16x256xbf16>,
    %c1_i32 = arith.constant 1 : i32
    %20 = tpu.dynamic_rotate %1 by %c1_i32 dim 1 : vector<16x256xf32>, i32 -> vector<16x256xf32>
    %c101 = arith.constant 101 : index
    %c0_9 = arith.constant 0 : index
    %21 = vector.load %arg5[%c101, %c0_9] : memref<107x256xf32, #tpu.memory_space<vmem>>, vector<1x256xf32>
    %22 = vector.broadcast %21 : vector<1x256xf32> to vector<16x256xf32>
    %23 = arith.mulf %20, %22 : vector<16x256xf32>
    %24 = arith.truncf %23 : vector<16x256xf32> to vector<16x256xbf16>
    %c48 = arith.constant 48 : index
    %c0_10 = arith.constant 0 : index
    %25 = vector.load %arg7[%c48, %c0_10] : memref<144x256xbf16, #tpu.memory_space<vmem>>, vector<16x256xbf16>
    tpu.vector_store %arg7[%c48, %c0_10], %24 {strides = array<i32>} : memref<144x256xbf16, #tpu.memory_space<vmem>>, vector<16x256xbf16>,
    %26 = arith.truncf %1 : vector<16x256xf32> to vector<16x256xbf16>
    %c64 = arith.constant 64 : index
    %c0_11 = arith.constant 0 : index
    %27 = vector.load %arg7[%c64, %c0_11] : memref<144x256xbf16, #tpu.memory_space<vmem>>, vector<16x256xbf16>
    tpu.vector_store %arg7[%c64, %c0_11], %26 {strides = array<i32>} : memref<144x256xbf16, #tpu.memory_space<vmem>>, vector<16x256xbf16>,
    %c255_i32 = arith.constant 255 : i32
    %28 = tpu.dynamic_rotate %1 by %c255_i32 dim 1 : vector<16x256xf32>, i32 -> vector<16x256xf32>
    %c103 = arith.constant 103 : index
    %c0_12 = arith.constant 0 : index
    %29 = vector.load %arg5[%c103, %c0_12] : memref<107x256xf32, #tpu.memory_space<vmem>>, vector<1x256xf32>
    %30 = vector.broadcast %29 : vector<1x256xf32> to vector<16x256xf32>
    %31 = arith.mulf %28, %30 : vector<16x256xf32>
    %32 = arith.truncf %31 : vector<16x256xf32> to vector<16x256xbf16>
    %c80 = arith.constant 80 : index
    %c0_13 = arith.constant 0 : index
    %33 = vector.load %arg7[%c80, %c0_13] : memref<144x256xbf16, #tpu.memory_space<vmem>>, vector<16x256xbf16>
    tpu.vector_store %arg7[%c80, %c0_13], %32 {strides = array<i32>} : memref<144x256xbf16, #tpu.memory_space<vmem>>, vector<16x256xbf16>,
    %c241_i32 = arith.constant 241 : i32
    %34 = tpu.dynamic_rotate %1 by %c241_i32 dim 1 : vector<16x256xf32>, i32 -> vector<16x256xf32>
    %c104 = arith.constant 104 : index
    %c0_14 = arith.constant 0 : index
    %35 = vector.load %arg5[%c104, %c0_14] : memref<107x256xf32, #tpu.memory_space<vmem>>, vector<1x256xf32>
    %36 = vector.broadcast %35 : vector<1x256xf32> to vector<16x256xf32>
    %37 = arith.mulf %34, %36 : vector<16x256xf32>
    %38 = arith.truncf %37 : vector<16x256xf32> to vector<16x256xbf16>
    %c96 = arith.constant 96 : index
    %c0_15 = arith.constant 0 : index
    %39 = vector.load %arg7[%c96, %c0_15] : memref<144x256xbf16, #tpu.memory_space<vmem>>, vector<16x256xbf16>
    tpu.vector_store %arg7[%c96, %c0_15], %38 {strides = array<i32>} : memref<144x256xbf16, #tpu.memory_space<vmem>>, vector<16x256xbf16>,
    %c240_i32 = arith.constant 240 : i32
    %40 = tpu.dynamic_rotate %1 by %c240_i32 dim 1 : vector<16x256xf32>, i32 -> vector<16x256xf32>
    %c105 = arith.constant 105 : index
    %c0_16 = arith.constant 0 : index
    %41 = vector.load %arg5[%c105, %c0_16] : memref<107x256xf32, #tpu.memory_space<vmem>>, vector<1x256xf32>
    %42 = vector.broadcast %41 : vector<1x256xf32> to vector<16x256xf32>
    %43 = arith.mulf %40, %42 : vector<16x256xf32>
    %44 = arith.truncf %43 : vector<16x256xf32> to vector<16x256xbf16>
    %c112 = arith.constant 112 : index
    %c0_17 = arith.constant 0 : index
    %45 = vector.load %arg7[%c112, %c0_17] : memref<144x256xbf16, #tpu.memory_space<vmem>>, vector<16x256xbf16>
    tpu.vector_store %arg7[%c112, %c0_17], %44 {strides = array<i32>} : memref<144x256xbf16, #tpu.memory_space<vmem>>, vector<16x256xbf16>,
    %c239_i32 = arith.constant 239 : i32
    %46 = tpu.dynamic_rotate %1 by %c239_i32 dim 1 : vector<16x256xf32>, i32 -> vector<16x256xf32>
    %c106 = arith.constant 106 : index
    %c0_18 = arith.constant 0 : index
    %47 = vector.load %arg5[%c106, %c0_18] : memref<107x256xf32, #tpu.memory_space<vmem>>, vector<1x256xf32>
    %48 = vector.broadcast %47 : vector<1x256xf32> to vector<16x256xf32>
    %49 = arith.mulf %46, %48 : vector<16x256xf32>
    %50 = arith.truncf %49 : vector<16x256xf32> to vector<16x256xbf16>
    %c128 = arith.constant 128 : index
    %c0_19 = arith.constant 0 : index
    %51 = vector.load %arg7[%c128, %c0_19] : memref<144x256xbf16, #tpu.memory_space<vmem>>, vector<16x256xbf16>
    tpu.vector_store %arg7[%c128, %c0_19], %50 {strides = array<i32>} : memref<144x256xbf16, #tpu.memory_space<vmem>>, vector<16x256xbf16>,
    %c0_20 = arith.constant 0 : index
    %c0_21 = arith.constant 0 : index
    %52 = vector.load %arg2[%c0_20, %c0_21] : memref<64x144xbf16, #tpu.memory_space<vmem>>, vector<64x144xbf16>
    %c0_22 = arith.constant 0 : index
    %c0_23 = arith.constant 0 : index
    %53 = vector.load %arg7[%c0_22, %c0_23] : memref<144x256xbf16, #tpu.memory_space<vmem>>, vector<144x256xbf16>
    %cst = arith.constant dense<0.000000e+00> : vector<64x256xf32>
    %54 = tpu.matmul %52, %53, %cst {dimension_numbers = #tpu.dot_dimension_numbers<[1], [0], [0], [1], [0, 0, 1, 1], [], []>} : vector<64x144xbf16>, vector<144x256xbf16>, vector<64x256xf32> -> vector<64x256xf32>
    %c0_24 = arith.constant 0 : index
    %c0_25 = arith.constant 0 : index
    %55 = vector.load %arg4[%c0_24, %c0_25] : memref<64x6xf32, #tpu.memory_space<vmem>>, vector<64x1xf32>
    %56 = vector.broadcast %55 : vector<64x1xf32> to vector<64x256xf32>
    %57 = arith.addf %54, %56 : vector<64x256xf32>
    %58 = vector.extract_strided_slice %57 {offsets = [0, 0], sizes = [32, 256], strides = [1, 1]} : vector<64x256xf32> to vector<32x256xf32>
    %cst_26 = arith.constant 0.000000e+00 : f32
    %59 = vector.broadcast %cst_26 : f32 to vector<32x256xf32>
    %60 = arith.maximumf %58, %59 : vector<32x256xf32>
    %61 = vector.extract_strided_slice %57 {offsets = [32, 0], sizes = [32, 256], strides = [1, 1]} : vector<64x256xf32> to vector<32x256xf32>
    %c17_i32_27 = arith.constant 17 : i32
    %62 = tpu.dynamic_rotate %60 by %c17_i32_27 dim 1 : vector<32x256xf32>, i32 -> vector<32x256xf32>
    %c98_28 = arith.constant 98 : index
    %c0_29 = arith.constant 0 : index
    %63 = vector.load %arg5[%c98_28, %c0_29] : memref<107x256xf32, #tpu.memory_space<vmem>>, vector<1x256xf32>
    %64 = vector.broadcast %63 : vector<1x256xf32> to vector<32x256xf32>
    %65 = arith.mulf %62, %64 : vector<32x256xf32>
    %66 = arith.truncf %65 : vector<32x256xf32> to vector<32x256xbf16>
    %c0_30 = arith.constant 0 : index
    %c0_31 = arith.constant 0 : index
    %67 = vector.load %arg8[%c0_30, %c0_31] : memref<288x256xbf16, #tpu.memory_space<vmem>>, vector<32x256xbf16>
    tpu.vector_store %arg8[%c0_30, %c0_31], %66 {strides = array<i32>} : memref<288x256xbf16, #tpu.memory_space<vmem>>, vector<32x256xbf16>,
    %c16_i32_32 = arith.constant 16 : i32
    %68 = tpu.dynamic_rotate %60 by %c16_i32_32 dim 1 : vector<32x256xf32>, i32 -> vector<32x256xf32>
    %c99_33 = arith.constant 99 : index
    %c0_34 = arith.constant 0 : index
    %69 = vector.load %arg5[%c99_33, %c0_34] : memref<107x256xf32, #tpu.memory_space<vmem>>, vector<1x256xf32>
    %70 = vector.broadcast %69 : vector<1x256xf32> to vector<32x256xf32>
    %71 = arith.mulf %68, %70 : vector<32x256xf32>
    %72 = arith.truncf %71 : vector<32x256xf32> to vector<32x256xbf16>
    %c32_35 = arith.constant 32 : index
    %c0_36 = arith.constant 0 : index
    %73 = vector.load %arg8[%c32_35, %c0_36] : memref<288x256xbf16, #tpu.memory_space<vmem>>, vector<32x256xbf16>
    tpu.vector_store %arg8[%c32_35, %c0_36], %72 {strides = array<i32>} : memref<288x256xbf16, #tpu.memory_space<vmem>>, vector<32x256xbf16>,
    %c15_i32_37 = arith.constant 15 : i32
    %74 = tpu.dynamic_rotate %60 by %c15_i32_37 dim 1 : vector<32x256xf32>, i32 -> vector<32x256xf32>
    %c100_38 = arith.constant 100 : index
    %c0_39 = arith.constant 0 : index
    %75 = vector.load %arg5[%c100_38, %c0_39] : memref<107x256xf32, #tpu.memory_space<vmem>>, vector<1x256xf32>
    %76 = vector.broadcast %75 : vector<1x256xf32> to vector<32x256xf32>
    %77 = arith.mulf %74, %76 : vector<32x256xf32>
    %78 = arith.truncf %77 : vector<32x256xf32> to vector<32x256xbf16>
    %c64_40 = arith.constant 64 : index
    %c0_41 = arith.constant 0 : index
    %79 = vector.load %arg8[%c64_40, %c0_41] : memref<288x256xbf16, #tpu.memory_space<vmem>>, vector<32x256xbf16>
    tpu.vector_store %arg8[%c64_40, %c0_41], %78 {strides = array<i32>} : memref<288x256xbf16, #tpu.memory_space<vmem>>, vector<32x256xbf16>,
    %c1_i32_42 = arith.constant 1 : i32
    %80 = tpu.dynamic_rotate %60 by %c1_i32_42 dim 1 : vector<32x256xf32>, i32 -> vector<32x256xf32>
    %c101_43 = arith.constant 101 : index
    %c0_44 = arith.constant 0 : index
    %81 = vector.load %arg5[%c101_43, %c0_44] : memref<107x256xf32, #tpu.memory_space<vmem>>, vector<1x256xf32>
    %82 = vector.broadcast %81 : vector<1x256xf32> to vector<32x256xf32>
    %83 = arith.mulf %80, %82 : vector<32x256xf32>
    %84 = arith.truncf %83 : vector<32x256xf32> to vector<32x256xbf16>
    %c96_45 = arith.constant 96 : index
    %c0_46 = arith.constant 0 : index
    %85 = vector.load %arg8[%c96_45, %c0_46] : memref<288x256xbf16, #tpu.memory_space<vmem>>, vector<32x256xbf16>
    tpu.vector_store %arg8[%c96_45, %c0_46], %84 {strides = array<i32>} : memref<288x256xbf16, #tpu.memory_space<vmem>>, vector<32x256xbf16>,
    %86 = arith.truncf %60 : vector<32x256xf32> to vector<32x256xbf16>
    %c128_47 = arith.constant 128 : index
    %c0_48 = arith.constant 0 : index
    %87 = vector.load %arg8[%c128_47, %c0_48] : memref<288x256xbf16, #tpu.memory_space<vmem>>, vector<32x256xbf16>
    tpu.vector_store %arg8[%c128_47, %c0_48], %86 {strides = array<i32>} : memref<288x256xbf16, #tpu.memory_space<vmem>>, vector<32x256xbf16>,
    %c255_i32_49 = arith.constant 255 : i32
    %88 = tpu.dynamic_rotate %60 by %c255_i32_49 dim 1 : vector<32x256xf32>, i32 -> vector<32x256xf32>
    %c103_50 = arith.constant 103 : index
    %c0_51 = arith.constant 0 : index
    %89 = vector.load %arg5[%c103_50, %c0_51] : memref<107x256xf32, #tpu.memory_space<vmem>>, vector<1x256xf32>
    %90 = vector.broadcast %89 : vector<1x256xf32> to vector<32x256xf32>
    %91 = arith.mulf %88, %90 : vector<32x256xf32>
    %92 = arith.truncf %91 : vector<32x256xf32> to vector<32x256xbf16>
    %c160 = arith.constant 160 : index
    %c0_52 = arith.constant 0 : index
    %93 = vector.load %arg8[%c160, %c0_52] : memref<288x256xbf16, #tpu.memory_space<vmem>>, vector<32x256xbf16>
    tpu.vector_store %arg8[%c160, %c0_52], %92 {strides = array<i32>} : memref<288x256xbf16, #tpu.memory_space<vmem>>, vector<32x256xbf16>,
    %c241_i32_53 = arith.constant 241 : i32
    %94 = tpu.dynamic_rotate %60 by %c241_i32_53 dim 1 : vector<32x256xf32>, i32 -> vector<32x256xf32>
    %c104_54 = arith.constant 104 : index
    %c0_55 = arith.constant 0 : index
    %95 = vector.load %arg5[%c104_54, %c0_55] : memref<107x256xf32, #tpu.memory_space<vmem>>, vector<1x256xf32>
    %96 = vector.broadcast %95 : vector<1x256xf32> to vector<32x256xf32>
    %97 = arith.mulf %94, %96 : vector<32x256xf32>
    %98 = arith.truncf %97 : vector<32x256xf32> to vector<32x256xbf16>
    %c192 = arith.constant 192 : index
    %c0_56 = arith.constant 0 : index
    %99 = vector.load %arg8[%c192, %c0_56] : memref<288x256xbf16, #tpu.memory_space<vmem>>, vector<32x256xbf16>
    tpu.vector_store %arg8[%c192, %c0_56], %98 {strides = array<i32>} : memref<288x256xbf16, #tpu.memory_space<vmem>>, vector<32x256xbf16>,
    %c240_i32_57 = arith.constant 240 : i32
    %100 = tpu.dynamic_rotate %60 by %c240_i32_57 dim 1 : vector<32x256xf32>, i32 -> vector<32x256xf32>
    %c105_58 = arith.constant 105 : index
    %c0_59 = arith.constant 0 : index
    %101 = vector.load %arg5[%c105_58, %c0_59] : memref<107x256xf32, #tpu.memory_space<vmem>>, vector<1x256xf32>
    %102 = vector.broadcast %101 : vector<1x256xf32> to vector<32x256xf32>
    %103 = arith.mulf %100, %102 : vector<32x256xf32>
    %104 = arith.truncf %103 : vector<32x256xf32> to vector<32x256xbf16>
    %c224 = arith.constant 224 : index
    %c0_60 = arith.constant 0 : index
    %105 = vector.load %arg8[%c224, %c0_60] : memref<288x256xbf16, #tpu.memory_space<vmem>>, vector<32x256xbf16>
    tpu.vector_store %arg8[%c224, %c0_60], %104 {strides = array<i32>} : memref<288x256xbf16, #tpu.memory_space<vmem>>, vector<32x256xbf16>,
    %c239_i32_61 = arith.constant 239 : i32
    %106 = tpu.dynamic_rotate %60 by %c239_i32_61 dim 1 : vector<32x256xf32>, i32 -> vector<32x256xf32>
    %c106_62 = arith.constant 106 : index
    %c0_63 = arith.constant 0 : index
    %107 = vector.load %arg5[%c106_62, %c0_63] : memref<107x256xf32, #tpu.memory_space<vmem>>, vector<1x256xf32>
    %108 = vector.broadcast %107 : vector<1x256xf32> to vector<32x256xf32>
    %109 = arith.mulf %106, %108 : vector<32x256xf32>
    %110 = arith.truncf %109 : vector<32x256xf32> to vector<32x256xbf16>
    %c256 = arith.constant 256 : index
    %c0_64 = arith.constant 0 : index
    %111 = vector.load %arg8[%c256, %c0_64] : memref<288x256xbf16, #tpu.memory_space<vmem>>, vector<32x256xbf16>
    tpu.vector_store %arg8[%c256, %c0_64], %110 {strides = array<i32>} : memref<288x256xbf16, #tpu.memory_space<vmem>>, vector<32x256xbf16>,
    %c0_65 = arith.constant 0 : index
    %c0_66 = arith.constant 0 : index
    %112 = vector.load %arg3[%c0_65, %c0_66] : memref<32x288xbf16, #tpu.memory_space<vmem>>, vector<32x288xbf16>
    %c0_67 = arith.constant 0 : index
    %c0_68 = arith.constant 0 : index
    %113 = vector.load %arg8[%c0_67, %c0_68] : memref<288x256xbf16, #tpu.memory_space<vmem>>, vector<288x256xbf16>
    %cst_69 = arith.constant dense<0.000000e+00> : vector<32x256xf32>
    %114 = tpu.matmul %112, %113, %cst_69 {dimension_numbers = #tpu.dot_dimension_numbers<[1], [0], [0], [1], [0, 0, 1, 1], [], []>} : vector<32x288xbf16>, vector<288x256xbf16>, vector<32x256xf32> -> vector<32x256xf32>
    %c0_70 = arith.constant 0 : index
    %c1 = arith.constant 1 : index
    %115 = vector.load %arg4[%c0_70, %c1] : memref<64x6xf32, #tpu.memory_space<vmem>>, vector<32x1xf32>
    %116 = vector.broadcast %115 : vector<32x1xf32> to vector<32x256xf32>
    %117 = arith.addf %114, %116 : vector<32x256xf32>
    %cst_71 = arith.constant dense<0.000000e+00> : vector<32xf32>
    %118 = vector.multi_reduction <add>, %117, %cst_71 [1] : vector<32x256xf32> to vector<32xf32>
    %119 = vector.shape_cast %118 : vector<32xf32> to vector<32x1xf32>
    %cst_72 = arith.constant 2.560000e+02 : f32
    %120 = vector.broadcast %cst_72 : f32 to vector<32x1xf32>
    %121 = arith.divf %119, %120 : vector<32x1xf32>
    %cst_73 = arith.constant dense<0xFF800000> : vector<32xf32>
    %122 = vector.multi_reduction <maximumf>, %117, %cst_73 [1] : vector<32x256xf32> to vector<32xf32>
    %123 = vector.shape_cast %122 : vector<32xf32> to vector<32x1xf32>
    %124 = tpu.concatenate %121, %123 in 1 : vector<32x1xf32>, vector<32x1xf32> -> vector<32x2xf32>
    %cst_74 = arith.constant 0.000000e+00 : f32
    %125 = vector.broadcast %cst_74 : f32 to vector<32x2xf32>
    %c0_75 = arith.constant 0 : index
    %c2 = arith.constant 2 : index
    %126 = vector.load %arg4[%c0_75, %c2] : memref<64x6xf32, #tpu.memory_space<vmem>>, vector<32x1xf32>
    %127 = vector.broadcast %126 : vector<32x1xf32> to vector<32x2xf32>
    %128 = arith.mulf %127, %124 : vector<32x2xf32>
    %cst_76 = arith.constant dense<0.000000e+00> : vector<2xf32>
    %129 = vector.multi_reduction <add>, %128, %cst_76 [0] : vector<32x2xf32> to vector<2xf32>
    %130 = vector.shape_cast %129 : vector<2xf32> to vector<1x2xf32>
    %cst_77 = arith.constant 0.000000e+00 : f32
    %131 = vector.broadcast %cst_77 : f32 to vector<1x2xf32>
    %132 = arith.maximumf %130, %131 : vector<1x2xf32>
    %c0_78 = arith.constant 0 : index
    %c4 = arith.constant 4 : index
    %133 = vector.load %arg4[%c0_78, %c4] : memref<64x6xf32, #tpu.memory_space<vmem>>, vector<32x1xf32>
    %134 = vector.broadcast %133 : vector<32x1xf32> to vector<32x2xf32>
    %135 = vector.broadcast %132 : vector<1x2xf32> to vector<32x2xf32>
    %136 = arith.mulf %134, %135 : vector<32x2xf32>
    %137 = arith.addf %125, %136 : vector<32x2xf32>
    %c0_79 = arith.constant 0 : index
    %c3 = arith.constant 3 : index
    %138 = vector.load %arg4[%c0_79, %c3] : memref<64x6xf32, #tpu.memory_space<vmem>>, vector<32x1xf32>
    %139 = vector.broadcast %138 : vector<32x1xf32> to vector<32x2xf32>
    %140 = arith.mulf %139, %124 : vector<32x2xf32>
    %cst_80 = arith.constant dense<0.000000e+00> : vector<2xf32>
    %141 = vector.multi_reduction <add>, %140, %cst_80 [0] : vector<32x2xf32> to vector<2xf32>
    %142 = vector.shape_cast %141 : vector<2xf32> to vector<1x2xf32>
    %cst_81 = arith.constant 0.000000e+00 : f32
    %143 = vector.broadcast %cst_81 : f32 to vector<1x2xf32>
    %144 = arith.maximumf %142, %143 : vector<1x2xf32>
    %c0_82 = arith.constant 0 : index
    %c5 = arith.constant 5 : index
    %145 = vector.load %arg4[%c0_82, %c5] : memref<64x6xf32, #tpu.memory_space<vmem>>, vector<32x1xf32>
    %146 = vector.broadcast %145 : vector<32x1xf32> to vector<32x2xf32>
    %147 = vector.broadcast %144 : vector<1x2xf32> to vector<32x2xf32>
    %148 = arith.mulf %146, %147 : vector<32x2xf32>
    %149 = arith.addf %137, %148 : vector<32x2xf32>
    %150 = vector.extract_strided_slice %149 {offsets = [0, 0], sizes = [32, 1], strides = [1, 1]} : vector<32x2xf32> to vector<32x1xf32>
    %151 = vector.extract_strided_slice %149 {offsets = [0, 1], sizes = [32, 1], strides = [1, 1]} : vector<32x2xf32> to vector<32x1xf32>
    %152 = arith.addf %150, %151 : vector<32x1xf32>
    %153 = arith.negf %152 : vector<32x1xf32>
    %154 = math.exp %153 : vector<32x1xf32>
    %cst_83 = arith.constant 1.000000e+00 : f32
    %155 = vector.broadcast %cst_83 : f32 to vector<32x1xf32>
    %156 = arith.addf %155, %154 : vector<32x1xf32>
    %157 = arith.divf %155, %156 : vector<32x1xf32>
    %158 = vector.broadcast %157 : vector<32x1xf32> to vector<32x256xf32>
    %159 = arith.mulf %117, %158 : vector<32x256xf32>
    %cst_84 = arith.constant dense<0.000000e+00> : vector<256xf32>
    %160 = vector.multi_reduction <add>, %159, %cst_84 [0] : vector<32x256xf32> to vector<256xf32>
    %161 = vector.shape_cast %160 : vector<256xf32> to vector<1x256xf32>
    %cst_85 = arith.constant 3.200000e+01 : f32
    %162 = vector.broadcast %cst_85 : f32 to vector<1x256xf32>
    %163 = arith.divf %161, %162 : vector<1x256xf32>
    %cst_86 = arith.constant dense<0xFF800000> : vector<256xf32>
    %164 = vector.multi_reduction <maximumf>, %159, %cst_86 [0] : vector<32x256xf32> to vector<256xf32>
    %165 = vector.shape_cast %164 : vector<256xf32> to vector<1x256xf32>
    %166 = tpu.concatenate %163, %165 in 0 : vector<1x256xf32>, vector<1x256xf32> -> vector<2x256xf32>
    %cst_87 = arith.constant 0.000000e+00 : f32
    %167 = vector.broadcast %cst_87 : f32 to vector<2x256xf32>
    %c51_i32 = arith.constant 51 : i32
    %168 = tpu.dynamic_rotate %166 by %c51_i32 dim 1 : vector<2x256xf32>, i32 -> vector<2x256xf32>
    %c0_88 = arith.constant 0 : index
    %c0_89 = arith.constant 0 : index
    %169 = vector.load %arg5[%c0_88, %c0_89] : memref<107x256xf32, #tpu.memory_space<vmem>>, vector<2x256xf32>
    %170 = arith.mulf %168, %169 : vector<2x256xf32>
    %171 = arith.addf %167, %170 : vector<2x256xf32>
    %c50_i32 = arith.constant 50 : i32
    %172 = tpu.dynamic_rotate %166 by %c50_i32 dim 1 : vector<2x256xf32>, i32 -> vector<2x256xf32>
    %c2_90 = arith.constant 2 : index
    %c0_91 = arith.constant 0 : index
    %173 = vector.load %arg5[%c2_90, %c0_91] : memref<107x256xf32, #tpu.memory_space<vmem>>, vector<2x256xf32>
    %174 = arith.mulf %172, %173 : vector<2x256xf32>
    %175 = arith.addf %171, %174 : vector<2x256xf32>
    %c49_i32 = arith.constant 49 : i32
    %176 = tpu.dynamic_rotate %166 by %c49_i32 dim 1 : vector<2x256xf32>, i32 -> vector<2x256xf32>
    %c4_92 = arith.constant 4 : index
    %c0_93 = arith.constant 0 : index
    %177 = vector.load %arg5[%c4_92, %c0_93] : memref<107x256xf32, #tpu.memory_space<vmem>>, vector<2x256xf32>
    %178 = arith.mulf %176, %177 : vector<2x256xf32>
    %179 = arith.addf %175, %178 : vector<2x256xf32>
    %c48_i32 = arith.constant 48 : i32
    %180 = tpu.dynamic_rotate %166 by %c48_i32 dim 1 : vector<2x256xf32>, i32 -> vector<2x256xf32>
    %c6 = arith.constant 6 : index
    %c0_94 = arith.constant 0 : index
    %181 = vector.load %arg5[%c6, %c0_94] : memref<107x256xf32, #tpu.memory_space<vmem>>, vector<2x256xf32>
    %182 = arith.mulf %180, %181 : vector<2x256xf32>
    %183 = arith.addf %179, %182 : vector<2x256xf32>
    %c47_i32 = arith.constant 47 : i32
    %184 = tpu.dynamic_rotate %166 by %c47_i32 dim 1 : vector<2x256xf32>, i32 -> vector<2x256xf32>
    %c8 = arith.constant 8 : index
    %c0_95 = arith.constant 0 : index
    %185 = vector.load %arg5[%c8, %c0_95] : memref<107x256xf32, #tpu.memory_space<vmem>>, vector<2x256xf32>
    %186 = arith.mulf %184, %185 : vector<2x256xf32>
    %187 = arith.addf %183, %186 : vector<2x256xf32>
    %c46_i32 = arith.constant 46 : i32
    %188 = tpu.dynamic_rotate %166 by %c46_i32 dim 1 : vector<2x256xf32>, i32 -> vector<2x256xf32>
    %c10 = arith.constant 10 : index
    %c0_96 = arith.constant 0 : index
    %189 = vector.load %arg5[%c10, %c0_96] : memref<107x256xf32, #tpu.memory_space<vmem>>, vector<2x256xf32>
    %190 = arith.mulf %188, %189 : vector<2x256xf32>
    %191 = arith.addf %187, %190 : vector<2x256xf32>
    %c45_i32 = arith.constant 45 : i32
    %192 = tpu.dynamic_rotate %166 by %c45_i32 dim 1 : vector<2x256xf32>, i32 -> vector<2x256xf32>
    %c12 = arith.constant 12 : index
    %c0_97 = arith.constant 0 : index
    %193 = vector.load %arg5[%c12, %c0_97] : memref<107x256xf32, #tpu.memory_space<vmem>>, vector<2x256xf32>
    %194 = arith.mulf %192, %193 : vector<2x256xf32>
    %195 = arith.addf %191, %194 : vector<2x256xf32>
    %c35_i32 = arith.constant 35 : i32
    %196 = tpu.dynamic_rotate %166 by %c35_i32 dim 1 : vector<2x256xf32>, i32 -> vector<2x256xf32>
    %c14 = arith.constant 14 : index
    %c0_98 = arith.constant 0 : index
    %197 = vector.load %arg5[%c14, %c0_98] : memref<107x256xf32, #tpu.memory_space<vmem>>, vector<2x256xf32>
    %198 = arith.mulf %196, %197 : vector<2x256xf32>
    %199 = arith.addf %195, %198 : vector<2x256xf32>
    %c34_i32 = arith.constant 34 : i32
    %200 = tpu.dynamic_rotate %166 by %c34_i32 dim 1 : vector<2x256xf32>, i32 -> vector<2x256xf32>
    %c16_99 = arith.constant 16 : index
    %c0_100 = arith.constant 0 : index
    %201 = vector.load %arg5[%c16_99, %c0_100] : memref<107x256xf32, #tpu.memory_space<vmem>>, vector<2x256xf32>
    %202 = arith.mulf %200, %201 : vector<2x256xf32>
    %203 = arith.addf %199, %202 : vector<2x256xf32>
    %c33_i32 = arith.constant 33 : i32
    %204 = tpu.dynamic_rotate %166 by %c33_i32 dim 1 : vector<2x256xf32>, i32 -> vector<2x256xf32>
    %c18 = arith.constant 18 : index
    %c0_101 = arith.constant 0 : index
    %205 = vector.load %arg5[%c18, %c0_101] : memref<107x256xf32, #tpu.memory_space<vmem>>, vector<2x256xf32>
    %206 = arith.mulf %204, %205 : vector<2x256xf32>
    %207 = arith.addf %203, %206 : vector<2x256xf32>
    %c32_i32 = arith.constant 32 : i32
    %208 = tpu.dynamic_rotate %166 by %c32_i32 dim 1 : vector<2x256xf32>, i32 -> vector<2x256xf32>
    %c20 = arith.constant 20 : index
    %c0_102 = arith.constant 0 : index
    %209 = vector.load %arg5[%c20, %c0_102] : memref<107x256xf32, #tpu.memory_space<vmem>>, vector<2x256xf32>
    %210 = arith.mulf %208, %209 : vector<2x256xf32>
    %211 = arith.addf %207, %210 : vector<2x256xf32>
    %c31_i32 = arith.constant 31 : i32
    %212 = tpu.dynamic_rotate %166 by %c31_i32 dim 1 : vector<2x256xf32>, i32 -> vector<2x256xf32>
    %c22 = arith.constant 22 : index
    %c0_103 = arith.constant 0 : index
    %213 = vector.load %arg5[%c22, %c0_103] : memref<107x256xf32, #tpu.memory_space<vmem>>, vector<2x256xf32>
    %214 = arith.mulf %212, %213 : vector<2x256xf32>
    %215 = arith.addf %211, %214 : vector<2x256xf32>
    %c30_i32 = arith.constant 30 : i32
    %216 = tpu.dynamic_rotate %166 by %c30_i32 dim 1 : vector<2x256xf32>, i32 -> vector<2x256xf32>
    %c24 = arith.constant 24 : index
    %c0_104 = arith.constant 0 : index
    %217 = vector.load %arg5[%c24, %c0_104] : memref<107x256xf32, #tpu.memory_space<vmem>>, vector<2x256xf32>
    %218 = arith.mulf %216, %217 : vector<2x256xf32>
    %219 = arith.addf %215, %218 : vector<2x256xf32>
    %c29_i32 = arith.constant 29 : i32
    %220 = tpu.dynamic_rotate %166 by %c29_i32 dim 1 : vector<2x256xf32>, i32 -> vector<2x256xf32>
    %c26 = arith.constant 26 : index
    %c0_105 = arith.constant 0 : index
    %221 = vector.load %arg5[%c26, %c0_105] : memref<107x256xf32, #tpu.memory_space<vmem>>, vector<2x256xf32>
    %222 = arith.mulf %220, %221 : vector<2x256xf32>
    %223 = arith.addf %219, %222 : vector<2x256xf32>
    %c19_i32 = arith.constant 19 : i32
    %224 = tpu.dynamic_rotate %166 by %c19_i32 dim 1 : vector<2x256xf32>, i32 -> vector<2x256xf32>
    %c28 = arith.constant 28 : index
    %c0_106 = arith.constant 0 : index
    %225 = vector.load %arg5[%c28, %c0_106] : memref<107x256xf32, #tpu.memory_space<vmem>>, vector<2x256xf32>
    %226 = arith.mulf %224, %225 : vector<2x256xf32>
    %227 = arith.addf %223, %226 : vector<2x256xf32>
    %c18_i32 = arith.constant 18 : i32
    %228 = tpu.dynamic_rotate %166 by %c18_i32 dim 1 : vector<2x256xf32>, i32 -> vector<2x256xf32>
    %c30 = arith.constant 30 : index
    %c0_107 = arith.constant 0 : index
    %229 = vector.load %arg5[%c30, %c0_107] : memref<107x256xf32, #tpu.memory_space<vmem>>, vector<2x256xf32>
    %230 = arith.mulf %228, %229 : vector<2x256xf32>
    %231 = arith.addf %227, %230 : vector<2x256xf32>
    %c17_i32_108 = arith.constant 17 : i32
    %232 = tpu.dynamic_rotate %166 by %c17_i32_108 dim 1 : vector<2x256xf32>, i32 -> vector<2x256xf32>
    %c32_109 = arith.constant 32 : index
    %c0_110 = arith.constant 0 : index
    %233 = vector.load %arg5[%c32_109, %c0_110] : memref<107x256xf32, #tpu.memory_space<vmem>>, vector<2x256xf32>
    %234 = arith.mulf %232, %233 : vector<2x256xf32>
    %235 = arith.addf %231, %234 : vector<2x256xf32>
    %c16_i32_111 = arith.constant 16 : i32
    %236 = tpu.dynamic_rotate %166 by %c16_i32_111 dim 1 : vector<2x256xf32>, i32 -> vector<2x256xf32>
    %c34 = arith.constant 34 : index
    %c0_112 = arith.constant 0 : index
    %237 = vector.load %arg5[%c34, %c0_112] : memref<107x256xf32, #tpu.memory_space<vmem>>, vector<2x256xf32>
    %238 = arith.mulf %236, %237 : vector<2x256xf32>
    %239 = arith.addf %235, %238 : vector<2x256xf32>
    %c15_i32_113 = arith.constant 15 : i32
    %240 = tpu.dynamic_rotate %166 by %c15_i32_113 dim 1 : vector<2x256xf32>, i32 -> vector<2x256xf32>
    %c36 = arith.constant 36 : index
    %c0_114 = arith.constant 0 : index
    %241 = vector.load %arg5[%c36, %c0_114] : memref<107x256xf32, #tpu.memory_space<vmem>>, vector<2x256xf32>
    %242 = arith.mulf %240, %241 : vector<2x256xf32>
    %243 = arith.addf %239, %242 : vector<2x256xf32>
    %c14_i32 = arith.constant 14 : i32
    %244 = tpu.dynamic_rotate %166 by %c14_i32 dim 1 : vector<2x256xf32>, i32 -> vector<2x256xf32>
    %c38 = arith.constant 38 : index
    %c0_115 = arith.constant 0 : index
    %245 = vector.load %arg5[%c38, %c0_115] : memref<107x256xf32, #tpu.memory_space<vmem>>, vector<2x256xf32>
    %246 = arith.mulf %244, %245 : vector<2x256xf32>
    %247 = arith.addf %243, %246 : vector<2x256xf32>
    %c13_i32 = arith.constant 13 : i32
    %248 = tpu.dynamic_rotate %166 by %c13_i32 dim 1 : vector<2x256xf32>, i32 -> vector<2x256xf32>
    %c40 = arith.constant 40 : index
    %c0_116 = arith.constant 0 : index
    %249 = vector.load %arg5[%c40, %c0_116] : memref<107x256xf32, #tpu.memory_space<vmem>>, vector<2x256xf32>
    %250 = arith.mulf %248, %249 : vector<2x256xf32>
    %251 = arith.addf %247, %250 : vector<2x256xf32>
    %c3_i32 = arith.constant 3 : i32
    %252 = tpu.dynamic_rotate %166 by %c3_i32 dim 1 : vector<2x256xf32>, i32 -> vector<2x256xf32>
    %c42 = arith.constant 42 : index
    %c0_117 = arith.constant 0 : index
    %253 = vector.load %arg5[%c42, %c0_117] : memref<107x256xf32, #tpu.memory_space<vmem>>, vector<2x256xf32>
    %254 = arith.mulf %252, %253 : vector<2x256xf32>
    %255 = arith.addf %251, %254 : vector<2x256xf32>
    %c2_i32 = arith.constant 2 : i32
    %256 = tpu.dynamic_rotate %166 by %c2_i32 dim 1 : vector<2x256xf32>, i32 -> vector<2x256xf32>
    %c44 = arith.constant 44 : index
    %c0_118 = arith.constant 0 : index
    %257 = vector.load %arg5[%c44, %c0_118] : memref<107x256xf32, #tpu.memory_space<vmem>>, vector<2x256xf32>
    %258 = arith.mulf %256, %257 : vector<2x256xf32>
    %259 = arith.addf %255, %258 : vector<2x256xf32>
    %c1_i32_119 = arith.constant 1 : i32
    %260 = tpu.dynamic_rotate %166 by %c1_i32_119 dim 1 : vector<2x256xf32>, i32 -> vector<2x256xf32>
    %c46 = arith.constant 46 : index
    %c0_120 = arith.constant 0 : index
    %261 = vector.load %arg5[%c46, %c0_120] : memref<107x256xf32, #tpu.memory_space<vmem>>, vector<2x256xf32>
    %262 = arith.mulf %260, %261 : vector<2x256xf32>
    %263 = arith.addf %259, %262 : vector<2x256xf32>
    %c48_121 = arith.constant 48 : index
    %c0_122 = arith.constant 0 : index
    %264 = vector.load %arg5[%c48_121, %c0_122] : memref<107x256xf32, #tpu.memory_space<vmem>>, vector<2x256xf32>
    %265 = arith.mulf %166, %264 : vector<2x256xf32>
    %266 = arith.addf %263, %265 : vector<2x256xf32>
    %c255_i32_123 = arith.constant 255 : i32
    %267 = tpu.dynamic_rotate %166 by %c255_i32_123 dim 1 : vector<2x256xf32>, i32 -> vector<2x256xf32>
    %c50 = arith.constant 50 : index
    %c0_124 = arith.constant 0 : index
    %268 = vector.load %arg5[%c50, %c0_124] : memref<107x256xf32, #tpu.memory_space<vmem>>, vector<2x256xf32>
    %269 = arith.mulf %267, %268 : vector<2x256xf32>
    %270 = arith.addf %266, %269 : vector<2x256xf32>
    %c254_i32 = arith.constant 254 : i32
    %271 = tpu.dynamic_rotate %166 by %c254_i32 dim 1 : vector<2x256xf32>, i32 -> vector<2x256xf32>
    %c52 = arith.constant 52 : index
    %c0_125 = arith.constant 0 : index
    %272 = vector.load %arg5[%c52, %c0_125] : memref<107x256xf32, #tpu.memory_space<vmem>>, vector<2x256xf32>
    %273 = arith.mulf %271, %272 : vector<2x256xf32>
    %274 = arith.addf %270, %273 : vector<2x256xf32>
    %c253_i32 = arith.constant 253 : i32
    %275 = tpu.dynamic_rotate %166 by %c253_i32 dim 1 : vector<2x256xf32>, i32 -> vector<2x256xf32>
    %c54 = arith.constant 54 : index
    %c0_126 = arith.constant 0 : index
    %276 = vector.load %arg5[%c54, %c0_126] : memref<107x256xf32, #tpu.memory_space<vmem>>, vector<2x256xf32>
    %277 = arith.mulf %275, %276 : vector<2x256xf32>
    %278 = arith.addf %274, %277 : vector<2x256xf32>
    %c243_i32 = arith.constant 243 : i32
    %279 = tpu.dynamic_rotate %166 by %c243_i32 dim 1 : vector<2x256xf32>, i32 -> vector<2x256xf32>
    %c56 = arith.constant 56 : index
    %c0_127 = arith.constant 0 : index
    %280 = vector.load %arg5[%c56, %c0_127] : memref<107x256xf32, #tpu.memory_space<vmem>>, vector<2x256xf32>
    %281 = arith.mulf %279, %280 : vector<2x256xf32>
    %282 = arith.addf %278, %281 : vector<2x256xf32>
    %c242_i32 = arith.constant 242 : i32
    %283 = tpu.dynamic_rotate %166 by %c242_i32 dim 1 : vector<2x256xf32>, i32 -> vector<2x256xf32>
    %c58 = arith.constant 58 : index
    %c0_128 = arith.constant 0 : index
    %284 = vector.load %arg5[%c58, %c0_128] : memref<107x256xf32, #tpu.memory_space<vmem>>, vector<2x256xf32>
    %285 = arith.mulf %283, %284 : vector<2x256xf32>
    %286 = arith.addf %282, %285 : vector<2x256xf32>
    %c241_i32_129 = arith.constant 241 : i32
    %287 = tpu.dynamic_rotate %166 by %c241_i32_129 dim 1 : vector<2x256xf32>, i32 -> vector<2x256xf32>
    %c60 = arith.constant 60 : index
    %c0_130 = arith.constant 0 : index
    %288 = vector.load %arg5[%c60, %c0_130] : memref<107x256xf32, #tpu.memory_space<vmem>>, vector<2x256xf32>
    %289 = arith.mulf %287, %288 : vector<2x256xf32>
    %290 = arith.addf %286, %289 : vector<2x256xf32>
    %c240_i32_131 = arith.constant 240 : i32
    %291 = tpu.dynamic_rotate %166 by %c240_i32_131 dim 1 : vector<2x256xf32>, i32 -> vector<2x256xf32>
    %c62 = arith.constant 62 : index
    %c0_132 = arith.constant 0 : index
    %292 = vector.load %arg5[%c62, %c0_132] : memref<107x256xf32, #tpu.memory_space<vmem>>, vector<2x256xf32>
    %293 = arith.mulf %291, %292 : vector<2x256xf32>
    %294 = arith.addf %290, %293 : vector<2x256xf32>
    %c239_i32_133 = arith.constant 239 : i32
    %295 = tpu.dynamic_rotate %166 by %c239_i32_133 dim 1 : vector<2x256xf32>, i32 -> vector<2x256xf32>
    %c64_134 = arith.constant 64 : index
    %c0_135 = arith.constant 0 : index
    %296 = vector.load %arg5[%c64_134, %c0_135] : memref<107x256xf32, #tpu.memory_space<vmem>>, vector<2x256xf32>
    %297 = arith.mulf %295, %296 : vector<2x256xf32>
    %298 = arith.addf %294, %297 : vector<2x256xf32>
    %c238_i32 = arith.constant 238 : i32
    %299 = tpu.dynamic_rotate %166 by %c238_i32 dim 1 : vector<2x256xf32>, i32 -> vector<2x256xf32>
    %c66 = arith.constant 66 : index
    %c0_136 = arith.constant 0 : index
    %300 = vector.load %arg5[%c66, %c0_136] : memref<107x256xf32, #tpu.memory_space<vmem>>, vector<2x256xf32>
    %301 = arith.mulf %299, %300 : vector<2x256xf32>
    %302 = arith.addf %298, %301 : vector<2x256xf32>
    %c237_i32 = arith.constant 237 : i32
    %303 = tpu.dynamic_rotate %166 by %c237_i32 dim 1 : vector<2x256xf32>, i32 -> vector<2x256xf32>
    %c68 = arith.constant 68 : index
    %c0_137 = arith.constant 0 : index
    %304 = vector.load %arg5[%c68, %c0_137] : memref<107x256xf32, #tpu.memory_space<vmem>>, vector<2x256xf32>
    %305 = arith.mulf %303, %304 : vector<2x256xf32>
    %306 = arith.addf %302, %305 : vector<2x256xf32>
    %c227_i32 = arith.constant 227 : i32
    %307 = tpu.dynamic_rotate %166 by %c227_i32 dim 1 : vector<2x256xf32>, i32 -> vector<2x256xf32>
    %c70 = arith.constant 70 : index
    %c0_138 = arith.constant 0 : index
    %308 = vector.load %arg5[%c70, %c0_138] : memref<107x256xf32, #tpu.memory_space<vmem>>, vector<2x256xf32>
    %309 = arith.mulf %307, %308 : vector<2x256xf32>
    %310 = arith.addf %306, %309 : vector<2x256xf32>
    %c226_i32 = arith.constant 226 : i32
    %311 = tpu.dynamic_rotate %166 by %c226_i32 dim 1 : vector<2x256xf32>, i32 -> vector<2x256xf32>
    %c72 = arith.constant 72 : index
    %c0_139 = arith.constant 0 : index
    %312 = vector.load %arg5[%c72, %c0_139] : memref<107x256xf32, #tpu.memory_space<vmem>>, vector<2x256xf32>
    %313 = arith.mulf %311, %312 : vector<2x256xf32>
    %314 = arith.addf %310, %313 : vector<2x256xf32>
    %c225_i32 = arith.constant 225 : i32
    %315 = tpu.dynamic_rotate %166 by %c225_i32 dim 1 : vector<2x256xf32>, i32 -> vector<2x256xf32>
    %c74 = arith.constant 74 : index
    %c0_140 = arith.constant 0 : index
    %316 = vector.load %arg5[%c74, %c0_140] : memref<107x256xf32, #tpu.memory_space<vmem>>, vector<2x256xf32>
    %317 = arith.mulf %315, %316 : vector<2x256xf32>
    %318 = arith.addf %314, %317 : vector<2x256xf32>
    %c224_i32 = arith.constant 224 : i32
    %319 = tpu.dynamic_rotate %166 by %c224_i32 dim 1 : vector<2x256xf32>, i32 -> vector<2x256xf32>
    %c76 = arith.constant 76 : index
    %c0_141 = arith.constant 0 : index
    %320 = vector.load %arg5[%c76, %c0_141] : memref<107x256xf32, #tpu.memory_space<vmem>>, vector<2x256xf32>
    %321 = arith.mulf %319, %320 : vector<2x256xf32>
    %322 = arith.addf %318, %321 : vector<2x256xf32>
    %c223_i32 = arith.constant 223 : i32
    %323 = tpu.dynamic_rotate %166 by %c223_i32 dim 1 : vector<2x256xf32>, i32 -> vector<2x256xf32>
    %c78 = arith.constant 78 : index
    %c0_142 = arith.constant 0 : index
    %324 = vector.load %arg5[%c78, %c0_142] : memref<107x256xf32, #tpu.memory_space<vmem>>, vector<2x256xf32>
    %325 = arith.mulf %323, %324 : vector<2x256xf32>
    %326 = arith.addf %322, %325 : vector<2x256xf32>
    %c222_i32 = arith.constant 222 : i32
    %327 = tpu.dynamic_rotate %166 by %c222_i32 dim 1 : vector<2x256xf32>, i32 -> vector<2x256xf32>
    %c80_143 = arith.constant 80 : index
    %c0_144 = arith.constant 0 : index
    %328 = vector.load %arg5[%c80_143, %c0_144] : memref<107x256xf32, #tpu.memory_space<vmem>>, vector<2x256xf32>
    %329 = arith.mulf %327, %328 : vector<2x256xf32>
    %330 = arith.addf %326, %329 : vector<2x256xf32>
    %c221_i32 = arith.constant 221 : i32
    %331 = tpu.dynamic_rotate %166 by %c221_i32 dim 1 : vector<2x256xf32>, i32 -> vector<2x256xf32>
    %c82 = arith.constant 82 : index
    %c0_145 = arith.constant 0 : index
    %332 = vector.load %arg5[%c82, %c0_145] : memref<107x256xf32, #tpu.memory_space<vmem>>, vector<2x256xf32>
    %333 = arith.mulf %331, %332 : vector<2x256xf32>
    %334 = arith.addf %330, %333 : vector<2x256xf32>
    %c211_i32 = arith.constant 211 : i32
    %335 = tpu.dynamic_rotate %166 by %c211_i32 dim 1 : vector<2x256xf32>, i32 -> vector<2x256xf32>
    %c84 = arith.constant 84 : index
    %c0_146 = arith.constant 0 : index
    %336 = vector.load %arg5[%c84, %c0_146] : memref<107x256xf32, #tpu.memory_space<vmem>>, vector<2x256xf32>
    %337 = arith.mulf %335, %336 : vector<2x256xf32>
    %338 = arith.addf %334, %337 : vector<2x256xf32>
    %c210_i32 = arith.constant 210 : i32
    %339 = tpu.dynamic_rotate %166 by %c210_i32 dim 1 : vector<2x256xf32>, i32 -> vector<2x256xf32>
    %c86 = arith.constant 86 : index
    %c0_147 = arith.constant 0 : index
    %340 = vector.load %arg5[%c86, %c0_147] : memref<107x256xf32, #tpu.memory_space<vmem>>, vector<2x256xf32>
    %341 = arith.mulf %339, %340 : vector<2x256xf32>
    %342 = arith.addf %338, %341 : vector<2x256xf32>
    %c209_i32 = arith.constant 209 : i32
    %343 = tpu.dynamic_rotate %166 by %c209_i32 dim 1 : vector<2x256xf32>, i32 -> vector<2x256xf32>
    %c88 = arith.constant 88 : index
    %c0_148 = arith.constant 0 : index
    %344 = vector.load %arg5[%c88, %c0_148] : memref<107x256xf32, #tpu.memory_space<vmem>>, vector<2x256xf32>
    %345 = arith.mulf %343, %344 : vector<2x256xf32>
    %346 = arith.addf %342, %345 : vector<2x256xf32>
    %c208_i32 = arith.constant 208 : i32
    %347 = tpu.dynamic_rotate %166 by %c208_i32 dim 1 : vector<2x256xf32>, i32 -> vector<2x256xf32>
    %c90 = arith.constant 90 : index
    %c0_149 = arith.constant 0 : index
    %348 = vector.load %arg5[%c90, %c0_149] : memref<107x256xf32, #tpu.memory_space<vmem>>, vector<2x256xf32>
    %349 = arith.mulf %347, %348 : vector<2x256xf32>
    %350 = arith.addf %346, %349 : vector<2x256xf32>
    %c207_i32 = arith.constant 207 : i32
    %351 = tpu.dynamic_rotate %166 by %c207_i32 dim 1 : vector<2x256xf32>, i32 -> vector<2x256xf32>
    %c92 = arith.constant 92 : index
    %c0_150 = arith.constant 0 : index
    %352 = vector.load %arg5[%c92, %c0_150] : memref<107x256xf32, #tpu.memory_space<vmem>>, vector<2x256xf32>
    %353 = arith.mulf %351, %352 : vector<2x256xf32>
    %354 = arith.addf %350, %353 : vector<2x256xf32>
    %c206_i32 = arith.constant 206 : i32
    %355 = tpu.dynamic_rotate %166 by %c206_i32 dim 1 : vector<2x256xf32>, i32 -> vector<2x256xf32>
    %c94 = arith.constant 94 : index
    %c0_151 = arith.constant 0 : index
    %356 = vector.load %arg5[%c94, %c0_151] : memref<107x256xf32, #tpu.memory_space<vmem>>, vector<2x256xf32>
    %357 = arith.mulf %355, %356 : vector<2x256xf32>
    %358 = arith.addf %354, %357 : vector<2x256xf32>
    %c205_i32 = arith.constant 205 : i32
    %359 = tpu.dynamic_rotate %166 by %c205_i32 dim 1 : vector<2x256xf32>, i32 -> vector<2x256xf32>
    %c96_152 = arith.constant 96 : index
    %c0_153 = arith.constant 0 : index
    %360 = vector.load %arg5[%c96_152, %c0_153] : memref<107x256xf32, #tpu.memory_space<vmem>>, vector<2x256xf32>
    %361 = arith.mulf %359, %360 : vector<2x256xf32>
    %362 = arith.addf %358, %361 : vector<2x256xf32>
    %363 = vector.extract_strided_slice %362 {offsets = [0, 0], sizes = [1, 256], strides = [1, 1]} : vector<2x256xf32> to vector<1x256xf32>
    %364 = vector.extract_strided_slice %362 {offsets = [1, 0], sizes = [1, 256], strides = [1, 1]} : vector<2x256xf32> to vector<1x256xf32>
    %365 = arith.addf %363, %364 : vector<1x256xf32>
    %366 = arith.negf %365 : vector<1x256xf32>
    %367 = math.exp %366 : vector<1x256xf32>
    %cst_154 = arith.constant 1.000000e+00 : f32
    %368 = vector.broadcast %cst_154 : f32 to vector<1x256xf32>
    %369 = arith.addf %368, %367 : vector<1x256xf32>
    %370 = arith.divf %368, %369 : vector<1x256xf32>
    %371 = vector.broadcast %370 : vector<1x256xf32> to vector<32x256xf32>
    %372 = arith.mulf %159, %371 : vector<32x256xf32>
    %373 = arith.addf %372, %61 : vector<32x256xf32>
    %cst_155 = arith.constant 0.000000e+00 : f32
    %374 = vector.broadcast %cst_155 : f32 to vector<32x256xf32>
    %375 = arith.maximumf %373, %374 : vector<32x256xf32>
    %c0_156 = arith.constant 0 : index
    %c0_157 = arith.constant 0 : index
    %c0_158 = arith.constant 0 : index
    %376 = vector.load %arg6[%c0_156, %c0_157, %c0_158] : memref<1x32x256xf32, #tpu.memory_space<vmem>>, vector<1x32x256xf32>
    %377 = vector.shape_cast %376 : vector<1x32x256xf32> to vector<32x256xf32>
    %378 = vector.shape_cast %375 : vector<32x256xf32> to vector<1x32x256xf32>
    tpu.vector_store %arg6[%c0_156, %c0_157, %c0_158], %378 {strides = array<i32>} : memref<1x32x256xf32, #tpu.memory_space<vmem>>, vector<1x32x256xf32>,
    return
  }
  func.func @transform_0(%arg0: i32) -> (i32, i32, i32) {
    %c0_i32 = arith.constant 0 : i32
    %c0_i32_0 = arith.constant 0 : i32
    %c0_i32_1 = arith.constant 0 : i32
    return %arg0, %c0_i32, %c0_i32_0 : i32, i32, i32
  }
  func.func @transform_1(%arg0: i32) -> (i32, i32) {
    %c0_i32 = arith.constant 0 : i32
    %c0_i32_0 = arith.constant 0 : i32
    %c0_i32_1 = arith.constant 0 : i32
    return %c0_i32, %c0_i32_0 : i32, i32
  }
  func.func @transform_2(%arg0: i32) -> (i32, i32) {
    %c0_i32 = arith.constant 0 : i32
    %c0_i32_0 = arith.constant 0 : i32
    %c0_i32_1 = arith.constant 0 : i32
    return %c0_i32, %c0_i32_0 : i32, i32
  }
  func.func @transform_3(%arg0: i32) -> (i32, i32) {
    %c0_i32 = arith.constant 0 : i32
    %c0_i32_0 = arith.constant 0 : i32
    %c0_i32_1 = arith.constant 0 : i32
    return %c0_i32, %c0_i32_0 : i32, i32
  }
  func.func @transform_4(%arg0: i32) -> (i32, i32) {
    %c0_i32 = arith.constant 0 : i32
    %c0_i32_0 = arith.constant 0 : i32
    %c0_i32_1 = arith.constant 0 : i32
    return %c0_i32, %c0_i32_0 : i32, i32
  }
  func.func @transform_5(%arg0: i32) -> (i32, i32, i32) {
    %c0_i32 = arith.constant 0 : i32
    %c0_i32_0 = arith.constant 0 : i32
    %c0_i32_1 = arith.constant 0 : i32
    return %arg0, %c0_i32, %c0_i32_0 : i32, i32, i32
  }
}

</mosaic_0001>

<bundles_post_ra>
// kernel: residual_block.1
= control target key start
LH: loop header
LB: loop body
LE: loop exit
PB: predicated region body
PF: predicated region fallthrough
CT: control target
= control target key end

     0   :  { %s3468_s18 = smov 0   ;;  %s5034_s0 = inlined_call_operand.vmem [shape: f32[2,16,256], index: 0, kind: input, shape index: {}]   ;;  %s5035_s1 = inlined_call_operand.vmem [shape: bf16[64,144], index: 1, kind: input, shape index: {}]   ;;  %s5036_s2 = inlined_call_operand.vmem [shape: bf16[32,288], index: 2, kind: input, shape index: {}]   ;;  %s5037_s3 = inlined_call_operand.vmem [shape: f32[64,6], index: 3, kind: input, shape index: {}]   ;;  %s5038_s4 = inlined_call_operand.vmem [shape: f32[107,256], index: 4, kind: input, shape index: {}]   ;;  %s5039_s5 = inlined_call_operand.vmem [shape: f32[2,32,256], index: 5, kind: output, shape index: {}]  }
   0x1 LB: > { %s2874_s19 = sadd.s32 4294967295, %s3380_s18   ;;  %p2878_p0 = scmp.ge.s32.totalorder %s3380_s18, 1  ;;  %s3380_s18 = sphi %s3468_s18, %s15_s18  }
   0x2   : > { %p187_p1 = scmp.lt.s32.totalorder %s3380_s18, 3 }
   0x4   : > { %p188_p2 = pnand %p2878_p0, %p187_p1 }
   0x6   : > { %191 = sbr.rel (%p188_p2) target bundleno = 1687 (0x697), region = 40 }
   0xb   : > { %p215_p3 = scmp.lt.s32.totalorder %s2874_s19, 1  ;;  %s3382_s24 = smov 112   ;;  %v238_v5 = vlaneseq  ;;  %v2889_v8 = vld [vmem:[%s5038_s4 + $0xd1] ss:$8 sm:$0x3]  ;;  %vm660_vm8 = vcmask 130048  }
   0xc   : > { %s3383_s25 = smov 113   ;;  %s3384_s26 = smov 127   ;;  %v420_v9 = vperm.slane %v2889_v8, 0  ;;  %v421_v10 = vperm.slane %v2889_v8, 1  ;;  %vm1451_vm9 = vcmask 261120   ;;  %vm1607_vm11 = vcmask 7168  }
   0xd   : > { %s5058_s19 = smov (!%p215_p3, %s2874_s19), 1  ;;  %s3385_s27 = smov 1   ;;  %v3554_v7 = vand.u32 127, %v238_v5  ;;  %v2888_v27 = vld [vmem:[%s5038_s4 + $0xd0] ss:$8 sm:$0x3] }
   0xe   : > { %s3191_s20 = sshll.u32 %s5058_s19, 5  ;;  %s3386_s28 = smov 15   ;;  %v392_v30 = vperm.slane %v2888_v27, 0  ;;  %v393_v31 = vperm.slane %v2888_v27, 1  ;;  %vm1632_vm12 = vcmask 15360  }
   0xf   : > { %s219_s23 = scalar_lea.vmem %s5034_s0, %s3191_s20  ;;  %s3387_s29 = smov 16   ;;  %vm5041_vm0 = vcmp.lt.s32.totalorder %v3554_v7, 112  ;;  %vm5042_vm1 = vcmp.lt.s32.totalorder %v3554_v7, 113  ;;  %v2887_v42 = vld [vmem:[%s5038_s4 + $0xc7] ss:$8 sm:$0x3] }
  0x10   : > { %v3482_v0 = vld [vmem:[%s219_s23 + $0x8] sm:$0xff]  ;;  %v3484_v1 = vld [vmem:[%s219_s23] sm:$0xff]  ;;  %v3492_v2 = vld [vmem:[%s219_s23 + $0x18] sm:$0xff]  ;;  %s3388_s30 = smov 17   ;;  %s3389_s6 = smov 111   ;;  %vm356_vm2 = vcmp.lt.s32.totalorder %v3554_v7, 127 }
  0x11   : > { %408 = vrot.lane.b32.xlu1 %v3482_v0, %s3382_s24  ;;  %404 = vrot.lane.b32.xlu0 %v3484_v1, %s3382_s24  ;;  %v3494_v3 = vld [vmem:[%s219_s23 + $0x10] sm:$0xff]  ;;  %v344_v23 = vpack.c.bf16 %v3482_v0, %v3484_v1  ;;  %v364_v50 = vperm.slane %v2887_v42, 0  ;;  %v365_v51 = vperm.slane %v2887_v42, 1  ;;  %vm324_vm3 = vcmp.lt.s32.totalorder %v3554_v7, 1  ;;  %s3398_s14 = smov 51   ;;  %s3399_s15 = smov 50  }
  0x12   : > { %376 = vrot.lane.b32.xlu2 %v3484_v1, %s3383_s25  ;;  %v345_v24 = vpack.c.bf16 %v3492_v2, %v3494_v3  ;;  %vm296_vm4 = vcmp.lt.s32.totalorder %v3554_v7, 15  ;;  %vm268_vm5 = vcmp.lt.s32.totalorder %v3554_v7, 16  ;;  %vm240_vm6 = vcmp.lt.s32.totalorder %v3554_v7, 17  ;;  %s3400_s16 = smov 49   ;;  %s3401_s17 = smov 48  }
  0x13   : > { %346 = vst [vmem:[#allocation2 + $0x40] sm:$0xff] %v344_v23  ;;  %vm5040_vm7 = vcmp.lt.s32.totalorder %v3554_v7, 111  ;;  %s3402_s20 = smov 47   ;;  %s3403_s21 = smov 46  }
  0x14   : > { %347 = vst [vmem:[#allocation2 + $0x48] sm:$0xff] %v345_v24  ;;  %s3404_s22 = smov 45   ;;  %s3405_s23 = smov 35  }
  0x15   : > { %s3406_s7 = smov 34   ;;  %s3407_s8 = smov 33  }
  0x16   : > { %s3408_s9 = smov 32   ;;  %s3409_s10 = smov 31  }
  0x17   : > { %s3410_s11 = smov 30   ;;  %s3411_s12 = smov 29  }
  0x18   : > { %s3412_s13 = smov 19  }
  0x19   : > { %410 = vrot.lane.b32.xlu1 %v3492_v2, %s3382_s24  ;;  %406 = vrot.lane.b32.xlu0 %v3494_v3, %s3382_s24 }
  0x1a   : > { %378 = vrot.lane.b32.xlu2 %v3494_v3, %s3383_s25 }
  0x21   : > { %382 = vrot.lane.b32.xlu1 %v3492_v2, %s3383_s25  ;;  %380 = vrot.lane.b32.xlu0 %v3482_v0, %s3383_s25 }
  0x22   : > { %348 = vrot.lane.b32.xlu2 %v3484_v1, %s3384_s26 }
  0x29   : > { %352 = vrot.lane.b32.xlu1 %v3482_v0, %s3384_s26  ;;  %350 = vrot.lane.b32.xlu0 %v3494_v3, %s3384_s26 }
  0x2a   : > { %354 = vrot.lane.b32.xlu2 %v3492_v2, %s3384_s26 }
  0x31   : > { %318 = vrot.lane.b32.xlu1 %v3494_v3, %s3385_s27  ;;  %316 = vrot.lane.b32.xlu0 %v3484_v1, %s3385_s27 }
  0x32   : > { %320 = vrot.lane.b32.xlu2 %v3482_v0, %s3385_s27 }
  0x39   : > { %288 = vrot.lane.b32.xlu1 %v3484_v1, %s3386_s28  ;;  %322 = vrot.lane.b32.xlu0 %v3492_v2, %s3385_s27 }
  0x3a   : > { %290 = vrot.lane.b32.xlu2 %v3494_v3, %s3386_s28 }
  0x41   : > { %294 = vrot.lane.b32.xlu1 %v3492_v2, %s3386_s28  ;;  %292 = vrot.lane.b32.xlu0 %v3482_v0, %s3386_s28 }
  0x42   : > { %260 = vrot.lane.b32.xlu2 %v3484_v1, %s3387_s29 }
  0x49   : > { %264 = vrot.lane.b32.xlu1 %v3482_v0, %s3387_s29  ;;  %262 = vrot.lane.b32.xlu0 %v3494_v3, %s3387_s29 }
  0x4a   : > { %266 = vrot.lane.b32.xlu2 %v3492_v2, %s3387_s29 }
  0x51   : > { %232 = vrot.lane.b32.xlu1 %v3494_v3, %s3388_s30  ;;  %230 = vrot.lane.b32.xlu0 %v3484_v1, %s3388_s30 }
  0x52   : > { %234 = vrot.lane.b32.xlu2 %v3482_v0, %s3388_s30 }
  0x59   : > { %432 = vrot.lane.b32.xlu1 %v3484_v1, %s3389_s6  ;;  %236 = vrot.lane.b32.xlu0 %v3492_v2, %s3388_s30 }
  0x5a   : > { %434 = vrot.lane.b32.xlu2 %v3494_v3, %s3389_s6 }
  0x61   : > { %438 = vrot.lane.b32.xlu1 %v3492_v2, %s3389_s6  ;;  %436 = vrot.lane.b32.xlu0 %v3482_v0, %s3389_s6  ;;  %v2886_v0 = vld [vmem:[%s5038_s4 + $0xc5] ss:$8 sm:$0x3] }
  0x62   : > { %v332_v5 = vperm.slane %v2886_v0, 0 }
  0x6c   : > { %v377_v4 = vpop.permute.xlu2 %376 }
  0x74   : > { %v379_v6 = vpop.permute.xlu2 %378 }
  0x7c   : > { %v349_v15 = vpop.permute.xlu2 %348 }
  0x83   : > { %v409_v11 = vpop.permute.xlu1 %408  ;;  %v405_v12 = vpop.permute.xlu0 %404 }
  0x84   : > { %v413_v13 = vsel %vm5041_vm0, %v405_v12, %v409_v11  ;;  %v415_v14 = vsel %vm5041_vm0, %v409_v11, %v405_v12  ;;  %v355_v28 = vpop.permute.xlu2 %354 }
  0x85   : > { %v424_v16 = vmul.f32 %v420_v9, %v413_v13  ;;  %v425_v17 = vmul.f32 %v421_v10, %v415_v14 }
  0x87   : > { %v428_v18 = vpack.c.bf16 %v425_v17, %v424_v16 }
  0x89   : > { %430 = vst [vmem:[#allocation2 + $0x70] sm:$0xff] %v428_v18 }
  0x8b   : > { %v411_v19 = vpop.permute.xlu1 %410  ;;  %v407_v20 = vpop.permute.xlu0 %406 }
  0x8c   : > { %v414_v21 = vsel %vm5041_vm0, %v407_v20, %v411_v19  ;;  %v416_v22 = vsel %vm5041_vm0, %v411_v19, %v407_v20  ;;  %v321_v49 = vpop.permute.xlu2 %320  ;;  %v2957_v20 = vld [vmem:[#allocation2 + $0x40] sm:$0xf] }
  0x8d   : > { %v426_v25 = vmul.f32 %v420_v9, %v414_v21  ;;  %v427_v26 = vmul.f32 %v421_v10, %v416_v22  ;;  %v333_v9 = vperm.slane %v2886_v0, 1  ;;  %v3210_v21 = vld [vmem:[#allocation2 + $0x44] sm:$0xf0]  ;;  %v3209_v22 = vld [vmem:[#allocation2 + $0x44] sm:$0xf] }
  0x8f   : > { %v429_v29 = vpack.c.bf16 %v427_v26, %v426_v25  ;;  %v2959_v25 = vld [vmem:[#allocation2 + $0x48] sm:$0xf0] }
  0x90   : > { %v2981_v45 = vld [vmem:[#allocation2 + $0x70] sm:$0xf]  ;;  %v3215_v47 = vld [vmem:[#allocation2 + $0x74] sm:$0xf] }
  0x91   : > { %431 = vst [vmem:[#allocation2 + $0x78] sm:$0xff] %v429_v29 }
  0x93   : > { %v383_v32 = vpop.permute.xlu1 %382  ;;  %v381_v33 = vpop.permute.xlu0 %380 }
  0x94   : > { %v386_v34 = vsel %vm5042_vm1, %v379_v6, %v383_v32  ;;  %v388_v35 = vsel %vm5042_vm1, %v383_v32, %v379_v6  ;;  %v385_v36 = vsel %vm5042_vm1, %v377_v4, %v381_v33  ;;  %v387_v37 = vsel %vm5042_vm1, %v381_v33, %v377_v4  ;;  %v291_v12 = vpop.permute.xlu2 %290 }
  0x95   : > { %v398_v38 = vmul.f32 %v392_v30, %v386_v34  ;;  %v399_v39 = vmul.f32 %v393_v31, %v388_v35  ;;  %v396_v40 = vmul.f32 %v392_v30, %v385_v36  ;;  %v397_v41 = vmul.f32 %v393_v31, %v387_v37 }
  0x96   : > { %v2958_v32 = vor.u32 %v3210_v21, %v2957_v20  ;;  %v2962_v35 = vor.u32 %v3209_v22, %v2959_v25 }
  0x97   : > { %v401_v43 = vpack.c.bf16 %v399_v39, %v398_v38  ;;  %v400_v44 = vpack.c.bf16 %v397_v41, %v396_v40  ;;  %v2885_v39 = vld [vmem:[%s5038_s4 + $0xc4] ss:$8 sm:$0x3] }
  0x98   : > { %v3216_v46 = vld [vmem:[#allocation2 + $0x74] sm:$0xf0]  ;;  %v2983_v48 = vld [vmem:[#allocation2 + $0x78] sm:$0xf0]  ;;  %v304_v41 = vperm.slane %v2885_v39, 0  ;;  %v305_v42 = vperm.slane %v2885_v39, 1 }
  0x99   : > { %403 = vst [vmem:[#allocation2 + $0x68] sm:$0xff] %v401_v43  ;;  %v2982_v52 = vor.u32 %v3216_v46, %v2981_v45  ;;  %v2986_v53 = vor.u32 %v3215_v47, %v2983_v48 }
  0x9a   : > { %402 = vst [vmem:[#allocation2 + $0x60] sm:$0xff] %v400_v44 }
  0x9b   : > { %v353_v54 = vpop.permute.xlu1 %352  ;;  %673 = vmatpush.bf16.msra.mxu0 %v2982_v52  ;;  %731 = vmatpush.bf16.msra.mxu2 %v2986_v53  ;;  %v351_v55 = vpop.permute.xlu0 %350  ;;  %v2884_v53 = vld [vmem:[%s5038_s4 + $0xc3] ss:$8 sm:$0x3] }
  0x9c   : > { %v357_v56 = vsel %vm356_vm2, %v349_v15, %v353_v54  ;;  %v359_v57 = vsel %vm356_vm2, %v353_v54, %v349_v15  ;;  %v358_v58 = vsel %vm356_vm2, %v351_v55, %v355_v28  ;;  %v360_v59 = vsel %vm356_vm2, %v355_v28, %v351_v55  ;;  %v261_v38 = vpop.permute.xlu2 %260 }
  0x9d   : > { %v368_v60 = vmul.f32 %v364_v50, %v357_v56  ;;  %v369_v61 = vmul.f32 %v365_v51, %v359_v57  ;;  %v370_v62 = vmul.f32 %v364_v50, %v358_v58  ;;  %v371_v63 = vmul.f32 %v365_v51, %v360_v59 }
  0x9f   : > { %v372_v1 = vpack.c.bf16 %v369_v61, %v368_v60  ;;  %v373_v2 = vpack.c.bf16 %v371_v63, %v370_v62  ;;  %v276_v61 = vperm.slane %v2884_v53, 0  ;;  %v277_v62 = vperm.slane %v2884_v53, 1 }
  0xa0   : > { %v3214_v3 = vld [vmem:[#allocation2 + $0x64] sm:$0xf0]  ;;  %v2975_v4 = vld [vmem:[#allocation2 + $0x68] sm:$0xf0] }
  0xa1   : > { %374 = vst [vmem:[#allocation2 + $0x50] sm:$0xff] %v372_v1  ;;  %v2973_v6 = vld [vmem:[#allocation2 + $0x60] sm:$0xf]  ;;  %v3213_v8 = vld [vmem:[#allocation2 + $0x64] sm:$0xf] }
  0xa2   : > { %375 = vst [vmem:[#allocation2 + $0x58] sm:$0xff] %v373_v2  ;;  %v2974_v10 = vor.u32 %v3214_v3, %v2973_v6  ;;  %v2978_v11 = vor.u32 %v3213_v8, %v2975_v4 }
  0xa3   : > { %v319_v13 = vpop.permute.xlu1 %318  ;;  %v317_v14 = vpop.permute.xlu0 %316 }
  0xa4   : > { %674 = vmatpush.bf16.msra.mxu0 %v2974_v10  ;;  %732 = vmatpush.bf16.msra.mxu2 %v2978_v11  ;;  %v325_v15 = vsel %vm324_vm3, %v317_v14, %v321_v49  ;;  %v327_v16 = vsel %vm324_vm3, %v321_v49, %v317_v14  ;;  %v267_v56 = vpop.permute.xlu2 %266 }
  0xa5   : > { %v336_v17 = vmul.f32 %v332_v5, %v327_v16  ;;  %v337_v18 = vmul.f32 %v333_v9, %v325_v15 }
  0xa7   : > { %v340_v19 = vpack.c.bf16 %v337_v18, %v336_v17 }
  0xa8   : > { %v2965_v23 = vld [vmem:[#allocation2 + $0x50] sm:$0xf]  ;;  %v3211_v24 = vld [vmem:[#allocation2 + $0x54] sm:$0xf] }
  0xa9   : > { %342 = vst [vmem:[#allocation2 + $0x30] sm:$0xff] %v340_v19  ;;  %v3212_v26 = vld [vmem:[#allocation2 + $0x54] sm:$0xf0]  ;;  %v2967_v27 = vld [vmem:[#allocation2 + $0x58] sm:$0xf0] }
  0xaa   : > { %v2966_v28 = vor.u32 %v3212_v26, %v2965_v23  ;;  %v2970_v29 = vor.u32 %v3211_v24, %v2967_v27 }
  0xab   : > { %v289_v30 = vpop.permute.xlu1 %288  ;;  %v323_v31 = vpop.permute.xlu0 %322 }
  0xac   : > { %675 = vmatpush.bf16.msra.mxu0 %v2966_v28  ;;  %733 = vmatpush.bf16.msra.mxu2 %v2970_v29  ;;  %v326_v33 = vsel %vm324_vm3, %v319_v13, %v323_v31  ;;  %v328_v34 = vsel %vm324_vm3, %v323_v31, %v319_v13  ;;  %v235_v18 = vpop.permute.xlu2 %234 }
  0xad   : > { %v338_v36 = vmul.f32 %v332_v5, %v328_v34  ;;  %v339_v37 = vmul.f32 %v333_v9, %v326_v33 }
  0xaf   : > { %v341_v40 = vpack.c.bf16 %v339_v37, %v338_v36 }
  0xb0   : > { %676 = vmatpush.bf16.msra.mxu0 %v2958_v32  ;;  %734 = vmatpush.bf16.msra.mxu2 %v2962_v35  ;;  %v2949_v57 = vld [vmem:[#allocation2 + $0x30] sm:$0xf]  ;;  %v3207_v59 = vld [vmem:[#allocation2 + $0x34] sm:$0xf] }
  0xb1   : > { %343 = vst [vmem:[#allocation2 + $0x38] sm:$0xff] %v341_v40 }
  0xb3   : > { %v295_v43 = vpop.permute.xlu1 %294  ;;  %v293_v44 = vpop.permute.xlu0 %292 }
  0xb4   : > { %v298_v45 = vsel %vm296_vm4, %v291_v12, %v295_v43  ;;  %v300_v46 = vsel %vm296_vm4, %v295_v43, %v291_v12  ;;  %v297_v47 = vsel %vm296_vm4, %v289_v30, %v293_v44  ;;  %v299_v48 = vsel %vm296_vm4, %v293_v44, %v289_v30  ;;  %v2883_v12 = vld [vmem:[%s5038_s4 + $0xc2] ss:$8 sm:$0x3]  ;;  %v2890_v43 = vld [vmem:[%s5038_s4 + $0xd2] ss:$8 sm:$0x3] }
  0xb5   : > { %v310_v49 = vmul.f32 %v304_v41, %v300_v46  ;;  %v311_v50 = vmul.f32 %v305_v42, %v298_v45  ;;  %v308_v51 = vmul.f32 %v304_v41, %v299_v48  ;;  %v309_v52 = vmul.f32 %v305_v42, %v297_v47  ;;  %v487_v44 = vld [vmem:[%s5037_s3 + $0x8] sm:$0xff] }
  0xb6   : > { %v248_v15 = vperm.slane %v2883_v12, 0  ;;  %v249_v19 = vperm.slane %v2883_v12, 1  ;;  %v3390_v46 = vmov 0   ;;  %v448_v47 = vperm.slane %v2890_v43, 0 }
  0xb7   : > { %v313_v54 = vpack.c.bf16 %v311_v50, %v310_v49  ;;  %v312_v55 = vpack.c.bf16 %v309_v52, %v308_v51  ;;  %3326 = vset.pattern.permute.xlu0 %v3390_v46  ;;  %3325 = vset.pattern.permute.xlu2 %v3390_v46  ;;  %v449_v48 = vperm.slane %v2890_v43, 1  ;;  %v435_v49 = vpop.permute.xlu2 %434 }
  0xb8   : > { %v3208_v58 = vld [vmem:[#allocation2 + $0x34] sm:$0xf0]  ;;  %v2951_v60 = vld [vmem:[#allocation2 + $0x38] sm:$0xf0]  ;;  %501 = vperm.xlu0 %3326, %v487_v44   ;;  %3327 = vset.pattern.permute.xlu1 %v3390_v46 }
  0xb9   : > { %315 = vst [vmem:[#allocation2 + $0x28] sm:$0xff] %v313_v54  ;;  %v2950_v63 = vor.u32 %v3208_v58, %v2949_v57  ;;  %v2954_v0 = vor.u32 %v3207_v59, %v2951_v60  ;;  %v2893_v60 = vld [vmem:[%s5035_s1] sm:$0xf] }
  0xba   : > { %314 = vst [vmem:[#allocation2 + $0x20] sm:$0xff] %v312_v55 }
  0xbb   : > { %v265_v1 = vpop.permute.xlu1 %264  ;;  %v263_v2 = vpop.permute.xlu0 %262  ;;  %677 = vmatpush.bf16.msra.mxu0 %v2950_v63  ;;  %735 = vmatpush.bf16.msra.mxu2 %v2954_v0  ;;  %v3194_v0 = vld [vmem:[%s5035_s1 + $0x4] sm:$0xf0] }
  0xbc   : > { %v269_v3 = vsel %vm268_vm5, %v261_v38, %v265_v1  ;;  %v271_v4 = vsel %vm268_vm5, %v265_v1, %v261_v38  ;;  %v270_v5 = vsel %vm268_vm5, %v263_v2, %v267_v56  ;;  %v272_v6 = vsel %vm268_vm5, %v267_v56, %v263_v2  ;;  %v3671_v1 = vld [vmem:[%s5037_s3] sm:$0xff] }
  0xbd   : > { %v280_v8 = vmul.f32 %v276_v61, %v271_v4  ;;  %v281_v9 = vmul.f32 %v277_v62, %v269_v3  ;;  %v282_v10 = vmul.f32 %v276_v61, %v272_v6  ;;  %v283_v11 = vmul.f32 %v277_v62, %v270_v5  ;;  %496 = vperm.xlu2 %3325, %v3671_v1  }
  0xbf   : > { %v284_v13 = vpack.c.bf16 %v281_v9, %v280_v8  ;;  %v285_v14 = vpack.c.bf16 %v283_v11, %v282_v10  ;;  %v2894_v8 = vor.u32 %v3194_v0, %v2893_v60  ;;  %v489_v9 = vld [vmem:[%s5037_s3 + $0x18] sm:$0xff]  ;;  %v3193_v10 = vld [vmem:[%s5035_s1 + $0x4] sm:$0xf] }
  0xc0   : > { %v3206_v16 = vld [vmem:[#allocation2 + $0x24] sm:$0xf0]  ;;  %v2943_v17 = vld [vmem:[#allocation2 + $0x28] sm:$0xf0] }
  0xc1   : > { %286 = vst [vmem:[#allocation2 + $0x10] sm:$0xff] %v284_v13  ;;  %v2941_v20 = vld [vmem:[#allocation2 + $0x20] sm:$0xf]  ;;  %v3205_v21 = vld [vmem:[#allocation2 + $0x24] sm:$0xf] }
  0xc2   : > { %287 = vst [vmem:[#allocation2 + $0x18] sm:$0xff] %v285_v14  ;;  %v2942_v22 = vor.u32 %v3206_v16, %v2941_v20  ;;  %v2946_v23 = vor.u32 %v3205_v21, %v2943_v17  ;;  %v2895_v13 = vld [vmem:[%s5035_s1 + $0x8] sm:$0xf0]  ;;  %v3196_v20 = vld [vmem:[%s5035_s1 + $0x14] sm:$0xf0] }
  0xc3   : > { %v233_v24 = vpop.permute.xlu1 %232  ;;  %v231_v25 = vpop.permute.xlu0 %230  ;;  %v491_v21 = vld [vmem:[%s5037_s3 + $0x28] sm:$0xff] }
  0xc4   : > { %v241_v26 = vsel %vm240_vm6, %v231_v25, %v235_v18  ;;  %v243_v27 = vsel %vm240_vm6, %v235_v18, %v231_v25  ;;  %678 = vmatpush.bf16.msra.mxu0 %v2942_v22  ;;  %736 = vmatpush.bf16.msra.mxu2 %v2946_v23  ;;  %v2898_v18 = vor.u32 %v3193_v10, %v2895_v13  ;;  %v488_v22 = vld [vmem:[%s5037_s3 + $0x10] sm:$0xff]  ;;  %v2903_v25 = vld [vmem:[%s5035_s1 + $0x18] sm:$0xf0] }
  0xc5   : > { %v252_v28 = vmul.f32 %v248_v15, %v243_v27  ;;  %v253_v29 = vmul.f32 %v249_v19, %v241_v26  ;;  %511 = vperm.xlu2 %3325, %v489_v9   ;;  %506 = vperm.xlu1 %3327, %v488_v22   ;;  %v2909_v27 = vld [vmem:[%s5035_s1 + $0x20] sm:$0xf] }
  0xc7   : > { %v256_v30 = vpack.c.bf16 %v253_v29, %v252_v28  ;;  %v3198_v28 = vld [vmem:[%s5035_s1 + $0x24] sm:$0xf0]  ;;  %v490_v29 = vld [vmem:[%s5037_s3 + $0x20] sm:$0xff] }
  0xc8   : > { %v2933_v31 = vld [vmem:[#allocation2 + $0x10] sm:$0xf]  ;;  %v3203_v32 = vld [vmem:[#allocation2 + $0x14] sm:$0xf] }
  0xc9   : > { %258 = vst [vmem:[#allocation2] sm:$0xff] %v256_v30  ;;  %v3204_v33 = vld [vmem:[#allocation2 + $0x14] sm:$0xf0]  ;;  %v2935_v34 = vld [vmem:[#allocation2 + $0x18] sm:$0xf0]  ;;  %v2910_v30 = vor.u32 %v3198_v28, %v2909_v27 }
  0xca   : > { %v2934_v35 = vor.u32 %v3204_v33, %v2933_v31  ;;  %v2938_v36 = vor.u32 %v3203_v32, %v2935_v34  ;;  %v493_v31 = vld [vmem:[%s5037_s3 + $0x38] sm:$0xff]  ;;  %v3197_v32 = vld [vmem:[%s5035_s1 + $0x24] sm:$0xf]  ;;  %v2911_v33 = vld [vmem:[%s5035_s1 + $0x28] sm:$0xf0] }
  0xcb   : > { %v433_v37 = vpop.permute.xlu1 %432  ;;  %v237_v38 = vpop.permute.xlu0 %236  ;;  %v2914_v34 = vor.u32 %v3197_v32, %v2911_v33 }
  0xcc   : > { %v242_v39 = vsel %vm240_vm6, %v233_v24, %v237_v38  ;;  %v244_v40 = vsel %vm240_vm6, %v237_v38, %v233_v24  ;;  %679 = vmatpush.bf16.msra.mxu0 %v2934_v35  ;;  %737 = vmatpush.bf16.msra.mxu2 %v2938_v36  ;;  %v3195_v24 = vld [vmem:[%s5035_s1 + $0x14] sm:$0xf]  ;;  %v2917_v35 = vld [vmem:[%s5035_s1 + $0x30] sm:$0xf]  ;;  %v3200_v36 = vld [vmem:[%s5035_s1 + $0x34] sm:$0xf0] }
  0xcd   : > { %v254_v41 = vmul.f32 %v248_v15, %v244_v40  ;;  %v255_v42 = vmul.f32 %v249_v19, %v242_v39  ;;  %v2901_v19 = vld [vmem:[%s5035_s1 + $0x10] sm:$0xf]  ;;  %521 = vperm.xlu2 %3325, %v491_v21   ;;  %v2906_v26 = vor.u32 %v3195_v24, %v2903_v25  ;;  %516 = vperm.xlu1 %3327, %v490_v29   ;;  %v3199_v38 = vld [vmem:[%s5035_s1 + $0x34] sm:$0xf]  ;;  %v2919_v39 = vld [vmem:[%s5035_s1 + $0x38] sm:$0xf0] }
  0xce   : > { %v2902_v23 = vor.u32 %v3196_v20, %v2901_v19  ;;  %v2922_v40 = vor.u32 %v3199_v38, %v2919_v39 }
  0xcf   : > { %v257_v45 = vpack.c.bf16 %v255_v42, %v254_v41 }
  0xd0   : > { %v2925_v63 = vld [vmem:[#allocation2] sm:$0xf]  ;;  %v3201_v3 = vld [vmem:[#allocation2 + $0x4] sm:$0xf] }
  0xd1   : > { %259 = vst [vmem:[#allocation2 + $0x8] sm:$0xff] %v257_v45 }
  0xd3   : > { %v439_v50 = vpop.permute.xlu1 %438  ;;  %v437_v51 = vpop.permute.xlu0 %436 }
  0xd4   : > { %v442_v52 = vsel %vm5040_vm7, %v435_v49, %v439_v50  ;;  %v444_v53 = vsel %vm5040_vm7, %v439_v50, %v435_v49  ;;  %v441_v54 = vsel %vm5040_vm7, %v433_v37, %v437_v51  ;;  %v443_v55 = vsel %vm5040_vm7, %v437_v51, %v433_v37 }
  0xd5   : > { %v454_v56 = vmul.f32 %v448_v47, %v442_v52  ;;  %v455_v57 = vmul.f32 %v449_v48, %v444_v53  ;;  %v452_v58 = vmul.f32 %v448_v47, %v441_v54  ;;  %v453_v59 = vmul.f32 %v449_v48, %v443_v55  ;;  %531 = vperm.xlu1 %3327, %v493_v31  }
  0xd6   : > { %v2918_v37 = vor.u32 %v3200_v36, %v2917_v35 }
  0xd7   : > { %v457_v61 = vpack.c.bf16 %v455_v57, %v454_v56  ;;  %v456_v62 = vpack.c.bf16 %v453_v59, %v452_v58 }
  0xd8   : > { %v3202_v2 = vld [vmem:[#allocation2 + $0x4] sm:$0xf0]  ;;  %v2927_v4 = vld [vmem:[#allocation2 + $0x8] sm:$0xf0] }
  0xd9   : > { %459 = vst [vmem:[#allocation2 + $0x88] sm:$0xff] %v457_v61  ;;  %v2926_v5 = vor.u32 %v3202_v2, %v2925_v63  ;;  %v2930_v6 = vor.u32 %v3201_v3, %v2927_v4 }
  0xda   : > { %458 = vst [vmem:[#allocation2 + $0x80] sm:$0xff] %v456_v62 }
  0xdb   : > { %680 = vmatpush.bf16.msra.mxu0 %v2926_v5  ;;  %738 = vmatpush.bf16.msra.mxu2 %v2930_v6 }
  0xde   : > { %681 = vmatmul.bf16.vlgmr.msra.gmra.mxu0 %v2894_v8  ;;  %739 = vmatmul.bf16.vlgmr.msra.gmra.mxu2 %v2894_v8 }
  0xe0   : > { %v3218_v11 = vld [vmem:[#allocation2 + $0x84] sm:$0xf0]  ;;  %v2991_v12 = vld [vmem:[#allocation2 + $0x88] sm:$0xf0] }
  0xe1   : > { %v2989_v14 = vld [vmem:[#allocation2 + $0x80] sm:$0xf]  ;;  %v3217_v15 = vld [vmem:[#allocation2 + $0x84] sm:$0xf] }
  0xe2   : > { %v2990_v16 = vor.u32 %v3218_v11, %v2989_v14  ;;  %v2994_v17 = vor.u32 %v3217_v15, %v2991_v12 }
  0xe4   : > { %709 = vmatpush.bf16.msra.mxu1 %v2990_v16  ;;  %767 = vmatpush.bf16.msra.mxu3 %v2994_v17 }
  0xe7   : > { %2995 = vmatmul.msk.bf16.vlgmr.msra.gmra.mxu1 %vm660_vm8, %v2898_v18  ;;  %2999 = vmatmul.msk.bf16.vlgmr.msra.gmra.mxu3 %vm660_vm8, %v2898_v18 }
  0xee   : > { %686 = vmatmul.bf16.gmra.mxu0 %v2902_v23  ;;  %744 = vmatmul.bf16.gmra.mxu2 %v2902_v23 }
  0xf7   : > { %2996 = vmatmul.msk.bf16.gmra.mxu1 %vm660_vm8, %v2906_v26  ;;  %3000 = vmatmul.msk.bf16.gmra.mxu3 %vm660_vm8, %v2906_v26 }
  0xfe   : > { %691 = vmatmul.bf16.gmra.mxu0 %v2910_v30  ;;  %749 = vmatmul.bf16.gmra.mxu2 %v2910_v30 }
 0x107   : > { %2997 = vmatmul.msk.bf16.gmra.mxu1 %vm660_vm8, %v2914_v34  ;;  %3001 = vmatmul.msk.bf16.gmra.mxu3 %vm660_vm8, %v2914_v34 }
 0x10e   : > { %754 = vmatmul.bf16.gmra.mxu2 %v2918_v37  ;;  %696 = vmatmul.bf16.gmra.mxu0 %v2918_v37 }
 0x117   : > { %3002 = vmatmul.msk.bf16.gmra.mxu3 %vm660_vm8, %v2922_v40  ;;  %2998 = vmatmul.msk.bf16.gmra.mxu1 %vm660_vm8, %v2922_v40  ;;  %v497_v42 = vpop.permute.xlu2 %496 }
 0x11f   : > { %v512_v18 = vpop.permute.xlu2 %511 }
 0x127   : > { %v522_v36 = vpop.permute.xlu2 %521 }
 0x12a   : > { %v502_v55 = vpop.permute.xlu0 %501 }
 0x137   : > { %v507_v61 = vpop.permute.xlu1 %506 }
 0x13f   : > { %v517_v22 = vpop.permute.xlu1 %516 }
 0x15b   : > { %v682_v41 = vpop.f32.mrf.mxu0 }
 0x15c   : > { %v683_v43 = vadd.f32 %v682_v41, %v497_v42 }
 0x161   : > { %v740_v44 = vpop.f32.mrf.mxu2 }
 0x162   : > { %v741_v50 = vadd.f32 %v740_v44, %v497_v42 }
 0x163   : > { %v684_v45 = vpop.f32.mrf.mxu0 }
 0x164   : > { %v711_v47 = vpop.f32.mrf.mxu1  ;;  %v685_v58 = vadd.f32 %v684_v45, %v502_v55 }
 0x165   : > { %v712_v48 = vadd.f32 %v711_v47, %v683_v43 }
 0x167   : > { %v3739_v49 = vmax.f32 %v712_v48, 0.0 }
 0x169   : > { %889 = vrot.lane.b32.xlu0 %v3739_v49, %s3386_s28  ;;  %843 = vrot.lane.b32.xlu1 %v3739_v49, %s3387_s29  ;;  %v742_v51 = vpop.f32.mrf.mxu2 }
 0x16a   : > { %797 = vrot.lane.b32.xlu2 %v3739_v49, %s3388_s30  ;;  %v769_v52 = vpop.f32.mrf.mxu3  ;;  %v743_v59 = vadd.f32 %v742_v51, %v502_v55 }
 0x16b   : > { %v770_v53 = vadd.f32 %v769_v52, %v741_v50  ;;  %v687_v54 = vpop.f32.mrf.mxu0  ;;  %v3855_v50 = vpop.permute.xlu1 %531  ;;  %v3005_v52 = vld [vmem:[%s5038_s4 + $0xc4] ss:$8 sm:$0x3] }
 0x16c   : > { %v713_v56 = vpop.f32.mrf.mxu1  ;;  %v688_v3 = vadd.f32 %v687_v54, %v507_v61  ;;  %v3868_v54 = vperm.slane %v3005_v52, 1 }
 0x16d   : > { %v3747_v57 = vmax.f32 %v770_v53, 0.0  ;;  %v714_v62 = vadd.f32 %v713_v56, %v685_v58  ;;  %v3866_v53 = vperm.slane %v3005_v52, 0 }
 0x16f   : > { %v981_v60 = vpack.c.bf16 %v3747_v57, %v3739_v49  ;;  %v3757_v6 = vmax.f32 %v714_v62, 0.0 }
 0x171   : > { %989 = vrot.lane.b32.xlu0 %v3739_v49, %s3384_s26  ;;  %1081 = vrot.lane.b32.xlu1 %v3739_v49, %s3382_s24  ;;  %v745_v63 = vpop.f32.mrf.mxu2  ;;  %985 = vst [vmem:[#allocation3 + $0x80] sm:$0xff] %v981_v60 }
 0x172   : > { %935 = vrot.lane.b32.xlu2 %v3739_v49, %s3385_s27  ;;  %v771_v0 = vpop.f32.mrf.mxu3  ;;  %v746_v10 = vadd.f32 %v745_v63, %v507_v61 }
 0x173   : > { %v772_v2 = vadd.f32 %v771_v0, %v743_v59  ;;  %v689_v4 = vpop.f32.mrf.mxu0 }
 0x174   : > { %v716_v5 = vpop.f32.mrf.mxu1  ;;  %v690_v20 = vadd.f32 %v689_v4, %v512_v18  ;;  %v3006_v4 = vld [vmem:[%s5038_s4 + $0xc5] ss:$8 sm:$0x3] }
 0x175   : > { %v3759_v8 = vmax.f32 %v772_v2, 0.0  ;;  %v717_v9 = vadd.f32 %v716_v5, %v688_v3  ;;  %v3003_v5 = vld [vmem:[%s5038_s4 + $0xc2] ss:$8 sm:$0x3] }
 0x177   : > { %v982_v11 = vpack.c.bf16 %v3759_v8, %v3757_v6  ;;  %v3769_v15 = vmax.f32 %v717_v9, 0.0  ;;  %v3898_v9 = vperm.slane %v3006_v4, 0 }
 0x179   : > { %943 = vrot.lane.b32.xlu1 %v3747_v57, %s3385_s27  ;;  %805 = vrot.lane.b32.xlu0 %v3747_v57, %s3388_s30  ;;  %986 = vst [vmem:[#allocation3 + $0x88] sm:$0xff] %v982_v11  ;;  %v747_v12 = vpop.f32.mrf.mxu2  ;;  %v3902_v11 = vperm.slane %v3003_v5, 0 }
 0x17a   : > { %1035 = vrot.lane.b32.xlu2 %v3739_v49, %s3383_s25  ;;  %v774_v13 = vpop.f32.mrf.mxu3  ;;  %v748_v23 = vadd.f32 %v747_v12, %v512_v18  ;;  %v3904_v12 = vperm.slane %v3003_v5, 1 }
 0x17b   : > { %v775_v14 = vadd.f32 %v774_v13, %v746_v10  ;;  %v692_v19 = vpop.f32.mrf.mxu0  ;;  %v3900_v10 = vperm.slane %v3006_v4, 1 }
 0x17c   : > { %v718_v16 = vpop.f32.mrf.mxu1  ;;  %v693_v25 = vadd.f32 %v692_v19, %v517_v22 }
 0x17d   : > { %v3771_v17 = vmax.f32 %v775_v14, 0.0  ;;  %v719_v24 = vadd.f32 %v718_v16, %v690_v20 }
 0x17f   : > { %v983_v21 = vpack.c.bf16 %v3771_v17, %v3769_v15  ;;  %v3781_v30 = vmax.f32 %v719_v24, 0.0 }
 0x181   : > { %1043 = vrot.lane.b32.xlu1 %v3747_v57, %s3383_s25  ;;  %1089 = vrot.lane.b32.xlu0 %v3747_v57, %s3382_s24  ;;  %987 = vst [vmem:[#allocation3 + $0x90] sm:$0xff] %v983_v21  ;;  %v750_v28 = vpop.f32.mrf.mxu2 }
 0x182   : > { %897 = vrot.lane.b32.xlu2 %v3747_v57, %s3386_s28  ;;  %v776_v26 = vpop.f32.mrf.mxu3  ;;  %v751_v33 = vadd.f32 %v750_v28, %v517_v22 }
 0x183   : > { %v777_v27 = vadd.f32 %v776_v26, %v748_v23  ;;  %v694_v35 = vpop.f32.mrf.mxu0  ;;  %v3008_v26 = vld [vmem:[%s5038_s4 + $0xd0] ss:$8 sm:$0x3] }
 0x184   : > { %v721_v29 = vpop.f32.mrf.mxu1  ;;  %v695_v38 = vadd.f32 %v694_v35, %v522_v36 }
 0x185   : > { %v3783_v31 = vmax.f32 %v777_v27, 0.0  ;;  %v3785_v32 = vadd.f32 %v721_v29, %v693_v25  ;;  %v3009_v27 = vld [vmem:[%s5038_s4 + $0xd1] ss:$8 sm:$0x3] }
 0x186   : > { %v3934_v35 = vperm.slane %v3009_v27, 0 }
 0x187   : > { %v984_v34 = vpack.c.bf16 %v3783_v31, %v3781_v30 }
 0x189   : > { %891 = vrot.lane.b32.xlu1 %v3757_v6, %s3386_s28  ;;  %799 = vrot.lane.b32.xlu0 %v3757_v6, %s3388_s30  ;;  %988 = vst [vmem:[#allocation3 + $0x98] sm:$0xff] %v984_v34  ;;  %v752_v42 = vpop.f32.mrf.mxu2  ;;  %v3932_v34 = vperm.slane %v3008_v26, 1 }
 0x18a   : > { %1083 = vrot.lane.b32.xlu2 %v3757_v6, %s3382_s24  ;;  %v779_v37 = vpop.f32.mrf.mxu3  ;;  %v753_v43 = vadd.f32 %v752_v42, %v522_v36  ;;  %v3936_v36 = vperm.slane %v3009_v27, 1 }
 0x18b   : > { %v3795_v39 = vadd.f32 %v779_v37, %v751_v33  ;;  %v3930_v33 = vperm.slane %v3008_v26, 0 }
 0x18c   : > { %v723_v40 = vpop.f32.mrf.mxu1 }
 0x18d   : > { %5043 = vst [vmem:[#allocation4_spill] sm:$0xff] %v3795_v39  ;;  %v3797_v41 = vadd.f32 %v723_v40, %v695_v38  ;;  %v2504_v39 = vld [vmem:[%s5038_s4 + $0x80] sm:$0xc0] }
 0x18f   : > { %5044 = vst [vmem:[#allocation5_spill] sm:$0xff] %v3797_v41 }
 0x191   : > { %991 = vrot.lane.b32.xlu1 %v3757_v6, %s3384_s26  ;;  %937 = vrot.lane.b32.xlu0 %v3757_v6, %s3385_s27 }
 0x192   : > { %945 = vrot.lane.b32.xlu2 %v3759_v8, %s3385_s27  ;;  %v781_v44 = vpop.f32.mrf.mxu3 }
 0x193   : > { %v3805_v45 = vadd.f32 %v781_v44, %v753_v43 }
 0x195   : > { %5045 = vst [vmem:[#allocation6_spill] sm:$0xff] %v3805_v45 }
 0x199   : > { %807 = vrot.lane.b32.xlu1 %v3759_v8, %s3388_s30  ;;  %1037 = vrot.lane.b32.xlu0 %v3757_v6, %s3383_s25 }
 0x19a   : > { %1045 = vrot.lane.b32.xlu2 %v3759_v8, %s3383_s25 }
 0x1a1   : > { %1091 = vrot.lane.b32.xlu1 %v3759_v8, %s3382_s24  ;;  %899 = vrot.lane.b32.xlu0 %v3759_v8, %s3386_s28 }
 0x1a2   : > { %1085 = vrot.lane.b32.xlu2 %v3769_v15, %s3382_s24 }
 0x1a9   : > { %801 = vrot.lane.b32.xlu1 %v3769_v15, %s3388_s30  ;;  %939 = vrot.lane.b32.xlu0 %v3769_v15, %s3385_s27 }
 0x1aa   : > { %847 = vrot.lane.b32.xlu2 %v3769_v15, %s3387_s29 }
 0x1b1   : > { %893 = vrot.lane.b32.xlu1 %v3769_v15, %s3386_s28  ;;  %1039 = vrot.lane.b32.xlu0 %v3769_v15, %s3383_s25 }
 0x1b2   : > { %809 = vrot.lane.b32.xlu2 %v3771_v17, %s3388_s30 }
 0x1b9   : > { %993 = vrot.lane.b32.xlu1 %v3769_v15, %s3384_s26  ;;  %901 = vrot.lane.b32.xlu0 %v3771_v17, %s3386_s28 }
 0x1ba   : > { %947 = vrot.lane.b32.xlu2 %v3771_v17, %s3385_s27 }
 0x1c1   : > { %1093 = vrot.lane.b32.xlu1 %v3771_v17, %s3382_s24  ;;  %1001 = vrot.lane.b32.xlu0 %v3771_v17, %s3384_s26 }
 0x1c2   : > { %1047 = vrot.lane.b32.xlu2 %v3771_v17, %s3383_s25 }
 0x1c4   : > { %v798_v47 = vpop.permute.xlu2 %797 }
 0x1c9   : > { %855 = vrot.lane.b32.xlu1 %v3771_v17, %s3387_s29  ;;  %1087 = vrot.lane.b32.xlu0 %v3781_v30, %s3382_s24 }
 0x1ca   : > { %803 = vrot.lane.b32.xlu2 %v3781_v30, %s3388_s30 }
 0x1cc   : > { %v936_v48 = vpop.permute.xlu2 %935 }
 0x1d1   : > { %941 = vrot.lane.b32.xlu1 %v3781_v30, %s3385_s27  ;;  %849 = vrot.lane.b32.xlu0 %v3781_v30, %s3387_s29 }
 0x1d2   : > { %895 = vrot.lane.b32.xlu2 %v3781_v30, %s3386_s28 }
 0x1d4   : > { %v1036_v51 = vpop.permute.xlu2 %1035 }
 0x1d9   : > { %1041 = vrot.lane.b32.xlu1 %v3781_v30, %s3383_s25  ;;  %811 = vrot.lane.b32.xlu0 %v3783_v31, %s3388_s30 }
 0x1da   : > { %995 = vrot.lane.b32.xlu2 %v3781_v30, %s3384_s26 }
 0x1db   : > { %v890_v55 = vpop.permute.xlu0 %889  ;;  %v3870_v56 = vpop.permute.xlu1 %843 }
 0x1dc   : > { %v898_v58 = vpop.permute.xlu2 %897 }
 0x1dd   : > { %v905_v59 = vsel %vm296_vm4, %v890_v55, %v898_v58  ;;  %v909_v60 = vsel %vm296_vm4, %v898_v58, %v890_v55 }
 0x1de   : > { %v919_v61 = vmul.f32 %v3866_v53, %v909_v60  ;;  %v920_v62 = vmul.f32 %v3868_v54, %v905_v59 }
 0x1e0   : > { %v927_v63 = vpack.c.bf16 %v920_v62, %v919_v61 }
 0x1e1   : > { %903 = vrot.lane.b32.xlu1 %v3783_v31, %s3386_s28  ;;  %949 = vrot.lane.b32.xlu0 %v3783_v31, %s3385_s27 }
 0x1e2   : > { %931 = vst [vmem:[#allocation3 + $0x40] sm:$0xff] %v927_v63  ;;  %1095 = vrot.lane.b32.xlu2 %v3783_v31, %s3382_s24 }
 0x1e3   : > { %v3884_v0 = vpop.permute.xlu0 %989  ;;  %v1082_v2 = vpop.permute.xlu1 %1081 }
 0x1e4   : > { %v3886_v3 = vpop.permute.xlu2 %1083 }
 0x1e9   : > { %1003 = vrot.lane.b32.xlu1 %v3783_v31, %s3384_s26  ;;  %1049 = vrot.lane.b32.xlu0 %v3783_v31, %s3383_s25 }
 0x1ea   : > { %997 = vrot.lane.b32.xlu2 %v3747_v57, %s3384_s26 }
 0x1eb   : > { %v944_v13 = vpop.permute.xlu1 %943  ;;  %v806_v14 = vpop.permute.xlu0 %805 }
 0x1ec   : > { %v946_v16 = vpop.permute.xlu2 %945  ;;  %v951_v18 = vsel %vm324_vm3, %v936_v48, %v944_v13  ;;  %v955_v19 = vsel %vm324_vm3, %v944_v13, %v936_v48  ;;  %v813_v20 = vsel %vm240_vm6, %v798_v47, %v806_v14  ;;  %v817_v21 = vsel %vm240_vm6, %v806_v14, %v798_v47 }
 0x1ed   : > { %v965_v22 = vmul.f32 %v3898_v9, %v955_v19  ;;  %v966_v23 = vmul.f32 %v3900_v10, %v951_v18  ;;  %v827_v24 = vmul.f32 %v3902_v11, %v817_v21  ;;  %v828_v25 = vmul.f32 %v3904_v12, %v813_v20 }
 0x1ef   : > { %v973_v28 = vpack.c.bf16 %v966_v23, %v965_v22  ;;  %v835_v29 = vpack.c.bf16 %v828_v25, %v827_v24 }
 0x1f1   : > { %977 = vst [vmem:[#allocation3 + $0x60] sm:$0xff] %v973_v28  ;;  %845 = vrot.lane.b32.xlu1 %v3757_v6, %s3387_s29  ;;  %999 = vrot.lane.b32.xlu0 %v3759_v8, %s3384_s26 }
 0x1f2   : > { %839 = vst [vmem:[#allocation3] sm:$0xff] %v835_v29  ;;  %857 = vrot.lane.b32.xlu2 %v3783_v31, %s3387_s29 }
 0x1f3   : > { %v1044_v37 = vpop.permute.xlu1 %1043  ;;  %v1090_v38 = vpop.permute.xlu0 %1089 }
 0x1f4   : > { %v1046_v40 = vpop.permute.xlu2 %1045  ;;  %v1051_v42 = vsel %vm5042_vm1, %v1036_v51, %v1044_v37  ;;  %v1055_v43 = vsel %vm5042_vm1, %v1044_v37, %v1036_v51  ;;  %v1097_v44 = vsel %vm5041_vm0, %v1082_v2, %v1090_v38  ;;  %v1101_v47 = vsel %vm5041_vm0, %v1090_v38, %v1082_v2 }
 0x1f5   : > { %v1065_v48 = vmul.f32 %v3930_v33, %v1051_v42  ;;  %v1066_v52 = vmul.f32 %v3932_v34, %v1055_v43  ;;  %v1111_v55 = vmul.f32 %v3934_v35, %v1097_v44  ;;  %v1112_v58 = vmul.f32 %v3936_v36, %v1101_v47 }
 0x1f7   : > { %v1073_v59 = vpack.c.bf16 %v1066_v52, %v1065_v48  ;;  %v1119_v60 = vpack.c.bf16 %v1112_v58, %v1111_v55 }
 0x1f9   : > { %1077 = vst [vmem:[#allocation3 + $0xc0] sm:$0xff] %v1073_v59  ;;  %1131 = vrot.lane.b32.xlu1 %v3769_v15, %s3389_s6  ;;  %853 = vrot.lane.b32.xlu0 %v3759_v8, %s3387_s29 }
 0x1fa   : > { %1123 = vst [vmem:[#allocation3 + $0xe0] sm:$0xff] %v1119_v60  ;;  %851 = vrot.lane.b32.xlu2 %v3747_v57, %s3387_s29 }
 0x1fb   : > { %v892_v51 = vpop.permute.xlu1 %891  ;;  %v800_v61 = vpop.permute.xlu0 %799 }
 0x1fc   : > { %v3958_v62 = vpop.permute.xlu2 %1085 }
 0x201   : > { %1141 = vrot.lane.b32.xlu1 %v3783_v31, %s3389_s6  ;;  %1139 = vrot.lane.b32.xlu0 %v3771_v17, %s3389_s6 }
 0x202   : > { %1133 = vrot.lane.b32.xlu2 %v3781_v30, %s3389_s6 }
 0x203   : > { %v3966_v15 = vpop.permute.xlu1 %991  ;;  %v938_v63 = vpop.permute.xlu0 %937 }
 0x204   : > { %v3968_v2 = vpop.permute.xlu2 %847  ;;  %v952_v4 = vsel %vm324_vm3, %v938_v63, %v946_v16  ;;  %v956_v5 = vsel %vm324_vm3, %v946_v16, %v938_v63 }
 0x205   : > { %v967_v13 = vmul.f32 %v3898_v9, %v956_v5  ;;  %v968_v31 = vmul.f32 %v3900_v10, %v952_v4 }
 0x207   : > { %v974_v14 = vpack.c.bf16 %v968_v31, %v967_v13 }
 0x209   : > { %978 = vst [vmem:[#allocation3 + $0x68] sm:$0xff] %v974_v14  ;;  %1135 = vrot.lane.b32.xlu1 %v3747_v57, %s3389_s6  ;;  %1129 = vrot.lane.b32.xlu0 %v3757_v6, %s3389_s6 }
 0x20a   : > { %1127 = vrot.lane.b32.xlu2 %v3739_v49, %s3389_s6 }
 0x20b   : > { %v808_v17 = vpop.permute.xlu1 %807  ;;  %v1038_v30 = vpop.permute.xlu0 %1037 }
 0x20c   : > { %v810_v18 = vpop.permute.xlu2 %809  ;;  %v814_v16 = vsel %vm240_vm6, %v800_v61, %v808_v17  ;;  %v818_v19 = vsel %vm240_vm6, %v808_v17, %v800_v61  ;;  %v1052_v20 = vsel %vm5042_vm1, %v1038_v30, %v1046_v40  ;;  %v1056_v57 = vsel %vm5042_vm1, %v1046_v40, %v1038_v30 }
 0x20d   : > { %v829_v6 = vmul.f32 %v3902_v11, %v818_v19  ;;  %v830_v21 = vmul.f32 %v3904_v12, %v814_v16  ;;  %v1067_v49 = vmul.f32 %v3930_v33, %v1052_v20  ;;  %v1068_v22 = vmul.f32 %v3932_v34, %v1056_v57 }
 0x20f   : > { %v836_v23 = vpack.c.bf16 %v830_v21, %v829_v6  ;;  %v1074_v24 = vpack.c.bf16 %v1068_v22, %v1067_v49 }
 0x211   : > { %840 = vst [vmem:[#allocation3 + $0x8] sm:$0xff] %v836_v23 }
 0x212   : > { %1078 = vst [vmem:[#allocation3 + $0xc8] sm:$0xff] %v1074_v24  ;;  %1137 = vrot.lane.b32.xlu2 %v3759_v8, %s3389_s6 }
 0x213   : > { %v1092_v25 = vpop.permute.xlu1 %1091  ;;  %v900_v26 = vpop.permute.xlu0 %899 }
 0x214   : > { %v948_v27 = vpop.permute.xlu2 %947  ;;  %v1098_v28 = vsel %vm5041_vm0, %v3886_v3, %v1092_v25  ;;  %v1102_v29 = vsel %vm5041_vm0, %v1092_v25, %v3886_v3  ;;  %v906_v37 = vsel %vm296_vm4, %v892_v51, %v900_v26  ;;  %v910_v38 = vsel %vm296_vm4, %v900_v26, %v892_v51  ;;  %v3007_v25 = vld [vmem:[%s5038_s4 + $0xc7] ss:$8 sm:$0x3] }
 0x215   : > { %v1113_v40 = vmul.f32 %v3934_v35, %v1098_v28  ;;  %v1114_v8 = vmul.f32 %v3936_v36, %v1102_v29  ;;  %v921_v42 = vmul.f32 %v3866_v53, %v910_v38  ;;  %v922_v43 = vmul.f32 %v3868_v54, %v906_v37 }
 0x216   : > { %v4043_v28 = vperm.slane %v3007_v25, 1 }
 0x217   : > { %v1120_v44 = vpack.c.bf16 %v1114_v8, %v1113_v40  ;;  %v928_v47 = vpack.c.bf16 %v922_v43, %v921_v42 }
 0x219   : > { %1124 = vst [vmem:[#allocation3 + $0xe8] sm:$0xff] %v1120_v44 }
 0x21a   : > { %932 = vst [vmem:[#allocation3 + $0x48] sm:$0xff] %v928_v47 }
 0x21b   : > { %v802_v48 = vpop.permute.xlu1 %801  ;;  %v940_v3 = vpop.permute.xlu0 %939 }
 0x21c   : > { %v1048_v52 = vpop.permute.xlu2 %1047  ;;  %v815_v55 = vsel %vm240_vm6, %v802_v48, %v810_v18  ;;  %v819_v58 = vsel %vm240_vm6, %v810_v18, %v802_v48  ;;  %v953_v59 = vsel %vm324_vm3, %v940_v3, %v948_v27  ;;  %v957_v60 = vsel %vm324_vm3, %v948_v27, %v940_v3 }
 0x21d   : > { %v831_v51 = vmul.f32 %v3902_v11, %v819_v58  ;;  %v832_v61 = vmul.f32 %v3904_v12, %v815_v55  ;;  %v969_v63 = vmul.f32 %v3898_v9, %v957_v60  ;;  %v970_v4 = vmul.f32 %v3900_v10, %v953_v59 }
 0x21e   : > { %v4041_v27 = vperm.slane %v3007_v25, 0 }
 0x21f   : > { %v837_v5 = vpack.c.bf16 %v832_v61, %v831_v51  ;;  %v975_v13 = vpack.c.bf16 %v970_v4, %v969_v63 }
 0x221   : > { %841 = vst [vmem:[#allocation3 + $0x10] sm:$0xff] %v837_v5  ;;  %v3391_v5 = vmov 1  }
 0x222   : > { %979 = vst [vmem:[#allocation3 + $0x70] sm:$0xff] %v975_v13  ;;  %3328 = vset.pattern.permute.xlu0 %v3391_v5  ;;  %3329 = vset.pattern.permute.xlu1 %v3391_v5 }
 0x223   : > { %v894_v31 = vpop.permute.xlu1 %893  ;;  %v1040_v14 = vpop.permute.xlu0 %1039  ;;  %1223 = vperm.xlu0 %3328, %v3671_v1   ;;  %3330 = vset.pattern.permute.xlu2 %v3391_v5 }
 0x224   : > { %v4022_v17 = vpop.permute.xlu2 %803  ;;  %v1053_v30 = vsel %vm5042_vm1, %v1040_v14, %v1048_v52  ;;  %v1057_v18 = vsel %vm5042_vm1, %v1048_v52, %v1040_v14  ;;  %v3004_v52 = vld [vmem:[%s5038_s4 + $0xc3] ss:$8 sm:$0x3] }
 0x225   : > { %v1069_v16 = vmul.f32 %v3930_v33, %v1053_v30  ;;  %v1070_v19 = vmul.f32 %v3932_v34, %v1057_v18  ;;  %v4064_v58 = vperm.slane %v3004_v52, 0  ;;  %v4066_v59 = vperm.slane %v3004_v52, 1  ;;  %v3149_v52 = vld [vmem:[#allocation3 + $0xe0] sm:$0xf] }
 0x227   : > { %v1075_v20 = vpack.c.bf16 %v1070_v19, %v1069_v16 }
 0x229   : > { %1079 = vst [vmem:[#allocation3 + $0xd0] sm:$0xff] %v1075_v20 }
 0x22b   : > { %v994_v57 = vpop.permute.xlu1 %993  ;;  %v902_v6 = vpop.permute.xlu0 %901 }
 0x22c   : > { %v4030_v21 = vpop.permute.xlu2 %895  ;;  %v907_v49 = vsel %vm296_vm4, %v894_v31, %v902_v6  ;;  %v911_v22 = vsel %vm296_vm4, %v902_v6, %v894_v31 }
 0x22d   : > { %v923_v23 = vmul.f32 %v3866_v53, %v911_v22  ;;  %v924_v24 = vmul.f32 %v3868_v54, %v907_v49 }
 0x22f   : > { %v929_v26 = vpack.c.bf16 %v924_v24, %v923_v23  ;;  %v3392_v23 = vmov 2  }
 0x230   : > { %3331 = vset.pattern.permute.xlu0 %v3392_v23 }
 0x231   : > { %933 = vst [vmem:[#allocation3 + $0x50] sm:$0xff] %v929_v26  ;;  %1613 = vperm.xlu0 %3331, %v3671_v1  }
 0x233   : > { %v1094_v29 = vpop.permute.xlu1 %1093  ;;  %v1002_v37 = vpop.permute.xlu0 %1001 }
 0x234   : > { %v4045_v38 = vpop.permute.xlu2 %995  ;;  %v1099_v40 = vsel %vm5041_vm0, %v3958_v62, %v1094_v29  ;;  %v1103_v8 = vsel %vm5041_vm0, %v1094_v29, %v3958_v62  ;;  %v1007_v42 = vsel %vm356_vm2, %v994_v57, %v1002_v37  ;;  %v1011_v43 = vsel %vm356_vm2, %v1002_v37, %v994_v57 }
 0x235   : > { %v1115_v44 = vmul.f32 %v3934_v35, %v1099_v40  ;;  %v1116_v47 = vmul.f32 %v3936_v36, %v1103_v8  ;;  %v1023_v48 = vmul.f32 %v4041_v27, %v1007_v42  ;;  %v1024_v3 = vmul.f32 %v4043_v28, %v1011_v43  ;;  %v3254_v8 = vld [vmem:[#allocation3 + $0xe4] sm:$0xf0] }
 0x237   : > { %v1121_v55 = vpack.c.bf16 %v1116_v47, %v1115_v44  ;;  %v1029_v62 = vpack.c.bf16 %v1024_v3, %v1023_v48 }
 0x239   : > { %1125 = vst [vmem:[#allocation3 + $0xf0] sm:$0xff] %v1121_v55 }
 0x23a   : > { %1033 = vst [vmem:[#allocation3 + $0xb0] sm:$0xff] %v1029_v62 }
 0x23b   : > { %v856_v60 = vpop.permute.xlu1 %855  ;;  %v1088_v51 = vpop.permute.xlu0 %1087 }
 0x23c   : > { %v1096_v61 = vpop.permute.xlu2 %1095  ;;  %v861_v63 = vsel %vm268_vm5, %v3968_v2, %v856_v60  ;;  %v865_v4 = vsel %vm268_vm5, %v856_v60, %v3968_v2  ;;  %v3150_v60 = vor.u32 %v3254_v8, %v3149_v52  ;;  %v3093_v8 = vld [vmem:[#allocation3 + $0x70] sm:$0xf]  ;;  %v3087_v52 = vld [vmem:[#allocation3 + $0x68] sm:$0xf0] }
 0x23d   : > { %v877_v13 = vmul.f32 %v4064_v58, %v865_v4  ;;  %v878_v31 = vmul.f32 %v4066_v59, %v861_v63  ;;  %v1100_v14 = vsel %vm5041_vm0, %v1088_v51, %v1096_v61  ;;  %v1104_v30 = vsel %vm5041_vm0, %v1096_v61, %v1088_v51 }
 0x23e   : > { %v1117_v18 = vmul.f32 %v3934_v35, %v1100_v14  ;;  %v1118_v16 = vmul.f32 %v3936_v36, %v1104_v30  ;;  %v3393_v61 = vmov 4  }
 0x23f   : > { %v883_v2 = vpack.c.bf16 %v878_v31, %v877_v13  ;;  %3336 = vset.pattern.permute.xlu0 %v3393_v61 }
 0x240   : > { %v1122_v19 = vpack.c.bf16 %v1118_v16, %v1117_v18  ;;  %v3157_v25 = vld [vmem:[#allocation3 + $0xf0] sm:$0xf] }
 0x241   : > { %887 = vst [vmem:[#allocation3 + $0x30] sm:$0xff] %v883_v2 }
 0x242   : > { %1126 = vst [vmem:[#allocation3 + $0xf8] sm:$0xff] %v1122_v19 }
 0x243   : > { %v942_v20 = vpop.permute.xlu1 %941  ;;  %v850_v57 = vpop.permute.xlu0 %849 }
 0x244   : > { %v998_v6 = vpop.permute.xlu2 %997 }
 0x245   : > { %v1005_v49 = vsel %vm356_vm2, %v3884_v0, %v998_v6  ;;  %v1009_v22 = vsel %vm356_vm2, %v998_v6, %v3884_v0 }
 0x246   : > { %v1019_v35 = vmul.f32 %v4041_v27, %v1005_v49  ;;  %v1020_v36 = vmul.f32 %v4043_v28, %v1009_v22 }
 0x248   : > { %v1027_v24 = vpack.c.bf16 %v1020_v36, %v1019_v35  ;;  %v3394_v35 = vmov 5  }
 0x249   : > { %v3256_v26 = vld [vmem:[#allocation3 + $0xf4] sm:$0xf0] }
 0x24a   : > { %1031 = vst [vmem:[#allocation3 + $0xa0] sm:$0xff] %v1027_v24  ;;  %v3158_v29 = vor.u32 %v3256_v26, %v3157_v25 }
 0x24b   : > { %v1042_v37 = vpop.permute.xlu1 %1041  ;;  %v812_v40 = vpop.permute.xlu0 %811 }
 0x24c   : > { %v858_v42 = vpop.permute.xlu2 %857  ;;  %1477 = vmatpush.bf16.msrb.mxu3 %v3158_v29  ;;  %v816_v0 = vsel %vm240_vm6, %v4022_v17, %v812_v40  ;;  %v820_v43 = vsel %vm240_vm6, %v812_v40, %v4022_v17  ;;  %v4110_v17 = vld [vmem:[%s5037_s3 + $0x18] sm:$0xff] }
 0x24d   : > { %v862_v44 = vsel %vm268_vm5, %v850_v57, %v858_v42  ;;  %v866_v47 = vsel %vm268_vm5, %v858_v42, %v850_v57  ;;  %v833_v48 = vmul.f32 %v3902_v11, %v820_v43  ;;  %v834_v3 = vmul.f32 %v3904_v12, %v816_v0  ;;  %1660 = vperm.xlu0 %3336, %v4110_v17   ;;  %v3239_v42 = vld [vmem:[#allocation3 + $0x74] sm:$0xf] }
 0x24e   : > { %v879_v55 = vmul.f32 %v4064_v58, %v866_v47  ;;  %v880_v62 = vmul.f32 %v4066_v59, %v862_v44 }
 0x24f   : > { %v838_v51 = vpack.c.bf16 %v834_v3, %v833_v48  ;;  %v3238_v3 = vld [vmem:[#allocation3 + $0x64] sm:$0xf0] }
 0x250   : > { %v884_v63 = vpack.c.bf16 %v880_v62, %v879_v55  ;;  %1478 = vmatpush.bf16.msrb.mxu3 %v3150_v60 }
 0x251   : > { %842 = vst [vmem:[#allocation3 + $0x18] sm:$0xff] %v838_v51  ;;  %v3085_v51 = vld [vmem:[#allocation3 + $0x60] sm:$0xf] }
 0x252   : > { %888 = vst [vmem:[#allocation3 + $0x38] sm:$0xff] %v884_v63  ;;  %v3237_v63 = vld [vmem:[#allocation3 + $0x64] sm:$0xf] }
 0x253   : > { %v904_v11 = vpop.permute.xlu1 %903  ;;  %v950_v12 = vpop.permute.xlu0 %949 }
 0x254   : > { %v852_v4 = vpop.permute.xlu2 %851  ;;  %v908_v5 = vsel %vm296_vm4, %v4030_v21, %v904_v11  ;;  %v912_v13 = vsel %vm296_vm4, %v904_v11, %v4030_v21  ;;  %v954_v31 = vsel %vm324_vm3, %v942_v20, %v950_v12  ;;  %v958_v14 = vsel %vm324_vm3, %v950_v12, %v942_v20 }
 0x255   : > { %v859_v30 = vsel %vm268_vm5, %v3870_v56, %v852_v4  ;;  %v863_v18 = vsel %vm268_vm5, %v852_v4, %v3870_v56  ;;  %v925_v16 = vmul.f32 %v3866_v53, %v912_v13  ;;  %v926_v2 = vmul.f32 %v3868_v54, %v908_v5  ;;  %3339 = vset.pattern.permute.xlu0 %v3394_v35 }
 0x256   : > { %v873_v21 = vmul.f32 %v4064_v58, %v863_v18  ;;  %v874_v19 = vmul.f32 %v4066_v59, %v859_v30  ;;  %v971_v57 = vmul.f32 %v3898_v9, %v958_v14  ;;  %v972_v20 = vmul.f32 %v3900_v10, %v954_v31  ;;  %1706 = vperm.xlu0 %3339, %v3671_v1   ;;  %v3077_v14 = vld [vmem:[#allocation3 + $0x50] sm:$0xf]  ;;  %v3235_v18 = vld [vmem:[#allocation3 + $0x54] sm:$0xf] }
 0x257   : > { %v930_v6 = vpack.c.bf16 %v926_v2, %v925_v16  ;;  %v3086_v12 = vor.u32 %v3238_v3, %v3085_v51  ;;  %v3090_v4 = vor.u32 %v3237_v63, %v3087_v52  ;;  %v3117_v63 = vld [vmem:[#allocation3 + $0xa0] sm:$0xf] }
 0x258   : > { %v881_v49 = vpack.c.bf16 %v874_v19, %v873_v21  ;;  %v976_v22 = vpack.c.bf16 %v972_v20, %v971_v57  ;;  %v3250_v21 = vld [vmem:[#allocation3 + $0xc4] sm:$0xf0] }
 0x259   : > { %934 = vst [vmem:[#allocation3 + $0x58] sm:$0xff] %v930_v6  ;;  %v3234_v20 = vld [vmem:[#allocation3 + $0x44] sm:$0xf0]  ;;  %v3071_v6 = vld [vmem:[#allocation3 + $0x48] sm:$0xf0] }
 0x25a   : > { %885 = vst [vmem:[#allocation3 + $0x20] sm:$0xff] %v881_v49 }
 0x25b   : > { %980 = vst [vmem:[#allocation3 + $0x78] sm:$0xff] %v976_v22  ;;  %v1004_v53 = vpop.permute.xlu1 %1003  ;;  %v1050_v54 = vpop.permute.xlu0 %1049 }
 0x25c   : > { %v1008_v56 = vsel %vm356_vm2, %v4045_v38, %v1004_v53  ;;  %v1012_v9 = vsel %vm356_vm2, %v1004_v53, %v4045_v38  ;;  %v1054_v10 = vsel %vm5042_vm1, %v1042_v37, %v1050_v54  ;;  %v1058_v36 = vsel %vm5042_vm1, %v1050_v54, %v1042_v37  ;;  %v492_v38 = vld [vmem:[%s5037_s3 + $0x30] sm:$0xff]  ;;  %v1134_v60 = vpop.permute.xlu2 %1133 }
 0x25d   : > { %v1025_v1 = vmul.f32 %v4041_v27, %v1008_v56  ;;  %v1026_v24 = vmul.f32 %v4043_v28, %v1012_v9  ;;  %v1071_v25 = vmul.f32 %v3930_v33, %v1054_v10  ;;  %v1072_v26 = vmul.f32 %v3932_v34, %v1058_v36  ;;  %v3069_v53 = vld [vmem:[#allocation3 + $0x40] sm:$0xf]  ;;  %v3233_v9 = vld [vmem:[#allocation3 + $0x44] sm:$0xf] }
 0x25e   : > { %3340 = vset.pattern.permute.xlu0 %v3390_v46  ;;  %v3133_v54 = vld [vmem:[#allocation3 + $0xc0] sm:$0xf] }
 0x25f   : > { %v1030_v29 = vpack.c.bf16 %v1026_v24, %v1025_v1  ;;  %v1076_v40 = vpack.c.bf16 %v1072_v26, %v1071_v25  ;;  %526 = vperm.xlu0 %3340, %v492_v38   ;;  %v3134_v56 = vor.u32 %v3250_v21, %v3133_v54  ;;  %v3010_v10 = vld [vmem:[%s5038_s4 + $0xd2] ss:$8 sm:$0x3]  ;;  %v3070_v1 = vor.u32 %v3234_v20, %v3069_v53  ;;  %v3125_v38 = vld [vmem:[#allocation3 + $0xb0] sm:$0xf]  ;;  %v4184_v20 = vld [vmem:[%s5037_s3 + $0x8] sm:$0xff] }
 0x260   : > { %v3236_v5 = vld [vmem:[#allocation3 + $0x54] sm:$0xf0]  ;;  %v3079_v13 = vld [vmem:[#allocation3 + $0x58] sm:$0xf0]  ;;  %v3074_v24 = vor.u32 %v3233_v9, %v3071_v6  ;;  %v3242_v53 = vld [vmem:[#allocation3 + $0x84] sm:$0xf0]  ;;  %1228 = vperm.xlu1 %3329, %v4184_v20  }
 0x261   : > { %1034 = vst [vmem:[#allocation3 + $0xb8] sm:$0xff] %v1030_v29  ;;  %v3082_v2 = vor.u32 %v3235_v18, %v3079_v13  ;;  %v3232_v29 = vld [vmem:[#allocation3 + $0x34] sm:$0xf0]  ;;  %v3229_v18 = vld [vmem:[#allocation3 + $0x24] sm:$0xf] }
 0x262   : > { %1080 = vst [vmem:[#allocation3 + $0xd8] sm:$0xff] %v1076_v40  ;;  %v3240_v37 = vld [vmem:[#allocation3 + $0x74] sm:$0xf0]  ;;  %v3095_v0 = vld [vmem:[#allocation3 + $0x78] sm:$0xf0] }
 0x263   : > { %v846_v43 = vpop.permute.xlu1 %845  ;;  %v3094_v44 = vor.u32 %v3240_v37, %v3093_v8  ;;  %v3098_v33 = vor.u32 %v3239_v42, %v3095_v0  ;;  %v1000_v47 = vpop.permute.xlu0 %999  ;;  %v3063_v40 = vld [vmem:[#allocation3 + $0x38] sm:$0xf0]  ;;  %v3061_v8 = vld [vmem:[#allocation3 + $0x30] sm:$0xf]  ;;  %v3231_v37 = vld [vmem:[#allocation3 + $0x34] sm:$0xf] }
 0x264   : > { %v1006_v34 = vsel %vm356_vm2, %v3966_v15, %v1000_v47  ;;  %v1010_v48 = vsel %vm356_vm2, %v1000_v47, %v3966_v15  ;;  %v3141_v15 = vld [vmem:[#allocation3 + $0xd0] sm:$0xf]  ;;  %v1128_v26 = vpop.permute.xlu2 %1127 }
 0x265   : > { %1458 = vmatpush.bf16.msrb.mxu1 %v3094_v44  ;;  %1515 = vmatpush.bf16.msrb.mxu2 %v3098_v33  ;;  %v1021_v55 = vmul.f32 %v4041_v27, %v1006_v34  ;;  %v1022_v62 = vmul.f32 %v4043_v28, %v1010_v48  ;;  %v3078_v27 = vor.u32 %v3236_v5, %v3077_v14  ;;  %v3244_v5 = vld [vmem:[#allocation3 + $0x94] sm:$0xf0] }
 0x266   : > { %v3066_v44 = vor.u32 %v3231_v37, %v3063_v40  ;;  %v3226_v37 = vld [vmem:[#allocation3 + $0x4] sm:$0xf0] }
 0x267   : > { %v1028_v11 = vpack.c.bf16 %v1022_v62, %v1021_v55 }
 0x268   : > { %v3248_v25 = vld [vmem:[#allocation3 + $0xb4] sm:$0xf0]  ;;  %1238 = vperm.xlu1 %3329, %v4110_v17  }
 0x269   : > { %1032 = vst [vmem:[#allocation3 + $0xa8] sm:$0xff] %v1028_v11  ;;  %1459 = vmatpush.bf16.msrb.mxu1 %v3086_v12  ;;  %1516 = vmatpush.bf16.msrb.mxu2 %v3090_v4  ;;  %v3252_v31 = vld [vmem:[#allocation3 + $0xd4] sm:$0xf0]  ;;  %v3126_v42 = vor.u32 %v3248_v25, %v3125_v38  ;;  %v3109_v4 = vld [vmem:[#allocation3 + $0x90] sm:$0xf] }
 0x26a   : > { %v3142_v30 = vor.u32 %v3252_v31, %v3141_v15  ;;  %v3053_v15 = vld [vmem:[#allocation3 + $0x20] sm:$0xf]  ;;  %v3047_v31 = vld [vmem:[#allocation3 + $0x18] sm:$0xf0]  ;;  %v3110_v21 = vor.u32 %v3244_v5, %v3109_v4 }
 0x26b   : > { %v1132_v16 = vpop.permute.xlu1 %1131  ;;  %v854_v28 = vpop.permute.xlu0 %853 }
 0x26c   : > { %1479 = vmatpush.bf16.msrb.mxu3 %v3142_v30  ;;  %v860_v19 = vsel %vm268_vm5, %v846_v43, %v854_v28  ;;  %v864_v57 = vsel %vm268_vm5, %v854_v28, %v846_v43  ;;  %v3062_v43 = vor.u32 %v3232_v29, %v3061_v8  ;;  %v1138_v28 = vpop.permute.xlu2 %1137 }
 0x26d   : > { %1460 = vmatpush.bf16.msrb.mxu1 %v3078_v27  ;;  %1517 = vmatpush.bf16.msrb.mxu2 %v3082_v2  ;;  %v875_v49 = vmul.f32 %v4064_v58, %v864_v57  ;;  %v876_v22 = vmul.f32 %v4066_v59, %v860_v19  ;;  %v1153_v58 = vperm.slane %v3010_v10, 0  ;;  %v1154_v59 = vperm.slane %v3010_v10, 1  ;;  %v3045_v19 = vld [vmem:[#allocation3 + $0x10] sm:$0xf]  ;;  %v3227_v57 = vld [vmem:[#allocation3 + $0x14] sm:$0xf] }
 0x26e   : > { %v3050_v54 = vor.u32 %v3227_v57, %v3047_v31  ;;  %v3143_v31 = vld [vmem:[#allocation3 + $0xd8] sm:$0xf0] }
 0x26f   : > { %v882_v36 = vpack.c.bf16 %v876_v22, %v875_v49 }
 0x270   : > { %1480 = vmatpush.bf16.msrb.mxu3 %v3134_v56  ;;  %v3246_v47 = vld [vmem:[#allocation3 + $0xa4] sm:$0xf0]  ;;  %3332 = vset.pattern.permute.xlu1 %v3392_v23 }
 0x271   : > { %886 = vst [vmem:[#allocation3 + $0x28] sm:$0xff] %v882_v36  ;;  %1461 = vmatpush.bf16.msrb.mxu1 %v3070_v1  ;;  %1518 = vmatpush.bf16.msrb.mxu2 %v3074_v24  ;;  %v3118_v12 = vor.u32 %v3246_v47, %v3117_v63  ;;  %v3219_v1 = vld [vmem:[%s5036_s2 + $0x4] sm:$0xf]  ;;  %v3015_v24 = vld [vmem:[%s5036_s2 + $0xc] sm:$0xf0] }
 0x272   : > { %v3039_v47 = vld [vmem:[#allocation3 + $0x8] sm:$0xf0]  ;;  %1617 = vperm.xlu1 %3332, %v4184_v20  }
 0x273   : > { %v1142_v0 = vpop.permute.xlu1 %1141  ;;  %v1140_v33 = vpop.permute.xlu0 %1139 }
 0x274   : > { %v1146_v34 = vsel %vm5040_vm7, %v1134_v60, %v1142_v0  ;;  %v1150_v48 = vsel %vm5040_vm7, %v1142_v0, %v1134_v60  ;;  %1481 = vmatpush.bf16.msrb.mxu3 %v3126_v42  ;;  %v1145_v3 = vsel %vm5040_vm7, %v1132_v16, %v1140_v33  ;;  %v1149_v52 = vsel %vm5040_vm7, %v1140_v33, %v1132_v16  ;;  %v3228_v60 = vld [vmem:[#allocation3 + $0x14] sm:$0xf0]  ;;  %v3037_v42 = vld [vmem:[#allocation3] sm:$0xf]  ;;  %v3225_v33 = vld [vmem:[#allocation3 + $0x4] sm:$0xf] }
 0x275   : > { %v1163_v55 = vmul.f32 %v1153_v58, %v1146_v34  ;;  %v1164_v62 = vmul.f32 %v1154_v59, %v1150_v48  ;;  %1462 = vmatpush.bf16.msrb.mxu1 %v3062_v43  ;;  %1519 = vmatpush.bf16.msrb.mxu2 %v3066_v44  ;;  %v1161_v51 = vmul.f32 %v1153_v58, %v1145_v3  ;;  %v3013_v34 = vld [vmem:[%s5036_s2] sm:$0xf]  ;;  %v3159_v3 = vld [vmem:[#allocation3 + $0xf8] sm:$0xf0] }
 0x276   : > { %v1162_v11 = vmul.f32 %v1154_v59, %v1149_v52  ;;  %v3046_v22 = vor.u32 %v3228_v60, %v3045_v19  ;;  %v4201_v44 = vor.u32 %v3219_v1, %v3015_v24  ;;  %v3038_v52 = vor.u32 %v3226_v37, %v3037_v42  ;;  %v3251_v19 = vld [vmem:[#allocation3 + $0xd4] sm:$0xf]  ;;  %v3127_v1 = vld [vmem:[#allocation3 + $0xb8] sm:$0xf0] }
 0x277   : > { %v1168_v13 = vpack.c.bf16 %v1164_v62, %v1163_v55  ;;  %v3042_v63 = vor.u32 %v3225_v33, %v3039_v47  ;;  %v3146_v57 = vor.u32 %v3251_v19, %v3143_v31  ;;  %v3247_v24 = vld [vmem:[#allocation3 + $0xb4] sm:$0xf]  ;;  %v3111_v37 = vld [vmem:[#allocation3 + $0x98] sm:$0xf0] }
 0x278   : > { %v1167_v14 = vpack.c.bf16 %v1162_v11, %v1161_v51  ;;  %1482 = vmatpush.bf16.msrb.mxu3 %v3118_v12  ;;  %v3230_v30 = vld [vmem:[#allocation3 + $0x24] sm:$0xf0]  ;;  %v3055_v27 = vld [vmem:[#allocation3 + $0x28] sm:$0xf0]  ;;  %v3255_v12 = vld [vmem:[#allocation3 + $0xf4] sm:$0xf] }
 0x279   : > { %1172 = vst [vmem:[#allocation3 + $0x118] sm:$0xff] %v1168_v13  ;;  %v3054_v16 = vor.u32 %v3230_v30, %v3053_v15  ;;  %v3058_v2 = vor.u32 %v3229_v18, %v3055_v27  ;;  %v3162_v5 = vor.u32 %v3255_v12, %v3159_v3  ;;  %v3151_v13 = vld [vmem:[#allocation3 + $0xe8] sm:$0xf0]  ;;  %v3253_v15 = vld [vmem:[#allocation3 + $0xe4] sm:$0xf]  ;;  %v3395_v3 = vmov 3  }
 0x27a   : > { %1171 = vst [vmem:[#allocation3 + $0x110] sm:$0xff] %v1167_v14  ;;  %v3154_v60 = vor.u32 %v3253_v15, %v3151_v13  ;;  %v3021_v14 = vld [vmem:[%s5036_s2 + $0x8] sm:$0xf]  ;;  %v3221_v27 = vld [vmem:[%s5036_s2 + $0x10] sm:$0xf0]  ;;  %1625 = vperm.xlu1 %3332, %v4110_v17  }
 0x27b   : > { %v1136_v6 = vpop.permute.xlu1 %1135  ;;  %1463 = vmatpush.bf16.msrb.mxu1 %v3054_v16  ;;  %1520 = vmatpush.bf16.msrb.mxu2 %v3058_v2  ;;  %v1130_v49 = vpop.permute.xlu0 %1129  ;;  %v3243_v42 = vld [vmem:[#allocation3 + $0x94] sm:$0xf] }
 0x27c   : > { %v1143_v56 = vsel %vm5040_vm7, %v1128_v26, %v1136_v6  ;;  %v1147_v9 = vsel %vm5040_vm7, %v1136_v6, %v1128_v26  ;;  %1483 = vmatpush.bf16.msrb.mxu3 %v3110_v21  ;;  %v1144_v10 = vsel %vm5040_vm7, %v1130_v49, %v1138_v28  ;;  %v1148_v36 = vsel %vm5040_vm7, %v1138_v28, %v1130_v49  ;;  %v3101_v26 = vld [vmem:[#allocation3 + $0x80] sm:$0xf]  ;;  %v3135_v6 = vld [vmem:[#allocation3 + $0xc8] sm:$0xf0] }
 0x27d   : > { %v1157_v25 = vmul.f32 %v1153_v58, %v1143_v56  ;;  %v1158_v29 = vmul.f32 %v1154_v59, %v1147_v9  ;;  %v1159_v40 = vmul.f32 %v1153_v58, %v1144_v10  ;;  %v1160_v38 = vmul.f32 %v1154_v59, %v1148_v36  ;;  %v3220_v58 = vld [vmem:[%s5036_s2 + $0x8] sm:$0xf0]  ;;  %v3025_v10 = vld [vmem:[%s5036_s2 + $0x18] sm:$0xf]  ;;  %v3223_v36 = vld [vmem:[%s5036_s2 + $0x20] sm:$0xf0] }
 0x27e   : > { %v3102_v8 = vor.u32 %v3242_v53, %v3101_v26  ;;  %v3014_v4 = vor.u32 %v3220_v58, %v3013_v34  ;;  %v3022_v49 = vor.u32 %v3221_v27, %v3021_v14  ;;  %v3027_v53 = vld [vmem:[%s5036_s2 + $0x24] sm:$0xf0]  ;;  %v1219_v26 = vld [vmem:[%s5037_s3 + $0x10] sm:$0xff]  ;;  %v3114_v33 = vor.u32 %v3243_v42, %v3111_v37  ;;  %v3103_v34 = vld [vmem:[#allocation3 + $0x88] sm:$0xf0] }
 0x27f   : > { %v1165_v0 = vpack.c.bf16 %v1158_v29, %v1157_v25  ;;  %v1166_v43 = vpack.c.bf16 %v1160_v38, %v1159_v40  ;;  %1464 = vmatpush.bf16.msrb.mxu1 %v3046_v22  ;;  %1521 = vmatpush.bf16.msrb.mxu2 %v3050_v54  ;;  %v3222_v22 = vld [vmem:[%s5036_s2 + $0x1c] sm:$0xf]  ;;  %v3249_v54 = vld [vmem:[#allocation3 + $0xc4] sm:$0xf]  ;;  %v3026_v25 = vor.u32 %v3223_v36, %v3025_v10 }
 0x280   : > { %1484 = vmatpush.bf16.msrb.mxu3 %v3102_v8  ;;  %v3260_v59 = vld [vmem:[#allocation3 + $0x114] sm:$0xf0]  ;;  %v3175_v48 = vld [vmem:[#allocation3 + $0x118] sm:$0xf0]  ;;  %v3138_v56 = vor.u32 %v3249_v54, %v3135_v6  ;;  %v3030_v9 = vor.u32 %v3222_v22, %v3027_v53  ;;  %v3130_v29 = vor.u32 %v3247_v24, %v3127_v1  ;;  %v3119_v40 = vld [vmem:[#allocation3 + $0xa8] sm:$0xf0]  ;;  %1233 = vperm.xlu2 %3330, %v1219_v26  }
 0x281   : > { %1169 = vst [vmem:[#allocation3 + $0x100] sm:$0xff] %v1165_v0  ;;  %v3173_v55 = vld [vmem:[#allocation3 + $0x110] sm:$0xf]  ;;  %v3259_v62 = vld [vmem:[#allocation3 + $0x114] sm:$0xf] }
 0x282   : > { %1170 = vst [vmem:[#allocation3 + $0x108] sm:$0xff] %v1166_v43  ;;  %v3174_v51 = vor.u32 %v3260_v59, %v3173_v55  ;;  %v3178_v11 = vor.u32 %v3259_v62, %v3175_v48  ;;  %v3245_v38 = vld [vmem:[#allocation3 + $0xa4] sm:$0xf]  ;;  %v3033_v0 = vld [vmem:[%s5036_s2 + $0x20] sm:$0xf]  ;;  %3335 = vset.pattern.permute.xlu1 %v3393_v61  ;;  %v4269_v62 = vpop.f32.mrf.mxu2 }
 0x283   : > { %1485 = vmatmul.bf16.vlgmr.msrb.gmra.mxu3 %v4201_v44  ;;  %1465 = vmatpush.bf16.msrb.mxu1 %v3038_v52  ;;  %v3122_v8 = vor.u32 %v3245_v38, %v3119_v40  ;;  %v3224_v43 = vld [vmem:[%s5036_s2 + $0x28] sm:$0xf0]  ;;  %v3241_v58 = vld [vmem:[#allocation3 + $0x84] sm:$0xf]  ;;  %v3373_v48 = vld [vmem:[%s5037_s3] sm:$0xff] }
 0x284   : > { %1502 = vmatpush.bf16.msrb.mxu0 %v3174_v51  ;;  %1522 = vmatpush.bf16.msrb.mxu2 %v3042_v63  ;;  %v3034_v47 = vor.u32 %v3224_v43, %v3033_v0  ;;  %v3106_v59 = vor.u32 %v3241_v58, %v3103_v34  ;;  %v4271_v51 = vpop.f32.mrf.mxu0 }
 0x285   : > { %1559 = vmatpush.bf16.msra.mxu3 %v3178_v11  ;;  %1652 = vperm.xlu1 %3335, %v4184_v20  }
 0x286   : > { %1466 = vmatmul.bf16.vlgmr.msrb.gmra.mxu1 %v3014_v4 }
 0x287   : > { %1534 = vmatpush.bf16.msra.mxu1 %v3162_v5  ;;  %1523 = vmatmul.bf16.vlgmr.msrb.gmra.mxu2 %v3014_v4 }
 0x288   : > { %v3165_v30 = vld [vmem:[#allocation3 + $0x100] sm:$0xf]  ;;  %v3257_v18 = vld [vmem:[#allocation3 + $0x104] sm:$0xf]  ;;  %3333 = vset.pattern.permute.xlu2 %v3392_v23  ;;  %v4261_v23 = vpop.f32.mrf.mxu1 }
 0x289   : > { %v3258_v16 = vld [vmem:[#allocation3 + $0x104] sm:$0xf0]  ;;  %v3167_v2 = vld [vmem:[#allocation3 + $0x108] sm:$0xf0]  ;;  %1621 = vperm.xlu2 %3333, %v1219_v26  }
 0x28a   : > { %v3166_v28 = vor.u32 %v3258_v16, %v3165_v30  ;;  %v3170_v21 = vor.u32 %v3257_v18, %v3167_v2  ;;  %v4273_v63 = vpop.f32.mrf.mxu2 }
 0x28b   : > { %1535 = vmatpush.bf16.msra.mxu1 %v3154_v60 }
 0x28c   : > { %1503 = vmatpush.bf16.msrb.mxu0 %v3166_v28  ;;  %1560 = vmatpush.bf16.msra.mxu3 %v3170_v21 }
 0x28d   : > { %3337 = vset.pattern.permute.xlu1 %v3395_v3 }
 0x28e   : > { %1672 = vperm.xlu1 %3337, %v3373_v48  }
 0x28f   : > { %1536 = vmatpush.bf16.msra.mxu1 %v3146_v57  ;;  %3179 = vmatmul.msk.bf16.vlgmr.msrb.gmra.mxu0 %vm1451_vm9, %v3022_v49 }
 0x291   : > { %3334 = vset.pattern.permute.xlu2 %v3393_v61  ;;  %v4263_v61 = vpop.f32.mrf.mxu3 }
 0x292   : > { %1648 = vperm.xlu2 %3334, %v3373_v48  }
 0x293   : > { %1537 = vmatpush.bf16.msra.mxu1 %v3138_v56  ;;  %1490 = vmatmul.bf16.gmra.mxu3 %v3030_v9 }
 0x295   : > { %v1224_v60 = vpop.permute.xlu0 %1223 }
 0x296   : > { %1471 = vmatmul.bf16.gmra.mxu1 %v3026_v25  ;;  %1680 = vperm.xlu1 %3337, %v1219_v26  }
 0x297   : > { %1538 = vmatpush.bf16.msra.mxu1 %v3130_v29  ;;  %1528 = vmatmul.bf16.gmra.mxu2 %v3026_v25 }
 0x299   : > { %v4267_v52 = vpop.f32.mrf.mxu3 }
 0x29a   : > { %1656 = vperm.xlu2 %3334, %v1219_v26   ;;  %5046 = vst [vmem:[#allocation7_spill] sm:$0xff] %v4267_v52 }
 0x29b   : > { %1539 = vmatpush.bf16.msra.mxu1 %v3122_v8 }
 0x29e   : > { %3341 = vset.pattern.permute.xlu1 %v3394_v35 }
 0x29f   : > { %1540 = vmatpush.bf16.msra.mxu1 %v3114_v33  ;;  %3180 = vmatmul.msk.bf16.gmra.mxu0 %vm1451_vm9, %v3034_v47 }
 0x2a0   : > { %1710 = vperm.xlu1 %3341, %v4184_v20  }
 0x2a2   : > { %3338 = vset.pattern.permute.xlu2 %v3395_v3 }
 0x2a3   : > { %1541 = vmatpush.bf16.msra.mxu1 %v3106_v59  ;;  %3181 = vmatmul.msk.bf16.vlgmr.msra.gmra.mxu3 %vm1451_vm9, %v3022_v49 }
 0x2a4   : > { %1676 = vperm.xlu2 %3338, %v4184_v20  }
 0x2a6   : > { %1542 = vmatmul.bf16.vlgmr.msra.gmra.mxu1 %v4201_v44  ;;  %v4265_v44 = vpop.f32.mrf.mxu1 }
 0x2a8   : > { %1718 = vperm.xlu1 %3341, %v4110_v17  }
 0x2ac   : > { %1684 = vperm.xlu2 %3338, %v4110_v17  }
 0x2b0   : > { %3343 = vset.pattern.permute.xlu1 %v3390_v46 }
 0x2b3   : > { %3182 = vmatmul.msk.bf16.gmra.mxu3 %vm1451_vm9, %v3034_v47 }
 0x2b4   : > { %3342 = vset.pattern.permute.xlu2 %v3394_v35 }
 0x2b5   : > { %1714 = vperm.xlu2 %3342, %v1219_v26  }
 0x2b6   : > { %1547 = vmatmul.bf16.gmra.mxu1 %v3030_v9 }
 0x2bd   : > { %3344 = vset.pattern.permute.xlu2 %v3390_v46  ;;  %v4275_v46 = vpop.f32.mrf.mxu0 }
 0x2d2   : > { %v1229_v2 = vpop.permute.xlu1 %1228 }
 0x2da   : > { %v1234_v36 = vpop.permute.xlu2 %1233  ;;  %v1239_v0 = vpop.permute.xlu1 %1238 }
 0x303   : > { %v1467_v20 = vpop.f32.mrf.mxu1 }
 0x304   : > { %v1468_v14 = vadd.f32 %v1467_v20, %v1224_v60 }
 0x306   : > { %v1486_v55 = vpop.f32.mrf.mxu3 }
 0x307   : > { %v1487_v16 = vadd.f32 %v1486_v55, %v1468_v14  ;;  %v1618_v14 = vpop.permute.xlu1 %1617 }
 0x30a   : > { %v1524_v4 = vpop.f32.mrf.mxu2 }
 0x30b   : > { %v1469_v17 = vpop.f32.mrf.mxu1  ;;  %v1525_v31 = vadd.f32 %v1524_v4, %v1224_v60 }
 0x30c   : > { %v1505_v13 = vpop.f32.mrf.mxu0  ;;  %v1470_v6 = vadd.f32 %v1469_v17, %v1229_v2 }
 0x30d   : > { %v4277_v21 = vadd.f32 %v1505_v13, %v1487_v16  ;;  %v1614_v16 = vpop.permute.xlu0 %1613 }
 0x30e   : > { %v1488_v35 = vpop.f32.mrf.mxu3 }
 0x30f   : > { %v1489_v56 = vadd.f32 %v1488_v35, %v1470_v6 }
 0x312   : > { %v1526_v18 = vpop.f32.mrf.mxu2 }
 0x313   : > { %v1472_v11 = vpop.f32.mrf.mxu1  ;;  %v1527_v22 = vadd.f32 %v1526_v18, %v1229_v2 }
 0x314   : > { %v1507_v57 = vpop.f32.mrf.mxu0  ;;  %v1473_v25 = vadd.f32 %v1472_v11, %v1234_v36 }
 0x315   : > { %v4283_v1 = vadd.f32 %v1507_v57, %v1489_v56  ;;  %v4315_v57 = vpop.permute.xlu0 %1660 }
 0x316   : > { %v1491_v12 = vpop.f32.mrf.mxu3 }
 0x317   : > { %v1492_v37 = vadd.f32 %v1491_v12, %v1473_v25 }
 0x31a   : > { %v1529_v9 = vpop.f32.mrf.mxu2 }
 0x31b   : > { %v1474_v5 = vpop.f32.mrf.mxu1  ;;  %v1530_v26 = vadd.f32 %v1529_v9, %v1234_v36 }
 0x31c   : > { %v1510_v38 = vpop.f32.mrf.mxu0  ;;  %v1475_v58 = vadd.f32 %v1474_v5, %v1239_v0 }
 0x31d   : > { %v4291_v33 = vadd.f32 %v1510_v38, %v1492_v37 }
 0x31e   : > { %v1493_v15 = vpop.f32.mrf.mxu3 }
 0x31f   : > { %v1494_v35 = vadd.f32 %v1493_v15, %v1475_v58 }
 0x322   : > { %v1531_v34 = vpop.f32.mrf.mxu2 }
 0x323   : > { %v1543_v30 = vpop.f32.mrf.mxu1  ;;  %v1532_v3 = vadd.f32 %v1531_v34, %v1239_v0 }
 0x324   : > { %v1544_v27 = vadd.f32 %v1543_v30, %v1525_v31  ;;  %v1512_v55 = vpop.f32.mrf.mxu0  ;;  %v1622_v31 = vpop.permute.xlu2 %1621 }
 0x325   : > { %v4299_v12 = vadd.f32 %v1512_v55, %v1494_v35  ;;  %v1626_v30 = vpop.permute.xlu1 %1625 }
 0x326   : > { %v1562_v28 = vpop.f32.mrf.mxu3 }
 0x327   : > { %v4279_v19 = vadd.f32 %v1562_v28, %v1544_v27 }
 0x329   : > { %v1572_v49 = vadd.f32 %v4279_v19, %v4277_v21  ;;  %v1595_v40 = vmax.f32 %v4277_v21, %v4279_v19 }
 0x32b   : > { %1573 = vadd.xlane.f32.xlu2 %v1572_v49  ;;  %v1545_v53 = vpop.f32.mrf.mxu1 }
 0x32c   : > { %v1546_v54 = vadd.f32 %v1545_v53, %v1527_v22  ;;  %v4309_v15 = vpop.permute.xlu2 %1648  ;;  %v4317_v22 = vpop.permute.xlu0 %1706  ;;  %v3396_v53 = vmov 256.0  }
 0x32d   : > { %v4311_v18 = vpop.permute.xlu1 %1652  ;;  %3345 = vrcp.f32 %v3396_v53 }
 0x32e   : > { %v1564_v10 = vpop.f32.mrf.mxu3 }
 0x32f   : > { %v4285_v24 = vadd.f32 %v1564_v10, %v1546_v54 }
 0x331   : > { %v1575_v29 = vadd.f32 %v4285_v24, %v4283_v1  ;;  %v1598_v48 = vmax.f32 %v4283_v1, %v4285_v24 }
 0x333   : > { %1576 = vadd.xlane.f32.xlu0 %v1575_v29  ;;  %1596 = vmax.xlane.f32.xlu2 %v1595_v40  ;;  %v1548_v8 = vpop.f32.mrf.mxu1  ;;  %v3346_v9 = vpop.eup %3345 }
 0x334   : > { %v1549_v42 = vadd.f32 %v1548_v8, %v1530_v26  ;;  %v4313_v27 = vpop.permute.xlu2 %1656  ;;  %v4323_v10 = vpop.permute.xlu0 %526  ;;  %v1585_v36 = vmul.f32 256.0, %v3346_v9  ;;  %vm1589_vm10 = vweird.f32 %v3346_v9 }
 0x335   : > { %v1673_v2 = vpop.permute.xlu1 %1672 }
 0x336   : > { %v1567_v43 = vpop.f32.mrf.mxu3  ;;  %v1586_v40 = vsub.f32 1.0, %v1585_v36 }
 0x337   : > { %v4293_v47 = vadd.f32 %v1567_v43, %v1549_v42 }
 0x338   : > { %v1587_v26 = vmul.f32 %v3346_v9, %v1586_v40 }
 0x339   : > { %v1578_v59 = vadd.f32 %v4293_v47, %v4291_v33  ;;  %v1601_v5 = vmax.f32 %v4291_v33, %v4293_v47 }
 0x33a   : > { %v1588_v8 = vadd.f32 %v3346_v9, %v1587_v26 }
 0x33b   : > { %1579 = vadd.xlane.f32.xlu1 %v1578_v59  ;;  %1599 = vmax.xlane.f32.xlu0 %v1598_v48  ;;  %v1550_v20 = vpop.f32.mrf.mxu1 }
 0x33c   : > { %v1551_v17 = vadd.f32 %v1550_v20, %v1532_v3  ;;  %v1677_v28 = vpop.permute.xlu2 %1676  ;;  %v1590_v0 = vsel %vm1589_vm10, %v3346_v9, %v1588_v8 }
 0x33d   : > { %v1681_v6 = vpop.permute.xlu1 %1680 }
 0x33e   : > { %v1569_v11 = vpop.f32.mrf.mxu3 }
 0x33f   : > { %v4301_v4 = vadd.f32 %v1569_v11, %v1551_v17 }
 0x341   : > { %v1581_v13 = vadd.f32 %v4301_v4, %v4299_v12  ;;  %v1604_v60 = vmax.f32 %v4299_v12, %v4301_v4 }
 0x343   : > { %1602 = vmax.xlane.f32.xlu1 %v1601_v5  ;;  %1582 = vadd.xlane.f32.xlu2 %v1581_v13 }
 0x344   : > { %v1685_v49 = vpop.permute.xlu2 %1684 }
 0x345   : > { %v4321_v56 = vpop.permute.xlu1 %1710 }
 0x34b   : > { %1605 = vmax.xlane.f32.xlu2 %v1604_v60 }
 0x34c   : > { %v4319_v54 = vpop.permute.xlu2 %1714 }
 0x34d   : > { %v4325_v29 = vpop.permute.xlu1 %1718 }
 0x39e   : > { %v1574_v25 = vpop.xlane.xlu2 %1573 }
 0x39f   : > { %v1591_v58 = vmul.f32 %v1590_v0, %v1574_v25 }
 0x3a6   : > { %v1577_v38 = vpop.xlane.xlu0 %1576  ;;  %v1597_v42 = vpop.xlane.xlu2 %1596 }
 0x3a7   : > { %v1592_v34 = vmul.f32 %v1590_v0, %v1577_v38  ;;  %v1608_v55 = vsel %vm1607_vm11, %v1591_v58, %v1597_v42 }
 0x3a8   : > { %v1628_v5 = vmul.f32 %v1614_v16, %v1608_v55  ;;  %v1687_v13 = vmul.f32 %v1673_v2, %v1608_v55 }
 0x3aa   : > { %v1633_v40 = vsel %vm1632_vm12, %v1628_v5, 0.0  ;;  %v1691_v38 = vsel %vm1632_vm12, %v1687_v13, 0.0 }
 0x3ae   : > { %v1580_v37 = vpop.xlane.xlu1 %1579  ;;  %v1600_v43 = vpop.xlane.xlu0 %1599 }
 0x3af   : > { %v1593_v59 = vmul.f32 %v1590_v0, %v1580_v37  ;;  %v1609_v48 = vsel %vm1607_vm11, %v1592_v34, %v1600_v43 }
 0x3b0   : > { %v1629_v35 = vmul.f32 %v1618_v14, %v1609_v48  ;;  %v1688_v11 = vmul.f32 %v1677_v28, %v1609_v48 }
 0x3b2   : > { %v1634_v9 = vsel %vm1632_vm12, %v1629_v35, 0.0  ;;  %v1692_v36 = vsel %vm1632_vm12, %v1688_v11, 0.0 }
 0x3b3   : > { %v1635_v28 = vadd.f32 %v1634_v9, %v1633_v40  ;;  %v1693_v16 = vadd.f32 %v1692_v36, %v1691_v38 }
 0x3b6   : > { %v1603_v3 = vpop.xlane.xlu1 %1602  ;;  %v1583_v20 = vpop.xlane.xlu2 %1582 }
 0x3b7   : > { %v1610_v17 = vsel %vm1607_vm11, %v1593_v59, %v1603_v3  ;;  %v1594_v25 = vmul.f32 %v1590_v0, %v1583_v20 }
 0x3b8   : > { %v1630_v60 = vmul.f32 %v1622_v31, %v1610_v17  ;;  %v1689_v53 = vmul.f32 %v1681_v6, %v1610_v17 }
 0x3ba   : > { %v1636_v26 = vsel %vm1632_vm12, %v1630_v60, 0.0  ;;  %v1694_v8 = vsel %vm1632_vm12, %v1689_v53, 0.0 }
 0x3bb   : > { %v1637_v42 = vadd.f32 %v1636_v26, %v1635_v28  ;;  %v1695_v37 = vadd.f32 %v1694_v8, %v1693_v16 }
 0x3be   : > { %v1606_v14 = vpop.xlane.xlu2 %1605 }
 0x3bf   : > { %v1611_v31 = vsel %vm1607_vm11, %v1594_v25, %v1606_v14 }
 0x3c0   : > { %v1631_v2 = vmul.f32 %v1626_v30, %v1611_v31  ;;  %v1690_v6 = vmul.f32 %v1685_v49, %v1611_v31 }
 0x3c2   : > { %v1638_v43 = vsel %vm1632_vm12, %v1631_v2, 0.0  ;;  %v1696_v0 = vsel %vm1632_vm12, %v1690_v6, 0.0 }
 0x3c3   : > { %v1639_v34 = vadd.f32 %v1638_v43, %v1637_v42  ;;  %v1697_v58 = vadd.f32 %v1696_v0, %v1695_v37 }
 0x3c5   : > { %v1640_v59 = vrot.slane %v1639_v34, 4  ;;  %v1698_v48 = vrot.slane %v1697_v58, 4 }
 0x3c7   : > { %v1641_v3 = vadd.f32 %v1640_v59, %v1639_v34  ;;  %v1699_v20 = vadd.f32 %v1698_v48, %v1697_v58 }
 0x3c9   : > { %v1642_v55 = vrot.slane %v1641_v3, 2  ;;  %v1700_v17 = vrot.slane %v1699_v20, 2 }
 0x3cb   : > { %v1643_v35 = vadd.f32 %v1642_v55, %v1641_v3  ;;  %v1701_v11 = vadd.f32 %v1700_v17, %v1699_v20 }
 0x3cd   : > { %v1644_v5 = vrot.slane %v1643_v35, 1  ;;  %v1702_v13 = vrot.slane %v1701_v11, 1 }
 0x3cf   : > { %v1645_v30 = vadd.f32 %v1644_v5, %v1643_v35  ;;  %v1703_v49 = vadd.f32 %v1702_v13, %v1701_v11 }
 0x3d1   : > { %v1646_v60 = vmax.f32 %v1645_v30, 0.0  ;;  %v1704_v53 = vmax.f32 %v1703_v49, 0.0 }
 0x3d3   : > { %v1665_v9 = vmul.f32 %v4313_v27, %v1646_v60  ;;  %v1723_v36 = vmul.f32 %v4319_v54, %v1704_v53  ;;  %v1664_v25 = vmul.f32 %v4311_v18, %v1646_v60  ;;  %v1722_v40 = vmul.f32 %v4321_v56, %v1704_v53 }
 0x3d4   : > { %v1663_v38 = vmul.f32 %v4309_v15, %v1646_v60  ;;  %v1721_v26 = vmul.f32 %v4317_v22, %v1704_v53  ;;  %v1666_v8 = vmul.f32 %v4315_v57, %v1646_v60  ;;  %v1724_v27 = vmul.f32 %v4325_v29, %v1704_v53 }
 0x3d5   : > { %v1727_v14 = vadd.f32 %v1723_v36, %v1665_v9  ;;  %v1726_v28 = vadd.f32 %v1722_v40, %v1664_v25 }
 0x3d6   : > { %v1725_v16 = vadd.f32 %v1721_v26, %v1663_v38  ;;  %v1728_v18 = vadd.f32 %v1724_v27, %v1666_v8 }
 0x3d7   : > { %1737 = vrot.lane.b32.xlu1 %v1727_v14, %s3384_s26  ;;  %1735 = vrot.lane.b32.xlu0 %v1726_v28, %s3384_s26 }
 0x3d8   : > { %1733 = vrot.lane.b32.xlu2 %v1725_v16, %s3384_s26 }
 0x3e0   : > { %1739 = vrot.lane.b32.xlu2 %v1728_v18, %s3384_s26 }
 0x432   : > { %v1734_v54 = vpop.permute.xlu2 %1733 }
 0x433   : > { %v1745_v15 = vadd.f32 %v1734_v54, %v1725_v16 }
 0x435   : > { %v3183_v56 = vmul.f32 -1.442695, %v1745_v15 }
 0x437   : > { %3347 = vpow2.f32 %v3183_v56 }
 0x43a   : > { %v1740_v22 = vpop.permute.xlu2 %1739 }
 0x43b   : > { %v1748_v2 = vadd.f32 %v1740_v22, %v1728_v18 }
 0x43d   : > { %v3348_v57 = vpop.eup %3347  ;;  %v3186_v6 = vmul.f32 -1.442695, %v1748_v2 }
 0x43e   : > { %v1761_v31 = vadd.f32 1.0, %v3348_v57 }
 0x440   : > { %3349 = vrcp.f32 %v1761_v31  ;;  %v1776_v59 = vand.u32 2147483648, %v1761_v31  ;;  %v1774_v3 = vand.u32 2147483647, %v1761_v31  ;;  %vm1770_vm14 = vweird.f32 %v1761_v31 }
 0x441   : > { %3351 = vpow2.f32 %v3186_v6 }
 0x442   : > { %v1777_v11 = vor.u32 1.1754944e-38, %v1776_v59  ;;  %vm1775_vm8 = vcmp.eq.f32.partialorder %v1774_v3, 8.507059e+37 }
 0x446   : > { %v3350_v42 = vpop.eup %3349 }
 0x447   : > { %v1766_v37 = vmul.f32 %v3350_v42, %v1761_v31  ;;  %vm1771_vm13 = vweird.f32 %v3350_v42  ;;  %v3352_v17 = vpop.eup %3351 }
 0x448   : > { %vm1772_vm15 = vmor %vm1770_vm14, %vm1771_vm13  ;;  %v1764_v13 = vadd.f32 1.0, %v3352_v17 }
 0x449   : > { %v1738_v43 = vpop.permute.xlu1 %1737  ;;  %v1736_v0 = vpop.permute.xlu0 %1735  ;;  %v1767_v34 = vsub.f32 1.0, %v1766_v37 }
 0x44a   : > { %v1747_v29 = vadd.f32 %v1738_v43, %v1727_v14  ;;  %v1746_v58 = vadd.f32 %v1736_v0, %v1726_v28  ;;  %vm1815_vm0 = vweird.f32 %v1764_v13  ;;  %v1819_v59 = vand.u32 2147483647, %v1764_v13 }
 0x44b   : > { %v1768_v48 = vmul.f32 %v3350_v42, %v1767_v34 }
 0x44c   : > { %v3185_v20 = vmul.f32 -1.442695, %v1747_v29  ;;  %v3184_v55 = vmul.f32 -1.442695, %v1746_v58  ;;  %v1821_v58 = vand.u32 2147483648, %v1764_v13 }
 0x44d   : > { %v1769_v35 = vadd.f32 %v3350_v42, %v1768_v48 }
 0x44e   : > { %3353 = vpow2.f32 %v3185_v20  ;;  %v1822_v3 = vor.u32 1.1754944e-38, %v1821_v58 }
 0x44f   : > { %3355 = vpow2.f32 %v3184_v55  ;;  %v1773_v5 = vsel %vm1772_vm15, %v3350_v42, %v1769_v35  ;;  %v3397_v55 = vmov 32.0  }
 0x450   : > { %v1778_v30 = vsel %vm1775_vm8, %v1777_v11, %v1773_v5  ;;  %3357 = vrcp.f32 %v1764_v13 }
 0x451   : > { %1827 = vperm.xlu0 %3340, %v1778_v30  }
 0x454   : > { %v3354_v49 = vpop.eup %3353 }
 0x455   : > { %v3356_v60 = vpop.eup %3355  ;;  %v1763_v53 = vadd.f32 1.0, %v3354_v49 }
 0x456   : > { %v1762_v9 = vadd.f32 1.0, %v3356_v60  ;;  %v3358_v36 = vpop.eup %3357 }
 0x457   : > { %3359 = vrcp.f32 %v1763_v53  ;;  %v1811_v40 = vmul.f32 %v3358_v36, %v1764_v13  ;;  %v1806_v16 = vand.u32 2147483648, %v1763_v53  ;;  %v1804_v15 = vand.u32 2147483647, %v1763_v53 }
 0x458   : > { %3361 = vrcp.f32 %v1762_v9  ;;  %v1791_v18 = vand.u32 2147483648, %v1762_v9  ;;  %v1789_v22 = vand.u32 2147483647, %v1762_v9  ;;  %vm1800_vm11 = vweird.f32 %v1763_v53 }
 0x459   : > { %v1812_v27 = vsub.f32 1.0, %v1811_v40  ;;  %vm1785_vm12 = vweird.f32 %v1762_v9  ;;  %v1807_v2 = vor.u32 1.1754944e-38, %v1806_v16  ;;  %vm1805_vm15 = vcmp.eq.f32.partialorder %v1804_v15, 8.507059e+37 }
 0x45a   : > { %v1792_v42 = vor.u32 1.1754944e-38, %v1791_v18  ;;  %vm1790_vm8 = vcmp.eq.f32.partialorder %v1789_v22, 8.507059e+37  ;;  %vm1816_vm7 = vweird.f32 %v3358_v36  ;;  %3363 = vrcp.f32 %v3397_v55 }
 0x45b   : > { %v1813_v6 = vmul.f32 %v3358_v36, %v1812_v27  ;;  %vm1817_vm1 = vmor %vm1815_vm0, %vm1816_vm7  ;;  %vm1905_vm7 = vcmp.lt.s32.totalorder %v3554_v7, 51 }
 0x45d   : > { %v3360_v25 = vpop.eup %3359  ;;  %v1814_v29 = vadd.f32 %v3358_v36, %v1813_v6 }
 0x45e   : > { %v3362_v38 = vpop.eup %3361  ;;  %v1796_v26 = vmul.f32 %v3360_v25, %v1763_v53  ;;  %vm1801_vm9 = vweird.f32 %v3360_v25 }
 0x45f   : > { %v1781_v8 = vmul.f32 %v3362_v38, %v1762_v9  ;;  %vm1786_vm10 = vweird.f32 %v3362_v38  ;;  %vm1802_vm13 = vmor %vm1800_vm11, %vm1801_vm9  ;;  %v1818_v48 = vsel %vm1817_vm1, %v3358_v36, %v1814_v29  ;;  %vm1820_vm9 = vcmp.eq.f32.partialorder %v1819_v59, 8.507059e+37 }
 0x460   : > { %v1797_v14 = vsub.f32 1.0, %v1796_v26  ;;  %vm1787_vm14 = vmor %vm1785_vm12, %vm1786_vm10  ;;  %v1823_v20 = vsel %vm1820_vm9, %v1822_v3, %v1818_v48  ;;  %v3364_v30 = vpop.eup %3363  ;;  %vm1898_vm1 = vcmask 1040384   ;;  %vm1918_vm10 = vcmp.lt.s32.totalorder %v3554_v7, 50 }
 0x461   : > { %v1782_v28 = vsub.f32 1.0, %v1781_v8  ;;  %v1872_v36 = vmul.f32 32.0, %v3364_v30  ;;  %vm1876_vm0 = vweird.f32 %v3364_v30  ;;  %vm1937_vm11 = vcmp.lt.s32.totalorder %v3554_v7, 49 }
 0x462   : > { %v1798_v54 = vmul.f32 %v3360_v25, %v1797_v14  ;;  %vm1956_vm12 = vcmp.lt.s32.totalorder %v3554_v7, 48  ;;  %vm2045_vm9 = vcmp.lt.s32.totalorder %v3554_v7, 34 }
 0x463   : > { %v1783_v56 = vmul.f32 %v3362_v38, %v1782_v28 }
 0x464   : > { %v1799_v57 = vadd.f32 %v3360_v25, %v1798_v54 }
 0x465   : > { %v1784_v31 = vadd.f32 %v3362_v38, %v1783_v56 }
 0x466   : > { %v1803_v37 = vsel %vm1802_vm13, %v3360_v25, %v1799_v57  ;;  %vm1975_vm13 = vcmp.lt.s32.totalorder %v3554_v7, 47 }
 0x467   : > { %v1788_v43 = vsel %vm1787_vm14, %v3362_v38, %v1784_v31  ;;  %v1808_v0 = vsel %vm1805_vm15, %v1807_v2, %v1803_v37  ;;  %vm1988_vm14 = vcmp.lt.s32.totalorder %v3554_v7, 46  ;;  %vm2007_vm15 = vcmp.lt.s32.totalorder %v3554_v7, 45 }
 0x468   : > { %v1793_v34 = vsel %vm1790_vm8, %v1792_v42, %v1788_v43  ;;  %1837 = vperm.xlu2 %3344, %v1808_v0   ;;  %vm2026_vm8 = vcmp.lt.s32.totalorder %v3554_v7, 35 }
 0x469   : > { %1832 = vperm.xlu1 %3343, %v1793_v34  }
 0x471   : > { %1842 = vperm.xlu1 %3343, %v1823_v20  }
 0x4c2   : > { %v1838_v60 = vpop.permute.xlu2 %1837 }
 0x4c3   : > { %v1828_v17 = vpop.permute.xlu0 %1827 }
 0x4c4   : > { %v4358_v49 = vmul.f32 %v1828_v17, %v4277_v21  ;;  %v4361_v13 = vmul.f32 %v1828_v17, %v4279_v19 }
 0x4db   : > { %v1833_v35 = vpop.permute.xlu1 %1832 }
 0x4dc   : > { %v4352_v11 = vmul.f32 %v1833_v35, %v4283_v1  ;;  %v4355_v5 = vmul.f32 %v1833_v35, %v4285_v24  ;;  %v4368_v1 = vmul.f32 %v1838_v60, %v4291_v33  ;;  %v4371_v24 = vmul.f32 %v1838_v60, %v4293_v47 }
 0x4dd   : > { %v1873_v47 = vsub.f32 1.0, %v1872_v36 }
 0x4de   : > { %v1853_v53 = vadd.f32 %v4352_v11, %v4358_v49  ;;  %v1862_v9 = vadd.f32 %v4355_v5, %v4361_v13  ;;  %v1880_v26 = vmax.f32 %v4358_v49, %v4368_v1  ;;  %v1889_v33 = vmax.f32 %v4361_v13, %v4371_v24 }
 0x4df   : > { %v1874_v54 = vmul.f32 %v3364_v30, %v1873_v47  ;;  %v1921_v47 = vld [vmem:[%s5038_s4] sm:$0xc] }
 0x4e0   : > { %v1854_v40 = vadd.f32 %v1853_v53, %v4368_v1  ;;  %v1863_v38 = vadd.f32 %v1862_v9, %v4371_v24 }
 0x4e1   : > { %v1875_v37 = vadd.f32 %v3364_v30, %v1874_v54 }
 0x4e3   : > { %v1843_v25 = vpop.permute.xlu1 %1842  ;;  %v1877_v20 = vsel %vm1876_vm0, %v3364_v30, %v1875_v37  ;;  %v1941_v37 = vld [vmem:[%s5038_s4 + $0x8] sm:$0x30]  ;;  %vm2058_vm0 = vcmp.lt.s32.totalorder %v3554_v7, 33 }
 0x4e4   : > { %v4374_v21 = vmul.f32 %v1843_v25, %v4299_v12  ;;  %v4377_v19 = vmul.f32 %v1843_v25, %v4301_v4 }
 0x4e6   : > { %v1855_v8 = vadd.f32 %v1854_v40, %v4374_v21  ;;  %v1864_v14 = vadd.f32 %v1863_v38, %v4377_v19  ;;  %v1881_v12 = vmax.f32 %v4352_v11, %v4374_v21  ;;  %v1890_v4 = vmax.f32 %v4355_v5, %v4377_v19 }
 0x4e8   : > { %v1856_v28 = vrot.slane %v1855_v8, 4  ;;  %v1865_v16 = vrot.slane %v1864_v14, 4  ;;  %v1882_v27 = vmax.f32 %v1880_v26, %v1881_v12  ;;  %v1891_v18 = vmax.f32 %v1889_v33, %v1890_v4  ;;  %v1908_v4 = vld [vmem:[%s5038_s4] sm:$0x3] }
 0x4ea   : > { %v1857_v15 = vadd.f32 %v1856_v28, %v1855_v8  ;;  %v1866_v56 = vadd.f32 %v1865_v16, %v1864_v14  ;;  %v1883_v22 = vrot.slane %v1882_v27, 4  ;;  %v1892_v57 = vrot.slane %v1891_v18, 4  ;;  %v1922_v8 = vld [vmem:[%s5038_s4 + $0x8] sm:$0xc]  ;;  %v1909_v28 = vld [vmem:[%s5038_s4 + $0x8] sm:$0x3] }
 0x4eb   : > { %v1925_v14 = vrot.slane %v1921_v47, 2  ;;  %v1926_v12 = vrot.slane %v1922_v8, 2 }
 0x4ec   : > { %v1858_v31 = vrot.slane %v1857_v15, 2  ;;  %v1867_v2 = vrot.slane %v1866_v56, 2  ;;  %v1884_v6 = vmax.f32 %v1882_v27, %v1883_v22  ;;  %v1893_v42 = vmax.f32 %v1891_v18, %v1892_v57 }
 0x4ee   : > { %v1859_v43 = vadd.f32 %v1858_v31, %v1857_v15  ;;  %v1868_v0 = vadd.f32 %v1867_v2, %v1866_v56  ;;  %v1885_v34 = vrot.slane %v1884_v6, 2  ;;  %v1894_v29 = vrot.slane %v1893_v42, 2 }
 0x4f0   : > { %v1860_v58 = vrot.slane %v1859_v43, 1  ;;  %v1869_v59 = vrot.slane %v1868_v0, 1  ;;  %v1886_v48 = vmax.f32 %v1884_v6, %v1885_v34  ;;  %v1895_v3 = vmax.f32 %v1893_v42, %v1894_v29  ;;  %v1940_v42 = vld [vmem:[%s5038_s4] sm:$0x30] }
 0x4f1   : > { %v1944_v34 = vrot.slane %v1940_v42, 4  ;;  %v1945_v29 = vrot.slane %v1941_v37, 4 }
 0x4f2   : > { %v1861_v55 = vadd.f32 %v1860_v58, %v1859_v43  ;;  %v1870_v17 = vadd.f32 %v1869_v59, %v1868_v0  ;;  %v1887_v35 = vrot.slane %v1886_v48, 1  ;;  %v1896_v60 = vrot.slane %v1895_v3, 1 }
 0x4f4   : > { %v1878_v53 = vmul.f32 %v1877_v20, %v1861_v55  ;;  %v1879_v9 = vmul.f32 %v1877_v20, %v1870_v17  ;;  %v1888_v36 = vmax.f32 %v1886_v48, %v1887_v35  ;;  %v1897_v25 = vmax.f32 %v1895_v3, %v1896_v60  ;;  %v1959_v35 = vld [vmem:[%s5038_s4] sm:$0xc0]  ;;  %v1960_v60 = vld [vmem:[%s5038_s4 + $0x8] sm:$0xc0] }
 0x4f6   : > { %v4391_v40 = vsel %vm1898_vm1, %v1878_v53, %v1888_v36  ;;  %v4393_v38 = vsel %vm1898_vm1, %v1879_v9, %v1897_v25  ;;  %v1963_v36 = vrot.slane %v1959_v35, 6  ;;  %v1964_v25 = vrot.slane %v1960_v60, 6  ;;  %v2029_v35 = vld [vmem:[%s5038_s4 + $0x10] sm:$0xc0]  ;;  %v2030_v60 = vld [vmem:[%s5038_s4 + $0x18] sm:$0xc0] }
 0x4f7   : > { %1903 = vrot.lane.b32.xlu0 %v4393_v38, %s3398_s14  ;;  %1914 = vrot.lane.b32.xlu1 %v4391_v40, %s3399_s15  ;;  %vm2077_vm1 = vcmp.lt.s32.totalorder %v3554_v7, 32 }
 0x4f8   : > { %1901 = vrot.lane.b32.xlu2 %v4391_v40, %s3398_s14  ;;  %s3413_s14 = smov 18  }
 0x4ff   : > { %1933 = vrot.lane.b32.xlu0 %v4391_v40, %s3400_s16  ;;  %1935 = vrot.lane.b32.xlu1 %v4393_v38, %s3400_s16  ;;  %s3415_s16 = smov 13  }
 0x500   : > { %1916 = vrot.lane.b32.xlu2 %v4393_v38, %s3399_s15  ;;  %s3414_s15 = smov 14  }
 0x507   : > { %1954 = vrot.lane.b32.xlu0 %v4393_v38, %s3401_s17  ;;  %1971 = vrot.lane.b32.xlu1 %v4391_v40, %s3402_s20 }
 0x508   : > { %1952 = vrot.lane.b32.xlu2 %v4391_v40, %s3401_s17  ;;  %s3437_s17 = smov 77  }
 0x50f   : > { %1984 = vrot.lane.b32.xlu0 %v4391_v40, %s3403_s21  ;;  %1986 = vrot.lane.b32.xlu1 %v4393_v38, %s3403_s21  ;;  %s3416_s21 = smov 3  }
 0x510   : > { %1973 = vrot.lane.b32.xlu2 %v4393_v38, %s3402_s20 }
 0x517   : > { %2005 = vrot.lane.b32.xlu0 %v4393_v38, %s3404_s22  ;;  %2022 = vrot.lane.b32.xlu1 %v4391_v40, %s3405_s23 }
 0x518   : > { %2003 = vrot.lane.b32.xlu2 %v4391_v40, %s3404_s22  ;;  %s3429_s22 = smov 94  }
 0x51f   : > { %2041 = vrot.lane.b32.xlu0 %v4391_v40, %s3406_s7  ;;  %2043 = vrot.lane.b32.xlu1 %v4393_v38, %s3406_s7  ;;  %s3431_s7 = smov 83  }
 0x520   : > { %2024 = vrot.lane.b32.xlu2 %v4393_v38, %s3405_s23  ;;  %s3419_s23 = smov 125  }
 0x527   : > { %2056 = vrot.lane.b32.xlu0 %v4393_v38, %s3407_s8  ;;  %2073 = vrot.lane.b32.xlu1 %v4391_v40, %s3408_s9 }
 0x528   : > { %2054 = vrot.lane.b32.xlu2 %v4391_v40, %s3407_s8 }
 0x52f   : > { %2092 = vrot.lane.b32.xlu0 %v4391_v40, %s3409_s10  ;;  %2094 = vrot.lane.b32.xlu1 %v4393_v38, %s3409_s10  ;;  %s3427_s10 = smov 96  }
 0x530   : > { %2075 = vrot.lane.b32.xlu2 %v4393_v38, %s3408_s9  ;;  %s3426_s9 = smov 97  }
 0x537   : > { %2113 = vrot.lane.b32.xlu0 %v4393_v38, %s3410_s11  ;;  %2124 = vrot.lane.b32.xlu1 %v4391_v40, %s3411_s12 }
 0x538   : > { %2111 = vrot.lane.b32.xlu2 %v4391_v40, %s3410_s11 }
 0x53f   : > { %2143 = vrot.lane.b32.xlu0 %v4391_v40, %s3412_s13  ;;  %2145 = vrot.lane.b32.xlu1 %v4393_v38, %s3412_s13 }
 0x540   : > { %2126 = vrot.lane.b32.xlu2 %v4393_v38, %s3411_s12 }
 0x547   : > { %2164 = vrot.lane.b32.xlu0 %v4393_v38, %s3413_s14  ;;  %2181 = vrot.lane.b32.xlu1 %v4391_v40, %s3388_s30 }
 0x548   : > { %2162 = vrot.lane.b32.xlu2 %v4391_v40, %s3413_s14  ;;  %s3192_s14 = sshll.u32 %s5058_s19, 6 }
 0x54f   : > { %2193 = vrot.lane.b32.xlu0 %v4391_v40, %s3387_s29  ;;  %2195 = vrot.lane.b32.xlu1 %v4393_v38, %s3387_s29  ;;  %s3432_s29 = smov 82  }
 0x550   : > { %2183 = vrot.lane.b32.xlu2 %v4393_v38, %s3388_s30  ;;  %s3433_s30 = smov 81  }
 0x552   : > { %v1902_v30 = vpop.permute.xlu2 %1901 }
 0x557   : > { %2213 = vrot.lane.b32.xlu0 %v4393_v38, %s3386_s28  ;;  %2229 = vrot.lane.b32.xlu1 %v4391_v40, %s3414_s15 }
 0x558   : > { %2211 = vrot.lane.b32.xlu2 %v4391_v40, %s3386_s28  ;;  %s3417_s28 = smov 2  }
 0x55a   : > { %v1917_v26 = vpop.permute.xlu2 %1916 }
 0x55f   : > { %2248 = vrot.lane.b32.xlu0 %v4391_v40, %s3415_s16  ;;  %2250 = vrot.lane.b32.xlu1 %v4393_v38, %s3415_s16  ;;  %s3418_s16 = smov 126  }
 0x560   : > { %2231 = vrot.lane.b32.xlu2 %v4393_v38, %s3414_s15  ;;  %s3420_s15 = smov 115  }
 0x562   : > { %v1953_v33 = vpop.permute.xlu2 %1952 }
 0x567   : > { %2263 = vrot.lane.b32.xlu0 %v4393_v38, %s3416_s21  ;;  %2280 = vrot.lane.b32.xlu1 %v4391_v40, %s3417_s28 }
 0x568   : > { %2261 = vrot.lane.b32.xlu2 %v4391_v40, %s3416_s21 }
 0x569   : > { %v1904_v16 = vpop.permute.xlu0 %1903  ;;  %v1915_v27 = vpop.permute.xlu1 %1914 }
 0x56a   : > { %v1906_v18 = vsel %vm1905_vm7, %v1902_v30, %v1904_v16  ;;  %v1907_v54 = vsel %vm1905_vm7, %v1904_v16, %v1902_v30  ;;  %v1919_v15 = vsel %vm1918_vm10, %v1915_v27, %v1917_v26  ;;  %v1920_v56 = vsel %vm1918_vm10, %v1917_v26, %v1915_v27  ;;  %v1974_v22 = vpop.permute.xlu2 %1973 }
 0x56b   : > { %v1910_v57 = vmul.f32 %v1908_v4, %v1907_v54  ;;  %v1911_v31 = vmul.f32 %v1909_v28, %v1906_v18  ;;  %v1929_v2 = vmul.f32 %v1925_v14, %v1920_v56  ;;  %v1930_v6 = vmul.f32 %v1926_v12, %v1919_v15  ;;  %v1978_v14 = vld [vmem:[%s5038_s4 + $0x10] sm:$0x3]  ;;  %v1979_v12 = vld [vmem:[%s5038_s4 + $0x18] sm:$0x3]  ;;  %v1991_v54 = vld [vmem:[%s5038_s4 + $0x10] sm:$0xc] }
 0x56c   : > { %vm2096_vm7 = vcmp.lt.s32.totalorder %v3554_v7, 31  ;;  %vm2115_vm10 = vcmp.lt.s32.totalorder %v3554_v7, 30 }
 0x56d   : > { %v1931_v43 = vadd.f32 %v1929_v2, %v1910_v57  ;;  %v1932_v0 = vadd.f32 %v1930_v6, %v1911_v31 }
 0x56f   : > { %2299 = vrot.lane.b32.xlu0 %v4391_v40, %s3385_s27  ;;  %2301 = vrot.lane.b32.xlu1 %v4393_v38, %s3385_s27  ;;  %s3421_s27 = smov 114  }
 0x570   : > { %2282 = vrot.lane.b32.xlu2 %v4393_v38, %s3417_s28  ;;  %s3434_s28 = smov 80  }
 0x571   : > { %v1934_v58 = vpop.permute.xlu0 %1933  ;;  %v1936_v59 = vpop.permute.xlu1 %1935 }
 0x572   : > { %v1938_v48 = vsel %vm1937_vm11, %v1934_v58, %v1936_v59  ;;  %v1939_v3 = vsel %vm1937_vm11, %v1936_v59, %v1934_v58  ;;  %v4472_v20 = vpop.permute.xlu2 %2003  ;;  %vm2128_vm11 = vcmp.lt.s32.totalorder %v3554_v7, 29 }
 0x573   : > { %v1948_v55 = vmul.f32 %v1944_v34, %v1939_v3  ;;  %v1949_v17 = vmul.f32 %v1945_v29, %v1938_v48  ;;  %v2010_v48 = vld [vmem:[%s5038_s4 + $0x10] sm:$0x30]  ;;  %v2011_v3 = vld [vmem:[%s5038_s4 + $0x18] sm:$0x30] }
 0x575   : > { %v1950_v53 = vadd.f32 %v1948_v55, %v1931_v43  ;;  %v1951_v9 = vadd.f32 %v1949_v17, %v1932_v0 }
 0x577   : > { %2325 = vrot.lane.b32.xlu0 %v4393_v38, %s3384_s26  ;;  %2341 = vrot.lane.b32.xlu1 %v4391_v40, %s3418_s16 }
 0x578   : > { %2323 = vrot.lane.b32.xlu2 %v4391_v40, %s3384_s26  ;;  %s3425_s26 = smov 98  }
 0x579   : > { %v1955_v30 = vpop.permute.xlu0 %1954  ;;  %v1972_v26 = vpop.permute.xlu1 %1971 }
 0x57a   : > { %v1957_v47 = vsel %vm1956_vm12, %v1953_v33, %v1955_v30  ;;  %v1958_v8 = vsel %vm1956_vm12, %v1955_v30, %v1953_v33  ;;  %v1976_v4 = vsel %vm1975_vm13, %v1972_v26, %v1974_v22  ;;  %v1977_v28 = vsel %vm1975_vm13, %v1974_v22, %v1972_v26  ;;  %v2025_v16 = vpop.permute.xlu2 %2024  ;;  %v1992_v33 = vld [vmem:[%s5038_s4 + $0x18] sm:$0xc] }
 0x57b   : > { %v1967_v27 = vmul.f32 %v1963_v36, %v1958_v8  ;;  %v1968_v18 = vmul.f32 %v1964_v25, %v1957_v47  ;;  %v1980_v57 = vmul.f32 %v1978_v14, %v1977_v28  ;;  %v1981_v31 = vmul.f32 %v1979_v12, %v1976_v4 }
 0x57c   : > { %v1995_v22 = vrot.slane %v1991_v54, 2  ;;  %v1996_v42 = vrot.slane %v1992_v33, 2  ;;  %v2033_v25 = vrot.slane %v2029_v35, 6  ;;  %v2034_v30 = vrot.slane %v2030_v60, 6 }
 0x57d   : > { %v1969_v15 = vadd.f32 %v1967_v27, %v1950_v53  ;;  %v1970_v56 = vadd.f32 %v1968_v18, %v1951_v9  ;;  %v2014_v53 = vrot.slane %v2010_v48, 4  ;;  %v2015_v9 = vrot.slane %v2011_v3, 4  ;;  %v2080_v48 = vld [vmem:[%s5038_s4 + $0x20] sm:$0x30]  ;;  %v2081_v3 = vld [vmem:[%s5038_s4 + $0x28] sm:$0x30] }
 0x57e   : > { %v2084_v60 = vrot.slane %v2080_v48, 4  ;;  %vm2147_vm12 = vcmp.lt.s32.totalorder %v3554_v7, 19  ;;  %vm2166_vm13 = vcmp.lt.s32.totalorder %v3554_v7, 18 }
 0x57f   : > { %v1982_v2 = vadd.f32 %v1980_v57, %v1969_v15  ;;  %v1983_v6 = vadd.f32 %v1981_v31, %v1970_v56  ;;  %2360 = vrot.lane.b32.xlu0 %v4391_v40, %s3419_s23  ;;  %2362 = vrot.lane.b32.xlu1 %v4393_v38, %s3419_s23  ;;  %s3430_s23 = smov 93  }
 0x580   : > { %2343 = vrot.lane.b32.xlu2 %v4393_v38, %s3418_s16  ;;  %s3428_s16 = smov 95  }
 0x581   : > { %v1985_v37 = vpop.permute.xlu0 %1984  ;;  %v1987_v43 = vpop.permute.xlu1 %1986 }
 0x582   : > { %v1989_v0 = vsel %vm1988_vm14, %v1985_v37, %v1987_v43  ;;  %v1990_v34 = vsel %vm1988_vm14, %v1987_v43, %v1985_v37  ;;  %v4505_v29 = vpop.permute.xlu2 %2054  ;;  %vm2284_vm14 = vcmp.lt.s32.totalorder %v3554_v7, 2 }
 0x583   : > { %v1999_v58 = vmul.f32 %v1995_v22, %v1990_v34  ;;  %v2000_v59 = vmul.f32 %v1996_v42, %v1989_v0  ;;  %v2061_v0 = vld [vmem:[%s5038_s4 + $0x20] sm:$0xc]  ;;  %v2062_v34 = vld [vmem:[%s5038_s4 + $0x28] sm:$0xc] }
 0x585   : > { %v2001_v55 = vadd.f32 %v1999_v58, %v1982_v2  ;;  %v2002_v17 = vadd.f32 %v2000_v59, %v1983_v6 }
 0x587   : > { %2381 = vrot.lane.b32.xlu0 %v4393_v38, %s3420_s15  ;;  %2392 = vrot.lane.b32.xlu1 %v4391_v40, %s3421_s27 }
 0x588   : > { %2379 = vrot.lane.b32.xlu2 %v4391_v40, %s3420_s15  ;;  %s3435_s15 = smov 79  }
 0x589   : > { %v2006_v36 = vpop.permute.xlu0 %2005  ;;  %v2023_v26 = vpop.permute.xlu1 %2022 }
 0x58a   : > { %v2008_v47 = vsel %vm2007_vm15, %v4472_v20, %v2006_v36  ;;  %v2009_v8 = vsel %vm2007_vm15, %v2006_v36, %v4472_v20  ;;  %v2027_v14 = vsel %vm2026_vm8, %v2023_v26, %v2025_v16  ;;  %v2028_v12 = vsel %vm2026_vm8, %v2025_v16, %v2023_v26  ;;  %v2076_v4 = vpop.permute.xlu2 %2075  ;;  %v2048_v20 = vld [vmem:[%s5038_s4 + $0x20] sm:$0x3]  ;;  %v2049_v16 = vld [vmem:[%s5038_s4 + $0x28] sm:$0x3] }
 0x58b   : > { %v2018_v28 = vmul.f32 %v2014_v53, %v2009_v8  ;;  %v2019_v27 = vmul.f32 %v2015_v9, %v2008_v47  ;;  %v2037_v33 = vmul.f32 %v2033_v25, %v2028_v12  ;;  %v2038_v15 = vmul.f32 %v2034_v30, %v2027_v14  ;;  %v2099_v12 = vld [vmem:[%s5038_s4 + $0x20] sm:$0xc0] }
 0x58c   : > { %v2085_v53 = vrot.slane %v2081_v3, 4  ;;  %vm2383_vm15 = vcmp.lt.s32.totalorder %v3554_v7, 115  ;;  %vm2396_vm8 = vcmp.lt.s32.totalorder %v3554_v7, 114 }
 0x58d   : > { %v2020_v18 = vadd.f32 %v2018_v28, %v2001_v55  ;;  %v2021_v54 = vadd.f32 %v2019_v27, %v2002_v17  ;;  %v2065_v55 = vrot.slane %v2061_v0, 2  ;;  %v2066_v17 = vrot.slane %v2062_v34, 2  ;;  %v2100_v28 = vld [vmem:[%s5038_s4 + $0x28] sm:$0xc0]  ;;  %v2131_v0 = vld [vmem:[%s5038_s4 + $0x30] sm:$0xc] }
 0x58e   : > { %v2132_v34 = vld [vmem:[%s5038_s4 + $0x38] sm:$0xc]  ;;  %v2135_v3 = vrot.slane %v2131_v0, 2 }
 0x58f   : > { %v2039_v56 = vadd.f32 %v2037_v33, %v2020_v18  ;;  %v2040_v57 = vadd.f32 %v2038_v15, %v2021_v54  ;;  %2411 = vrot.lane.b32.xlu0 %v4391_v40, %s3383_s25  ;;  %2413 = vrot.lane.b32.xlu1 %v4393_v38, %s3383_s25 }
 0x590   : > { %2394 = vrot.lane.b32.xlu2 %v4393_v38, %s3421_s27  ;;  %s3423_s27 = smov 109  }
 0x591   : > { %v2042_v31 = vpop.permute.xlu0 %2041  ;;  %v2044_v2 = vpop.permute.xlu1 %2043 }
 0x592   : > { %v2046_v6 = vsel %vm2045_vm9, %v2042_v31, %v2044_v2  ;;  %v2047_v22 = vsel %vm2045_vm9, %v2044_v2, %v2042_v31  ;;  %v4538_v42 = vpop.permute.xlu2 %2111  ;;  %vm5047_vm9 = vcmp.lt.s32.totalorder %v3554_v7, 113 }
 0x593   : > { %v2050_v37 = vmul.f32 %v2048_v20, %v2047_v22  ;;  %v2051_v43 = vmul.f32 %v2049_v16, %v2046_v6 }
 0x595   : > { %v2052_v58 = vadd.f32 %v2050_v37, %v2039_v56  ;;  %v2053_v59 = vadd.f32 %v2051_v43, %v2040_v57  ;;  %v2104_v56 = vrot.slane %v2100_v28, 6 }
 0x597   : > { %2431 = vrot.lane.b32.xlu0 %v4393_v38, %s3382_s24  ;;  %2447 = vrot.lane.b32.xlu1 %v4391_v40, %s3389_s6 }
 0x598   : > { %2429 = vrot.lane.b32.xlu2 %v4391_v40, %s3382_s24  ;;  %s3422_s24 = smov 110  }
 0x599   : > { %v2057_v35 = vpop.permute.xlu0 %2056  ;;  %v2074_v9 = vpop.permute.xlu1 %2073 }
 0x59a   : > { %v2059_v36 = vsel %vm2058_vm0, %v4505_v29, %v2057_v35  ;;  %v2060_v25 = vsel %vm2058_vm0, %v2057_v35, %v4505_v29  ;;  %v2078_v30 = vsel %vm2077_vm1, %v2074_v9, %v2076_v4  ;;  %v2079_v26 = vsel %vm2077_vm1, %v2076_v4, %v2074_v9  ;;  %v2127_v47 = vpop.permute.xlu2 %2126  ;;  %vm5048_vm0 = vmmov %vm5047_vm9 }
 0x59b   : > { %v2069_v8 = vmul.f32 %v2065_v55, %v2060_v25  ;;  %v2070_v14 = vmul.f32 %v2066_v17, %v2059_v36  ;;  %v2088_v54 = vmul.f32 %v2084_v60, %v2079_v26  ;;  %v2089_v33 = vmul.f32 %v2085_v53, %v2078_v30  ;;  %v2150_v26 = vld [vmem:[%s5038_s4 + $0x30] sm:$0x30] }
 0x59c   : > { %v2103_v4 = vrot.slane %v2099_v12, 6  ;;  %v2136_v55 = vrot.slane %v2132_v34, 2  ;;  %vm5049_vm1 = vcmp.lt.s32.totalorder %v3554_v7, 112 }
 0x59d   : > { %v2071_v27 = vadd.f32 %v2069_v8, %v2052_v58  ;;  %v2072_v18 = vadd.f32 %v2070_v14, %v2053_v59  ;;  %v2118_v58 = vld [vmem:[%s5038_s4 + $0x30] sm:$0x3]  ;;  %v2119_v59 = vld [vmem:[%s5038_s4 + $0x38] sm:$0x3]  ;;  %v2151_v8 = vld [vmem:[%s5038_s4 + $0x38] sm:$0x30] }
 0x59f   : > { %v2090_v29 = vadd.f32 %v2088_v54, %v2071_v27  ;;  %v2091_v15 = vadd.f32 %v2089_v33, %v2072_v18  ;;  %2459 = vrot.lane.b32.xlu0 %v4391_v40, %s3422_s24  ;;  %2461 = vrot.lane.b32.xlu1 %v4393_v38, %s3422_s24  ;;  %v2155_v54 = vrot.slane %v2151_v8, 4 }
 0x5a0   : > { %2449 = vrot.lane.b32.xlu2 %v4393_v38, %s3389_s6  ;;  %s3424_s6 = smov 99  }
 0x5a1   : > { %v2093_v57 = vpop.permute.xlu0 %2092  ;;  %v2095_v20 = vpop.permute.xlu1 %2094 }
 0x5a2   : > { %v2097_v16 = vsel %vm2096_vm7, %v2093_v57, %v2095_v20  ;;  %v2098_v31 = vsel %vm2096_vm7, %v2095_v20, %v2093_v57  ;;  %v4573_v2 = vpop.permute.xlu2 %2162  ;;  %vm5050_vm7 = vmmov %vm5049_vm1 }
 0x5a3   : > { %v2107_v6 = vmul.f32 %v2103_v4, %v2098_v31  ;;  %v2108_v22 = vmul.f32 %v2104_v56, %v2097_v16  ;;  %v2169_v16 = vld [vmem:[%s5038_s4 + $0x30] sm:$0xc0]  ;;  %v2170_v31 = vld [vmem:[%s5038_s4 + $0x38] sm:$0xc0] }
 0x5a5   : > { %v2109_v37 = vadd.f32 %v2107_v6, %v2090_v29  ;;  %v2110_v43 = vadd.f32 %v2108_v22, %v2091_v15 }
 0x5a7   : > { %2480 = vrot.lane.b32.xlu0 %v4393_v38, %s3423_s27  ;;  %2497 = vrot.lane.b32.xlu1 %v4391_v40, %s3424_s6 }
 0x5a8   : > { %2478 = vrot.lane.b32.xlu2 %v4391_v40, %s3423_s27  ;;  %s3436_s27 = smov 78  }
 0x5a9   : > { %v2114_v48 = vpop.permute.xlu0 %2113  ;;  %v2125_v17 = vpop.permute.xlu1 %2124 }
 0x5aa   : > { %v2116_v35 = vsel %vm2115_vm10, %v4538_v42, %v2114_v48  ;;  %v2117_v60 = vsel %vm2115_vm10, %v2114_v48, %v4538_v42  ;;  %v2129_v53 = vsel %vm2128_vm11, %v2125_v17, %v2127_v47  ;;  %v2130_v9 = vsel %vm2128_vm11, %v2127_v47, %v2125_v17  ;;  %v2184_v36 = vpop.permute.xlu2 %2183  ;;  %v2187_v48 = vld [vmem:[%s5038_s4 + $0x40] sm:$0x3] }
 0x5ab   : > { %v2120_v25 = vmul.f32 %v2118_v58, %v2117_v60  ;;  %v2121_v30 = vmul.f32 %v2119_v59, %v2116_v35  ;;  %v2139_v28 = vmul.f32 %v2135_v3, %v2130_v9  ;;  %v2140_v27 = vmul.f32 %v2136_v55, %v2129_v53  ;;  %v2188_v3 = vld [vmem:[%s5038_s4 + $0x48] sm:$0x3]  ;;  %v2200_v9 = vld [vmem:[%s5038_s4 + $0x48] sm:$0xc] }
 0x5ac   : > { %v2154_v47 = vrot.slane %v2150_v26, 4  ;;  %vm2463_vm10 = vcmp.lt.s32.totalorder %v3554_v7, 110  ;;  %vm2482_vm11 = vcmp.lt.s32.totalorder %v3554_v7, 109 }
 0x5ad   : > { %v2122_v14 = vadd.f32 %v2120_v25, %v2109_v37  ;;  %v2123_v12 = vadd.f32 %v2121_v30, %v2110_v43  ;;  %v2173_v37 = vrot.slane %v2169_v16, 6  ;;  %v2174_v43 = vrot.slane %v2170_v31, 6  ;;  %v2236_v16 = vld [vmem:[%s5038_s4 + $0x40] sm:$0xc0]  ;;  %v2237_v31 = vld [vmem:[%s5038_s4 + $0x48] sm:$0xc0] }
 0x5af   : > { %v2141_v42 = vadd.f32 %v2139_v28, %v2122_v14  ;;  %v2142_v18 = vadd.f32 %v2140_v27, %v2123_v12  ;;  %2516 = vrot.lane.b32.xlu0 %v4391_v40, %s3425_s26  ;;  %2518 = vrot.lane.b32.xlu1 %v4393_v38, %s3425_s26  ;;  %v2204_v28 = vrot.slane %v2200_v9, 2 }
 0x5b0   : > { %2499 = vrot.lane.b32.xlu2 %v4393_v38, %s3424_s6 }
 0x5b1   : > { %v2144_v33 = vpop.permute.xlu0 %2143  ;;  %v2146_v29 = vpop.permute.xlu1 %2145 }
 0x5b2   : > { %v2148_v15 = vsel %vm2147_vm12, %v2144_v33, %v2146_v29  ;;  %v2149_v4 = vsel %vm2147_vm12, %v2146_v29, %v2144_v33  ;;  %v4606_v56 = vpop.permute.xlu2 %2211  ;;  %vm5051_vm12 = vcmp.lt.s32.totalorder %v3554_v7, 111 }
 0x5b3   : > { %v2158_v57 = vmul.f32 %v2154_v47, %v2149_v4  ;;  %v2159_v20 = vmul.f32 %v2155_v54, %v2148_v15  ;;  %v2217_v15 = vld [vmem:[%s5038_s4 + $0x40] sm:$0x30]  ;;  %v2218_v4 = vld [vmem:[%s5038_s4 + $0x48] sm:$0x30] }
 0x5b5   : > { %v2160_v6 = vadd.f32 %v2158_v57, %v2141_v42  ;;  %v2161_v22 = vadd.f32 %v2159_v20, %v2142_v18 }
 0x5b7   : > { %2531 = vrot.lane.b32.xlu0 %v4393_v38, %s3426_s9  ;;  %2548 = vrot.lane.b32.xlu1 %v4391_v40, %s3427_s10 }
 0x5b8   : > { %2529 = vrot.lane.b32.xlu2 %v4391_v40, %s3426_s9 }
 0x5b9   : > { %v2165_v0 = vpop.permute.xlu0 %2164  ;;  %v2182_v34 = vpop.permute.xlu1 %2181 }
 0x5ba   : > { %v2167_v58 = vsel %vm2166_vm13, %v4573_v2, %v2165_v0  ;;  %v2168_v59 = vsel %vm2166_vm13, %v2165_v0, %v4573_v2  ;;  %v2185_v55 = vsel %vm240_vm6, %v2182_v34, %v2184_v36  ;;  %v2186_v17 = vsel %vm240_vm6, %v2184_v36, %v2182_v34  ;;  %v2232_v35 = vpop.permute.xlu2 %2231  ;;  %v2199_v2 = vld [vmem:[%s5038_s4 + $0x40] sm:$0xc]  ;;  %vm5052_vm13 = vmmov %vm5051_vm12 }
 0x5bb   : > { %v2177_v60 = vmul.f32 %v2173_v37, %v2168_v59  ;;  %v2178_v53 = vmul.f32 %v2174_v43, %v2167_v58  ;;  %v2189_v26 = vmul.f32 %v2187_v48, %v2186_v17  ;;  %v2190_v8 = vmul.f32 %v2188_v3, %v2185_v55 }
 0x5bc   : > { %v2203_v36 = vrot.slane %v2199_v2, 2  ;;  %v2240_v43 = vrot.slane %v2236_v16, 6  ;;  %v2241_v0 = vrot.slane %v2237_v31, 6  ;;  %vm2252_vm6 = vcmp.lt.s32.totalorder %v3554_v7, 13 }
 0x5bd   : > { %v2179_v25 = vadd.f32 %v2177_v60, %v2160_v6  ;;  %v2180_v30 = vadd.f32 %v2178_v53, %v2161_v22  ;;  %v2221_v6 = vrot.slane %v2217_v15, 4  ;;  %v2222_v22 = vrot.slane %v2218_v4, 4  ;;  %v2287_v15 = vld [vmem:[%s5038_s4 + $0x50] sm:$0x30]  ;;  %v2288_v4 = vld [vmem:[%s5038_s4 + $0x58] sm:$0x30] }
 0x5be   : > { %v2291_v31 = vrot.slane %v2287_v15, 4  ;;  %v2348_v15 = vld [vmem:[%s5038_s4 + $0x60] sm:$0x30] }
 0x5bf   : > { %v2191_v14 = vadd.f32 %v2189_v26, %v2179_v25  ;;  %v2192_v12 = vadd.f32 %v2190_v8, %v2180_v30  ;;  %2567 = vrot.lane.b32.xlu0 %v4391_v40, %s3428_s16  ;;  %2569 = vrot.lane.b32.xlu1 %v4393_v38, %s3428_s16 }
 0x5c0   : > { %2550 = vrot.lane.b32.xlu2 %v4393_v38, %s3427_s10 }
 0x5c1   : > { %v2194_v27 = vpop.permute.xlu0 %2193  ;;  %v2196_v42 = vpop.permute.xlu1 %2195 }
 0x5c2   : > { %v2197_v18 = vsel %vm268_vm5, %v2194_v27, %v2196_v42  ;;  %v2198_v47 = vsel %vm268_vm5, %v2196_v42, %v2194_v27  ;;  %v4643_v54 = vpop.permute.xlu2 %2261  ;;  %vm2233_vm5 = vcmp.lt.s32.totalorder %v3554_v7, 14 }
 0x5c3   : > { %v2207_v33 = vmul.f32 %v2203_v36, %v2198_v47  ;;  %v2208_v29 = vmul.f32 %v2204_v28, %v2197_v18  ;;  %v2268_v18 = vld [vmem:[%s5038_s4 + $0x50] sm:$0xc]  ;;  %v2269_v47 = vld [vmem:[%s5038_s4 + $0x58] sm:$0xc] }
 0x5c5   : > { %v2209_v57 = vadd.f32 %v2207_v33, %v2191_v14  ;;  %v2210_v20 = vadd.f32 %v2208_v29, %v2192_v12 }
 0x5c7   : > { %2588 = vrot.lane.b32.xlu0 %v4393_v38, %s3429_s22  ;;  %2599 = vrot.lane.b32.xlu1 %v4391_v40, %s3430_s23 }
 0x5c8   : > { %2586 = vrot.lane.b32.xlu2 %v4391_v40, %s3429_s22 }
 0x5c9   : > { %v2214_v37 = vpop.permute.xlu0 %2213  ;;  %v2230_v34 = vpop.permute.xlu1 %2229 }
 0x5ca   : > { %v2215_v58 = vsel %vm296_vm4, %v4606_v56, %v2214_v37  ;;  %v2216_v59 = vsel %vm296_vm4, %v2214_v37, %v4606_v56  ;;  %v2234_v48 = vsel %vm2233_vm5, %v2230_v34, %v2232_v35  ;;  %v2235_v3 = vsel %vm2233_vm5, %v2232_v35, %v2230_v34  ;;  %v2283_v55 = vpop.permute.xlu2 %2282  ;;  %v2255_v56 = vld [vmem:[%s5038_s4 + $0x50] sm:$0x3]  ;;  %v2256_v35 = vld [vmem:[%s5038_s4 + $0x58] sm:$0x3] }
 0x5cb   : > { %v2225_v17 = vmul.f32 %v2221_v6, %v2216_v59  ;;  %v2226_v60 = vmul.f32 %v2222_v22, %v2215_v58  ;;  %v2244_v9 = vmul.f32 %v2240_v43, %v2235_v3  ;;  %v2245_v25 = vmul.f32 %v2241_v0, %v2234_v48  ;;  %v2305_v3 = vld [vmem:[%s5038_s4 + $0x50] sm:$0xc0] }
 0x5cc   : > { %vm2265_vm4 = vcmp.lt.s32.totalorder %v3554_v7, 3  ;;  %v2292_v6 = vrot.slane %v2288_v4, 4  ;;  %v2349_v4 = vld [vmem:[%s5038_s4 + $0x68] sm:$0x30]  ;;  %vm2501_vm5 = vcmp.lt.s32.totalorder %v3554_v7, 99 }
 0x5cd   : > { %v2227_v53 = vadd.f32 %v2225_v17, %v2209_v57  ;;  %v2228_v2 = vadd.f32 %v2226_v60, %v2210_v20  ;;  %v2272_v57 = vrot.slane %v2268_v18, 2  ;;  %v2273_v20 = vrot.slane %v2269_v47, 2  ;;  %v2306_v17 = vld [vmem:[%s5038_s4 + $0x58] sm:$0xc0] }
 0x5cf   : > { %v2246_v30 = vadd.f32 %v2244_v9, %v2227_v53  ;;  %v2247_v26 = vadd.f32 %v2245_v25, %v2228_v2  ;;  %2618 = vrot.lane.b32.xlu0 %v4391_v40, %s3431_s7  ;;  %2620 = vrot.lane.b32.xlu1 %v4393_v38, %s3431_s7 }
 0x5d0   : > { %2601 = vrot.lane.b32.xlu2 %v4393_v38, %s3430_s23 }
 0x5d1   : > { %v2249_v8 = vpop.permute.xlu0 %2248  ;;  %v2251_v14 = vpop.permute.xlu1 %2250 }
 0x5d2   : > { %v2253_v12 = vsel %vm2252_vm6, %v2249_v8, %v2251_v14  ;;  %v2254_v36 = vsel %vm2252_vm6, %v2251_v14, %v2249_v8  ;;  %v4677_v28 = vpop.permute.xlu2 %2323  ;;  %vm2520_vm6 = vcmp.lt.s32.totalorder %v3554_v7, 98 }
 0x5d3   : > { %v2257_v27 = vmul.f32 %v2255_v56, %v2254_v36  ;;  %v2258_v42 = vmul.f32 %v2256_v35, %v2253_v12 }
 0x5d5   : > { %v2259_v33 = vadd.f32 %v2257_v27, %v2246_v30  ;;  %v2260_v29 = vadd.f32 %v2258_v42, %v2247_v26  ;;  %v2329_v27 = vld [vmem:[%s5038_s4 + $0x60] sm:$0xc]  ;;  %v2330_v42 = vld [vmem:[%s5038_s4 + $0x68] sm:$0xc] }
 0x5d7   : > { %2639 = vrot.lane.b32.xlu0 %v4393_v38, %s3432_s29  ;;  %2656 = vrot.lane.b32.xlu1 %v4391_v40, %s3433_s30 }
 0x5d8   : > { %2637 = vrot.lane.b32.xlu2 %v4391_v40, %s3432_s29 }
 0x5d9   : > { %v2264_v16 = vpop.permute.xlu0 %2263  ;;  %v2281_v22 = vpop.permute.xlu1 %2280 }
 0x5da   : > { %v2266_v37 = vsel %vm2265_vm4, %v4643_v54, %v2264_v16  ;;  %v2267_v43 = vsel %vm2265_vm4, %v2264_v16, %v4643_v54  ;;  %v2285_v0 = vsel %vm2284_vm14, %v2281_v22, %v2283_v55  ;;  %v2286_v34 = vsel %vm2284_vm14, %v2283_v55, %v2281_v22  ;;  %v2344_v58 = vpop.permute.xlu2 %2343 }
 0x5db   : > { %v2276_v59 = vmul.f32 %v2272_v57, %v2267_v43  ;;  %v2277_v48 = vmul.f32 %v2273_v20, %v2266_v37  ;;  %v2295_v2 = vmul.f32 %v2291_v31, %v2286_v34  ;;  %v2296_v9 = vmul.f32 %v2292_v6, %v2285_v0 }
 0x5dc   : > { %v2309_v54 = vrot.slane %v2305_v3, 6  ;;  %v2310_v55 = vrot.slane %v2306_v17, 6  ;;  %v2333_v57 = vrot.slane %v2329_v27, 2  ;;  %v2334_v20 = vrot.slane %v2330_v42, 2 }
 0x5dd   : > { %v2278_v60 = vadd.f32 %v2276_v59, %v2259_v33  ;;  %v2279_v53 = vadd.f32 %v2277_v48, %v2260_v29  ;;  %v2317_v33 = vld [vmem:[%s5038_s4 + $0x60] sm:$0x3]  ;;  %v2318_v29 = vld [vmem:[%s5038_s4 + $0x68] sm:$0x3]  ;;  %v2352_v22 = vrot.slane %v2348_v15, 4  ;;  %v2353_v37 = vrot.slane %v2349_v4, 4 }
 0x5de   : > { %v2320_v16 = vmul.f32 %v2318_v29, %v4393_v38  ;;  %v2319_v6 = vmul.f32 %v2317_v33, %v4391_v40  ;;  %v2400_v15 = vld [vmem:[%s5038_s4 + $0x78] sm:$0xc]  ;;  %v2387_v4 = vld [vmem:[%s5038_s4 + $0x78] sm:$0x3]  ;;  %vm2533_vm4 = vcmp.lt.s32.totalorder %v3554_v7, 97  ;;  %vm2552_vm14 = vcmp.lt.s32.totalorder %v3554_v7, 96 }
 0x5df   : > { %v2297_v25 = vadd.f32 %v2295_v2, %v2278_v60  ;;  %v2298_v30 = vadd.f32 %v2296_v9, %v2279_v53  ;;  %2669 = vrot.lane.b32.xlu0 %v4391_v40, %s3434_s28  ;;  %2671 = vrot.lane.b32.xlu1 %v4393_v38, %s3434_s28  ;;  %v2367_v9 = vld [vmem:[%s5038_s4 + $0x60] sm:$0xc0] }
 0x5e0   : > { %2658 = vrot.lane.b32.xlu2 %v4393_v38, %s3433_s30 }
 0x5e1   : > { %v2300_v26 = vpop.permute.xlu0 %2299  ;;  %v2302_v56 = vpop.permute.xlu1 %2301 }
 0x5e2   : > { %v2303_v35 = vsel %vm324_vm3, %v2300_v26, %v2302_v56  ;;  %v2304_v8 = vsel %vm324_vm3, %v2302_v56, %v2300_v26  ;;  %v4713_v14 = vpop.permute.xlu2 %2379  ;;  %vm2345_vm3 = vcmp.lt.s32.totalorder %v3554_v7, 126  ;;  %v2371_v56 = vrot.slane %v2367_v9, 6 }
 0x5e3   : > { %v2313_v12 = vmul.f32 %v2309_v54, %v2304_v8  ;;  %v2314_v36 = vmul.f32 %v2310_v55, %v2303_v35 }
 0x5e5   : > { %v2315_v18 = vadd.f32 %v2313_v12, %v2297_v25  ;;  %v2316_v47 = vadd.f32 %v2314_v36, %v2298_v30  ;;  %v2368_v25 = vld [vmem:[%s5038_s4 + $0x68] sm:$0xc0] }
 0x5e6   : > { %v2372_v35 = vrot.slane %v2368_v25, 6 }
 0x5e7   : > { %2690 = vrot.lane.b32.xlu0 %v4393_v38, %s3435_s15  ;;  %2707 = vrot.lane.b32.xlu1 %v4391_v40, %s3436_s27  ;;  %v2321_v17 = vadd.f32 %v2319_v6, %v2315_v18  ;;  %v2322_v60 = vadd.f32 %v2320_v16, %v2316_v47  ;;  %v2404_v16 = vrot.slane %v2400_v15, 2  ;;  %v2436_v15 = vld [vmem:[%s5038_s4 + $0x78] sm:$0xc0] }
 0x5e8   : > { %2688 = vrot.lane.b32.xlu2 %v4391_v40, %s3435_s15 }
 0x5e9   : > { %v2326_v31 = vpop.permute.xlu0 %2325  ;;  %v2342_v43 = vpop.permute.xlu1 %2341 }
 0x5ea   : > { %v2327_v0 = vsel %vm356_vm2, %v4677_v28, %v2326_v31  ;;  %v2328_v34 = vsel %vm356_vm2, %v2326_v31, %v4677_v28  ;;  %v2346_v59 = vsel %vm2345_vm3, %v2342_v43, %v2344_v58  ;;  %v2347_v48 = vsel %vm2345_vm3, %v2344_v58, %v2342_v43  ;;  %v2395_v3 = vpop.permute.xlu2 %2394 }
 0x5eb   : > { %v2337_v53 = vmul.f32 %v2333_v57, %v2327_v0  ;;  %v2338_v2 = vmul.f32 %v2334_v20, %v2328_v34  ;;  %v2356_v55 = vmul.f32 %v2352_v22, %v2346_v59  ;;  %v2357_v26 = vmul.f32 %v2353_v37, %v2347_v48 }
 0x5ec   : > { %vm2364_vm2 = vcmp.lt.s32.totalorder %v3554_v7, 125  ;;  %vm2571_vm3 = vcmp.lt.s32.totalorder %v3554_v7, 95 }
 0x5ed   : > { %v2339_v30 = vadd.f32 %v2337_v53, %v2321_v17  ;;  %v2340_v54 = vadd.f32 %v2338_v2, %v2322_v60 }
 0x5ef   : > { %v2358_v28 = vadd.f32 %v2356_v55, %v2339_v30  ;;  %v2359_v58 = vadd.f32 %v2357_v26, %v2340_v54  ;;  %2726 = vrot.lane.b32.xlu0 %v4391_v40, %s3437_s17  ;;  %2728 = vrot.lane.b32.xlu1 %v4393_v38, %s3437_s17  ;;  %v2399_v40 = vld [vmem:[%s5038_s4 + $0x70] sm:$0xc] }
 0x5f0   : > { %2709 = vrot.lane.b32.xlu2 %v4393_v38, %s3436_s27  ;;  %v2386_v38 = vld [vmem:[%s5038_s4 + $0x70] sm:$0x3]  ;;  %v2403_v20 = vrot.slane %v2399_v40, 2  ;;  %v2435_v40 = vld [vmem:[%s5038_s4 + $0x70] sm:$0xc0]  ;;  %s224_s27 = scalar_lea.vmem %s5039_s5, %s3192_s14 }
 0x5f1   : > { %v2361_v8 = vpop.permute.xlu0 %2360  ;;  %v2363_v12 = vpop.permute.xlu1 %2362 }
 0x5f2   : > { %v2365_v36 = vsel %vm2364_vm2, %v2361_v8, %v2363_v12  ;;  %v2366_v27 = vsel %vm2364_vm2, %v2363_v12, %v2361_v8  ;;  %v2430_v42 = vpop.permute.xlu2 %2429  ;;  %vm2590_vm2 = vcmp.lt.s32.totalorder %v3554_v7, 94 }
 0x5f3   : > { %v2375_v18 = vmul.f32 %v2371_v56, %v2365_v36  ;;  %v2376_v47 = vmul.f32 %v2372_v35, %v2366_v27 }
 0x5f5   : > { %v2377_v33 = vadd.f32 %v2375_v18, %v2358_v28  ;;  %v2378_v29 = vadd.f32 %v2376_v47, %v2359_v58  ;;  %v2417_v47 = vld [vmem:[%s5038_s4 + $0x70] sm:$0x30] }
 0x5f9   : > { %v2382_v57 = vpop.permute.xlu0 %2381  ;;  %v2393_v31 = vpop.permute.xlu1 %2392 }
 0x5fa   : > { %v2384_v6 = vsel %vm2383_vm15, %v4713_v14, %v2382_v57  ;;  %v2385_v22 = vsel %vm2383_vm15, %v2382_v57, %v4713_v14  ;;  %v2397_v37 = vsel %vm2396_vm8, %v2393_v31, %v2395_v3  ;;  %v2398_v43 = vsel %vm2396_vm8, %v2395_v3, %v2393_v31  ;;  %v2450_v0 = vpop.permute.xlu2 %2449 }
 0x5fb   : > { %v2388_v34 = vmul.f32 %v2386_v38, %v2384_v6  ;;  %v2389_v59 = vmul.f32 %v2387_v4, %v2385_v22  ;;  %v2407_v60 = vmul.f32 %v2403_v20, %v2397_v37  ;;  %v2408_v53 = vmul.f32 %v2404_v16, %v2398_v43 }
 0x5fc   : > { %v2421_v38 = vrot.slane %v2417_v47, 4  ;;  %v2439_v16 = vrot.slane %v2435_v40, 6  ;;  %v2440_v31 = vrot.slane %v2436_v15, 6  ;;  %v2453_v15 = vld [vmem:[%s5038_s4 + $0x80] sm:$0x3]  ;;  %vm2603_vm15 = vcmp.lt.s32.totalorder %v3554_v7, 93 }
 0x5fd   : > { %v2390_v48 = vadd.f32 %v2388_v34, %v2377_v33  ;;  %v2391_v17 = vadd.f32 %v2389_v59, %v2378_v29  ;;  %v2418_v33 = vld [vmem:[%s5038_s4 + $0x78] sm:$0x30]  ;;  %v2466_v34 = vld [vmem:[%s5038_s4 + $0x80] sm:$0xc]  ;;  %vm2622_vm8 = vcmp.lt.s32.totalorder %v3554_v7, 83 }
 0x5fe   : > { %v2422_v4 = vrot.slane %v2418_v33, 4 }
 0x5ff   : > { %v2409_v2 = vadd.f32 %v2407_v60, %v2390_v48  ;;  %v2410_v9 = vadd.f32 %v2408_v53, %v2391_v17  ;;  %v2467_v17 = vld [vmem:[%s5038_s4 + $0x88] sm:$0xc] }
 0x600   : > { %v2471_v40 = vrot.slane %v2467_v17, 2 }
 0x601   : > { %v2412_v25 = vpop.permute.xlu0 %2411  ;;  %v2414_v30 = vpop.permute.xlu1 %2413 }
 0x602   : > { %v2479_v54 = vpop.permute.xlu2 %2478  ;;  %v2415_v57 = vsel %vm5047_vm9, %v2412_v25, %v2414_v30  ;;  %v2416_v20 = vsel %vm5048_vm0, %v2414_v30, %v2412_v25  ;;  %v2470_v25 = vrot.slane %v2466_v34, 2  ;;  %v2486_v30 = vld [vmem:[%s5038_s4 + $0x88] sm:$0x30]  ;;  %vm2641_vm9 = vcmp.lt.s32.totalorder %v3554_v7, 82 }
 0x603   : > { %v2425_v37 = vmul.f32 %v2421_v38, %v2415_v57  ;;  %v2426_v43 = vmul.f32 %v2422_v4, %v2416_v20  ;;  %v2454_v38 = vld [vmem:[%s5038_s4 + $0x88] sm:$0x3]  ;;  %vm2660_vm0 = vcmp.lt.s32.totalorder %v3554_v7, 81 }
 0x605   : > { %v2427_v47 = vadd.f32 %v2425_v37, %v2409_v2  ;;  %v2428_v33 = vadd.f32 %v2426_v43, %v2410_v9 }
 0x609   : > { %v2432_v55 = vpop.permute.xlu0 %2431  ;;  %v2448_v26 = vpop.permute.xlu1 %2447 }
 0x60a   : > { %v4773_v28 = vpop.permute.xlu2 %2499  ;;  %v2433_v6 = vsel %vm5049_vm1, %v2430_v42, %v2432_v55  ;;  %v2434_v22 = vsel %vm5050_vm7, %v2432_v55, %v2430_v42  ;;  %v2485_v42 = vld [vmem:[%s5038_s4 + $0x80] sm:$0x30]  ;;  %v2451_v4 = vsel %vm5051_vm12, %v2448_v26, %v2450_v0  ;;  %v2452_v57 = vsel %vm5052_vm13, %v2450_v0, %v2448_v26  ;;  %v2505_v0 = vld [vmem:[%s5038_s4 + $0x88] sm:$0xc0] }
 0x60b   : > { %v2443_v60 = vmul.f32 %v2439_v16, %v2433_v6  ;;  %v2444_v53 = vmul.f32 %v2440_v31, %v2434_v22  ;;  %v2489_v31 = vrot.slane %v2485_v42, 4  ;;  %v2490_v6 = vrot.slane %v2486_v30, 4 }
 0x60c   : > { %v2455_v43 = vmul.f32 %v2453_v15, %v2451_v4  ;;  %v2456_v34 = vmul.f32 %v2454_v38, %v2452_v57  ;;  %v2509_v30 = vrot.slane %v2505_v0, 6  ;;  %vm2673_vm1 = vcmp.lt.s32.totalorder %v3554_v7, 80 }
 0x60d   : > { %v2445_v9 = vadd.f32 %v2443_v60, %v2427_v47  ;;  %v2446_v16 = vadd.f32 %v2444_v53, %v2428_v33  ;;  %v2536_v60 = vld [vmem:[%s5038_s4 + $0x90] sm:$0xc]  ;;  %v2537_v53 = vld [vmem:[%s5038_s4 + $0x98] sm:$0xc]  ;;  %vm2692_vm7 = vcmp.lt.s32.totalorder %v3554_v7, 79 }
 0x60e   : > { %v2540_v4 = vrot.slane %v2536_v60, 2  ;;  %v2541_v57 = vrot.slane %v2537_v53, 2 }
 0x60f   : > { %v2458_v26 = vadd.f32 %v2456_v34, %v2446_v16 }
 0x611   : > { %v2460_v58 = vpop.permute.xlu0 %2459  ;;  %v2462_v14 = vpop.permute.xlu1 %2461 }
 0x612   : > { %v4775_v56 = vpop.permute.xlu2 %2529  ;;  %v2464_v20 = vsel %vm2463_vm10, %v2460_v58, %v2462_v14  ;;  %v2465_v2 = vsel %vm2463_vm10, %v2462_v14, %v2460_v58  ;;  %vm2711_vm10 = vcmp.lt.s32.totalorder %v3554_v7, 78 }
 0x613   : > { %v2474_v17 = vmul.f32 %v2470_v25, %v2464_v20  ;;  %v2475_v45 = vmul.f32 %v2471_v40, %v2465_v2  ;;  %v2524_v40 = vld [vmem:[%s5038_s4 + $0x98] sm:$0x3] }
 0x615   : > { %v2477_v42 = vadd.f32 %v2475_v45, %v2458_v26 }
 0x619   : > { %v2481_v3 = vpop.permute.xlu0 %2480  ;;  %v4777_v35 = vpop.permute.xlu1 %2497 }
 0x61a   : > { %v4779_v8 = vpop.permute.xlu2 %2550  ;;  %v2483_v22 = vsel %vm2482_vm11, %v2479_v54, %v2481_v3  ;;  %v2484_v37 = vsel %vm2482_vm11, %v2481_v3, %v2479_v54  ;;  %v2457_v54 = vadd.f32 %v2455_v43, %v2445_v9  ;;  %v2508_v3 = vrot.slane %v2504_v39, 6  ;;  %v2523_v39 = vld [vmem:[%s5038_s4 + $0x90] sm:$0x3] }
 0x61b   : > { %v2493_v58 = vmul.f32 %v2489_v31, %v2483_v22  ;;  %v2494_v14 = vmul.f32 %v2490_v6, %v2484_v37  ;;  %v2502_v47 = vsel %vm2501_vm5, %v4777_v35, %v4773_v28  ;;  %v2503_v33 = vsel %vm2501_vm5, %v4773_v28, %v4777_v35  ;;  %v2574_v22 = vld [vmem:[%s5038_s4 + $0x90] sm:$0xc0] }
 0x61c   : > { %v2476_v25 = vadd.f32 %v2474_v17, %v2457_v54  ;;  %v2512_v9 = vmul.f32 %v2508_v3, %v2502_v47  ;;  %v2513_v16 = vmul.f32 %v2509_v30, %v2503_v33  ;;  %vm2730_vm11 = vcmp.lt.s32.totalorder %v3554_v7, 77 }
 0x61d   : > { %v2496_v35 = vadd.f32 %v2494_v14, %v2477_v42 }
 0x61e   : > { %v2495_v28 = vadd.f32 %v2493_v58, %v2476_v25  ;;  %v2578_v58 = vrot.slane %v2574_v22, 6  ;;  %v2644_v22 = vld [vmem:[%s5038_s4 + $0xa0] sm:$0xc0] }
 0x61f   : > { %v2515_v34 = vadd.f32 %v2513_v16, %v2496_v35 }
 0x621   : > { %v4781_v12 = vpop.permute.xlu0 %2516  ;;  %v4783_v36 = vpop.permute.xlu1 %2518 }
 0x622   : > { %v4795_v29 = vpop.permute.xlu2 %2586  ;;  %v2521_v45 = vsel %vm2520_vm6, %v4781_v12, %v4783_v36  ;;  %v2522_v15 = vsel %vm2520_vm6, %v4783_v36, %v4781_v12  ;;  %v2555_v12 = vld [vmem:[%s5038_s4 + $0x90] sm:$0x30]  ;;  %v2556_v36 = vld [vmem:[%s5038_s4 + $0x98] sm:$0x30] }
 0x623   : > { %v2525_v31 = vmul.f32 %v2523_v39, %v2521_v45  ;;  %v2526_v6 = vmul.f32 %v2524_v40, %v2522_v15  ;;  %v2559_v54 = vrot.slane %v2555_v12, 4  ;;  %v2560_v26 = vrot.slane %v2556_v36, 4  ;;  %v2606_v39 = vld [vmem:[%s5038_s4 + $0xa0] sm:$0xc] }
 0x625   : > { %v2528_v3 = vadd.f32 %v2526_v6, %v2515_v34 }
 0x629   : > { %v4785_v27 = vpop.permute.xlu0 %2531  ;;  %v4787_v18 = vpop.permute.xlu1 %2548 }
 0x62a   : > { %v4828_v55 = vpop.permute.xlu2 %2601  ;;  %v2534_v20 = vsel %vm2533_vm4, %v4775_v56, %v4785_v27  ;;  %v2535_v2 = vsel %vm2533_vm4, %v4785_v27, %v4775_v56  ;;  %v2575_v56 = vld [vmem:[%s5038_s4 + $0x98] sm:$0xc0]  ;;  %v2514_v27 = vadd.f32 %v2512_v9, %v2495_v28  ;;  %v2553_v53 = vsel %vm2552_vm14, %v4787_v18, %v4779_v8 }
 0x62b   : > { %v2544_v17 = vmul.f32 %v2540_v4, %v2534_v20  ;;  %v2545_v0 = vmul.f32 %v2541_v57, %v2535_v2  ;;  %v2579_v60 = vrot.slane %v2575_v56, 6  ;;  %v2554_v25 = vsel %vm2552_vm14, %v4779_v8, %v4787_v18  ;;  %v2593_v8 = vld [vmem:[%s5038_s4 + $0xa0] sm:$0x3]  ;;  %v2594_v18 = vld [vmem:[%s5038_s4 + $0xa8] sm:$0x3] }
 0x62c   : > { %v2527_v14 = vadd.f32 %v2525_v31, %v2514_v27  ;;  %v2563_v45 = vmul.f32 %v2559_v54, %v2553_v53  ;;  %v2564_v15 = vmul.f32 %v2560_v26, %v2554_v25  ;;  %v2607_v4 = vld [vmem:[%s5038_s4 + $0xa8] sm:$0xc]  ;;  %v2625_v57 = vld [vmem:[%s5038_s4 + $0xa0] sm:$0x30]  ;;  %v2610_v9 = vrot.slane %v2606_v39, 2 }
 0x62d   : > { %v2547_v33 = vadd.f32 %v2545_v0, %v2528_v3  ;;  %v2611_v12 = vrot.slane %v2607_v4, 2  ;;  %v2629_v36 = vrot.slane %v2625_v57, 4  ;;  %v2645_v56 = vld [vmem:[%s5038_s4 + $0xa8] sm:$0xc0] }
 0x62e   : > { %v2546_v47 = vadd.f32 %v2544_v17, %v2527_v14  ;;  %v2649_v53 = vrot.slane %v2645_v56, 6 }
 0x62f   : > { %v2566_v16 = vadd.f32 %v2564_v15, %v2547_v33  ;;  %v2695_v15 = vld [vmem:[%s5038_s4 + $0xb0] sm:$0x30] }
 0x631   : > { %v4814_v59 = vpop.permute.xlu0 %2567  ;;  %v4816_v48 = vpop.permute.xlu1 %2569 }
 0x632   : > { %v4878_v38 = vpop.permute.xlu2 %2637  ;;  %v2572_v42 = vsel %vm2571_vm3, %v4814_v59, %v4816_v48  ;;  %v2573_v30 = vsel %vm2571_vm3, %v4816_v48, %v4814_v59 }
 0x633   : > { %v2582_v28 = vmul.f32 %v2578_v58, %v2572_v42  ;;  %v2583_v35 = vmul.f32 %v2579_v60, %v2573_v30  ;;  %v2648_v60 = vrot.slane %v2644_v22, 6 }
 0x635   : > { %v2585_v34 = vadd.f32 %v2583_v35, %v2566_v16 }
 0x639   : > { %v4844_v52 = vpop.permute.xlu0 %2588  ;;  %v4846_v41 = vpop.permute.xlu1 %2599 }
 0x63a   : > { %v2591_v40 = vsel %vm2590_vm2, %v4795_v29, %v4844_v52  ;;  %v2592_v59 = vsel %vm2590_vm2, %v4844_v52, %v4795_v29  ;;  %v2659_v48 = vpop.permute.xlu2 %2658  ;;  %v2626_v52 = vld [vmem:[%s5038_s4 + $0xa8] sm:$0x30]  ;;  %v2565_v29 = vadd.f32 %v2563_v45, %v2546_v47  ;;  %v2604_v0 = vsel %vm2603_vm15, %v4846_v41, %v4828_v55 }
 0x63b   : > { %v2595_v31 = vmul.f32 %v2593_v8, %v2591_v40  ;;  %v2596_v6 = vmul.f32 %v2594_v18, %v2592_v59  ;;  %v2630_v17 = vrot.slane %v2626_v52, 4  ;;  %v2605_v54 = vsel %vm2603_vm15, %v4828_v55, %v4846_v41  ;;  %v2676_v41 = vld [vmem:[%s5038_s4 + $0xb0] sm:$0xc] }
 0x63c   : > { %v2584_v27 = vadd.f32 %v2582_v28, %v2565_v29  ;;  %v2614_v30 = vmul.f32 %v2610_v9, %v2604_v0  ;;  %v2615_v47 = vmul.f32 %v2611_v12, %v2605_v54  ;;  %v2680_v45 = vrot.slane %v2676_v41, 2  ;;  %v2696_v28 = vld [vmem:[%s5038_s4 + $0xb8] sm:$0x30]  ;;  %v2664_v9 = vld [vmem:[%s5038_s4 + $0xb8] sm:$0x3] }
 0x63d   : > { %v2598_v3 = vadd.f32 %v2596_v6, %v2585_v34  ;;  %v2700_v22 = vrot.slane %v2696_v28, 4 }
 0x63e   : > { %v2597_v14 = vadd.f32 %v2595_v31, %v2584_v27 }
 0x641   : > { %v2619_v37 = vpop.permute.xlu0 %2618  ;;  %v2621_v43 = vpop.permute.xlu1 %2620 }
 0x642   : > { %v2623_v26 = vsel %vm2622_vm8, %v2619_v37, %v2621_v43  ;;  %v2624_v58 = vsel %vm2622_vm8, %v2621_v43, %v2619_v37  ;;  %v2677_v37 = vld [vmem:[%s5038_s4 + $0xb8] sm:$0xc]  ;;  %v2616_v43 = vadd.f32 %v2614_v30, %v2597_v14  ;;  %v2689_v18 = vpop.permute.xlu2 %2688 }
 0x643   : > { %v2633_v33 = vmul.f32 %v2629_v36, %v2623_v26  ;;  %v2634_v39 = vmul.f32 %v2630_v17, %v2624_v58  ;;  %v2681_v57 = vrot.slane %v2677_v37, 2  ;;  %v2699_v36 = vrot.slane %v2695_v15, 4  ;;  %v2715_v58 = vld [vmem:[%s5038_s4 + $0xb8] sm:$0xc0]  ;;  %v2733_v37 = vld [vmem:[%s5038_s4 + $0xc0] sm:$0x3] }
 0x645   : > { %v2635_v35 = vadd.f32 %v2633_v33, %v2616_v43  ;;  %v2719_v33 = vrot.slane %v2715_v58, 6  ;;  %v2734_v43 = vld [vmem:[%s5038_s4 + $0xc8] sm:$0x3] }
 0x649   : > { %v2640_v20 = vpop.permute.xlu0 %2639  ;;  %v2657_v2 = vpop.permute.xlu1 %2656 }
 0x64a   : > { %v2642_v25 = vsel %vm2641_vm9, %v4878_v38, %v2640_v20  ;;  %v2643_v42 = vsel %vm2641_vm9, %v2640_v20, %v4878_v38  ;;  %v2617_v38 = vadd.f32 %v2615_v47, %v2598_v3  ;;  %v2663_v20 = vld [vmem:[%s5038_s4 + $0xb0] sm:$0x3]  ;;  %v2661_v52 = vsel %vm2660_vm0, %v2657_v2, %v2659_v48 }
 0x64b   : > { %v2652_v40 = vmul.f32 %v2648_v60, %v2642_v25  ;;  %v2653_v59 = vmul.f32 %v2649_v53, %v2643_v42  ;;  %v2662_v29 = vsel %vm2660_vm0, %v2659_v48, %v2657_v2  ;;  %v2665_v56 = vmul.f32 %v2663_v20, %v2661_v52  ;;  %v2714_v2 = vld [vmem:[%s5038_s4 + $0xb0] sm:$0xc0]  ;;  %v2710_v25 = vpop.permute.xlu2 %2709 }
 0x64c   : > { %v2636_v4 = vadd.f32 %v2634_v39, %v2617_v38  ;;  %v2666_v27 = vmul.f32 %v2664_v9, %v2662_v29  ;;  %v2718_v47 = vrot.slane %v2714_v2, 6 }
 0x64d   : > { %v2654_v6 = vadd.f32 %v2652_v40, %v2635_v35 }
 0x64e   : > { %v2655_v12 = vadd.f32 %v2653_v59, %v2636_v4 }
 0x64f   : > { %v2667_v14 = vadd.f32 %v2665_v56, %v2654_v6 }
 0x650   : > { %v2668_v3 = vadd.f32 %v2666_v27, %v2655_v12 }
 0x651   : > { %v2670_v8 = vpop.permute.xlu0 %2669  ;;  %v2672_v55 = vpop.permute.xlu1 %2671 }
 0x652   : > { %v2674_v16 = vsel %vm2673_vm1, %v2670_v8, %v2672_v55  ;;  %v2675_v31 = vsel %vm2673_vm1, %v2672_v55, %v2670_v8 }
 0x653   : > { %v2684_v34 = vmul.f32 %v2680_v45, %v2674_v16  ;;  %v2685_v17 = vmul.f32 %v2681_v57, %v2675_v31 }
 0x655   : > { %v2686_v42 = vadd.f32 %v2684_v34, %v2667_v14  ;;  %v2687_v30 = vadd.f32 %v2685_v17, %v2668_v3 }
 0x659   : > { %v2691_v0 = vpop.permute.xlu0 %2690  ;;  %v2708_v54 = vpop.permute.xlu1 %2707 }
 0x65a   : > { %v2693_v26 = vsel %vm2692_vm7, %v2689_v18, %v2691_v0  ;;  %v2694_v48 = vsel %vm2692_vm7, %v2691_v0, %v2689_v18  ;;  %v2712_v39 = vsel %vm2711_vm10, %v2708_v54, %v2710_v25  ;;  %v2713_v8 = vsel %vm2711_vm10, %v2710_v25, %v2708_v54 }
 0x65b   : > { %v2703_v60 = vmul.f32 %v2699_v36, %v2693_v26  ;;  %v2704_v53 = vmul.f32 %v2700_v22, %v2694_v48  ;;  %v2722_v38 = vmul.f32 %v2718_v47, %v2712_v39  ;;  %v2723_v18 = vmul.f32 %v2719_v33, %v2713_v8 }
 0x65d   : > { %v2705_v41 = vadd.f32 %v2703_v60, %v2686_v42  ;;  %v2706_v55 = vadd.f32 %v2704_v53, %v2687_v30  ;;  %v698_v53 = vadd.f32 %v4271_v51, %v4323_v10  ;;  %v756_v42 = vadd.f32 %v4269_v62, %v4323_v10 }
 0x65e   : > { %v700_v51 = vadd.f32 %v4275_v46, %v3855_v50  ;;  %v758_v62 = vadd.f32 %v4273_v63, %v3855_v50 }
 0x65f   : > { %v2724_v28 = vadd.f32 %v2722_v38, %v2705_v41  ;;  %v2725_v35 = vadd.f32 %v2723_v18, %v2706_v55  ;;  %v727_v10 = vadd.f32 %v4261_v23, %v698_v53 }
 0x661   : > { %v2727_v40 = vpop.permute.xlu0 %2726  ;;  %v2729_v59 = vpop.permute.xlu1 %2728 }
 0x662   : > { %v2731_v45 = vsel %vm2730_vm11, %v2727_v40, %v2729_v59  ;;  %v2732_v15 = vsel %vm2730_vm11, %v2729_v59, %v2727_v40 }
 0x663   : > { %v2735_v4 = vmul.f32 %v2733_v37, %v2731_v45  ;;  %v2736_v57 = vmul.f32 %v2734_v43, %v2732_v15  ;;  %v785_v43 = vadd.f32 %v4263_v61, %v756_v42  ;;  %v729_v61 = vadd.f32 %v4265_v44, %v700_v51 }
 0x665   : > { %v2737_v20 = vadd.f32 %v2735_v4, %v2724_v28  ;;  %v2738_v7 = vadd.f32 %v2736_v57, %v2725_v35  ;;  %v5053_v28 = vld [vmem:[#allocation5_spill] sm:$0xff] }
 0x667   : > { %v2741_v9 = vrot.slane %v2737_v20, 1  ;;  %v2742_v52 = vrot.slane %v2738_v7, 1 }
 0x669   : > { %v2745_v29 = vadd.f32 %v2741_v9, %v2737_v20  ;;  %v2746_v16 = vadd.f32 %v2742_v52, %v2738_v7 }
 0x66b   : > { %v3187_v31 = vmul.f32 -1.442695, %v2745_v29  ;;  %v3188_v6 = vmul.f32 -1.442695, %v2746_v16 }
 0x66d   : > { %3365 = vpow2.f32 %v3187_v31 }
 0x66e   : > { %3367 = vpow2.f32 %v3188_v6 }
 0x673   : > { %v3366_v12 = vpop.eup %3365 }
 0x674   : > { %v3368_v36 = vpop.eup %3367  ;;  %v2753_v22 = vadd.f32 1.0, %v3366_v12 }
 0x675   : > { %v2754_v56 = vadd.f32 1.0, %v3368_v36 }
 0x676   : > { %3369 = vrcp.f32 %v2753_v22  ;;  %v2766_v26 = vand.u32 2147483648, %v2753_v22  ;;  %v2764_v58 = vand.u32 2147483647, %v2753_v22  ;;  %vm2760_vm5 = vweird.f32 %v2753_v22 }
 0x677   : > { %3371 = vrcp.f32 %v2754_v56  ;;  %v2781_v14 = vand.u32 2147483648, %v2754_v56  ;;  %v2779_v60 = vand.u32 2147483647, %v2754_v56  ;;  %vm2775_vm4 = vweird.f32 %v2754_v56 }
 0x678   : > { %v2767_v30 = vor.u32 1.1754944e-38, %v2766_v26  ;;  %vm2765_vm14 = vcmp.eq.f32.partialorder %v2764_v58, 8.507059e+37 }
 0x679   : > { %v2782_v39 = vor.u32 1.1754944e-38, %v2781_v14  ;;  %vm2780_vm2 = vcmp.eq.f32.partialorder %v2779_v60, 8.507059e+37 }
 0x67c   : > { %v3370_v27 = vpop.eup %3369 }
 0x67d   : > { %v3372_v34 = vpop.eup %3371  ;;  %v2756_v17 = vmul.f32 %v3370_v27, %v2753_v22  ;;  %vm2761_vm12 = vweird.f32 %v3370_v27 }
 0x67e   : > { %v2771_v0 = vmul.f32 %v3372_v34, %v2754_v56  ;;  %vm2776_vm13 = vweird.f32 %v3372_v34  ;;  %vm2762_vm6 = vmor %vm2760_vm5, %vm2761_vm12 }
 0x67f   : > { %v2757_v54 = vsub.f32 1.0, %v2756_v17  ;;  %vm2777_vm3 = vmor %vm2775_vm4, %vm2776_vm13 }
 0x680   : > { %v2772_v48 = vsub.f32 1.0, %v2771_v0 }
 0x681   : > { %v2758_v2 = vmul.f32 %v3370_v27, %v2757_v54 }
 0x682   : > { %v2773_v3 = vmul.f32 %v3372_v34, %v2772_v48 }
 0x683   : > { %v2759_v25 = vadd.f32 %v3370_v27, %v2758_v2 }
 0x684   : > { %v2774_v47 = vadd.f32 %v3372_v34, %v2773_v3 }
 0x685   : > { %v2763_v33 = vsel %vm2762_vm6, %v3370_v27, %v2759_v25 }
 0x686   : > { %v2768_v8 = vsel %vm2765_vm14, %v2767_v30, %v2763_v33  ;;  %v2778_v41 = vsel %vm2777_vm3, %v3372_v34, %v2774_v47 }
 0x687   : > { %v2783_v55 = vsel %vm2780_vm2, %v2782_v39, %v2778_v41  ;;  %v2785_v37 = vperm.slane %v2768_v8, 0 }
 0x688   : > { %v2786_v38 = vperm.slane %v2783_v55, 0 }
 0x689   : > { %v2787_v18 = vmul.f32 %v2785_v37, %v4358_v49  ;;  %v2789_v40 = vmul.f32 %v2785_v37, %v4352_v11  ;;  %v2791_v59 = vmul.f32 %v2785_v37, %v4368_v1  ;;  %v2793_v45 = vmul.f32 %v2785_v37, %v4374_v21  ;;  %v5054_v11 = vld [vmem:[#allocation7_spill] sm:$0xff] }
 0x68a   : > { %v2788_v46 = vmul.f32 %v2786_v38, %v4361_v13  ;;  %v2790_v15 = vmul.f32 %v2786_v38, %v4355_v5  ;;  %v2792_v50 = vmul.f32 %v2786_v38, %v4371_v24  ;;  %v2794_v23 = vmul.f32 %v2786_v38, %v4377_v19  ;;  %v5055_v13 = vld [vmem:[#allocation4_spill] sm:$0xff]  ;;  %v5056_v5 = vld [vmem:[#allocation6_spill] sm:$0xff] }
 0x68b   : > { %v2795_v63 = vadd.f32 %v2787_v18, %v3785_v32  ;;  %v2797_v49 = vadd.f32 %v2789_v40, %v5053_v28  ;;  %v2799_v35 = vadd.f32 %v2791_v59, %v727_v10  ;;  %v787_v1 = vadd.f32 %v5054_v11, %v758_v62 }
 0x68c   : > { %v2796_v21 = vadd.f32 %v2788_v46, %v5055_v13  ;;  %v2798_v4 = vadd.f32 %v2790_v15, %v5056_v5  ;;  %v2800_v24 = vadd.f32 %v2792_v50, %v785_v43  ;;  %v2801_v57 = vadd.f32 %v2793_v45, %v729_v61 }
 0x68d   : > { %v2803_v19 = vmax.f32 %v2795_v63, 0.0  ;;  %v2805_v20 = vmax.f32 %v2797_v49, 0.0  ;;  %v2802_v44 = vadd.f32 %v2794_v23, %v787_v1  ;;  %v2807_v9 = vmax.f32 %v2799_v35, 0.0 }
 0x68e   : > { %v2804_v7 = vmax.f32 %v2796_v21, 0.0  ;;  %v2806_v32 = vmax.f32 %v2798_v4, 0.0  ;;  %v2808_v52 = vmax.f32 %v2800_v24, 0.0  ;;  %v2809_v29 = vmax.f32 %v2801_v57, 0.0 }
 0x68f   : > { %2811 = vst [vmem:[%s224_s27] sm:$0xff] %v2803_v19  ;;  %v2810_v16 = vmax.f32 %v2802_v44, 0.0 }
 0x690   : > { %2812 = vst [vmem:[%s224_s27 + $0x8] sm:$0xff] %v2804_v7 }
 0x691   : > { %2813 = vst [vmem:[%s224_s27 + $0x10] sm:$0xff] %v2805_v20 }
 0x692   : > { %2814 = vst [vmem:[%s224_s27 + $0x18] sm:$0xff] %v2806_v32 }
 0x693   : > { %2815 = vst [vmem:[%s224_s27 + $0x20] sm:$0xff] %v2807_v9 }
 0x694   : > { %2816 = vst [vmem:[%s224_s27 + $0x28] sm:$0xff] %v2808_v52 }
 0x695   : > { %2817 = vst [vmem:[%s224_s27 + $0x30] sm:$0xff] %v2809_v29 }
 0x696   : > { %2818 = vst [vmem:[%s224_s27 + $0x38] sm:$0xff] %v2810_v16 }
 0x697 PF: > { %s15_s18 = sadd.s32 1, %s3380_s18  }
 0x698   : > { %p12_p4 = scmp.ge.s32.totalorder %s15_s18, 4  }
 0x69a   :  { %14 = sbr.rel (!%p12_p4) target bundleno = 1 (0x1), region = 78 }

</bundles_post_ra>
